<compile_context>
chip_gen: v6e
topology: v6e:2x2x1
jax: 0.10.0
libtpu: 0.0.40
codegen_flags: <defaults>
</compile_context>

<pallas_src>
import functools

import jax
import jax.numpy as jnp
from jax.experimental import pallas as pl
from jax.experimental.pallas import tpu as pltpu

KSIZE = 7    # conv kernel size (7x7)
PAD = 3      # 'same' padding
EPS = 1e-5   # PyTorch BatchNorm2d default eps
SLOPE = 0.1  # LeakyReLU negative slope

CHANNELS = [(2, 16), (16, 8), (8, 4), (4, 2)]   # (cin, cout) per conv layer


# ----------------------------------------------------------------------------
# Fused kernel: the whole encoder (4x [conv7x7+BN+LeakyReLU] -> flatten ->
# dense) for the full batch in one invocation.
#
# Activation layout: (N*H, W*C) with row index n*H + y and lane index x*C + c.
# Conv layer l:
#   stage(N*H, 7*W*cin) : column block ky holds the activation shifted by
#                         (ky - PAD) rows within each batch element (zeros
#                         where the shift runs off the image -> vertical pad).
#   out = stage @ Bcat_l            (horizontal padding is inside Bcat_l)
# ----------------------------------------------------------------------------
def _encoder_kernel(x_ref,
                    b1_ref, v1_ref, b2_ref, v2_ref,
                    b3_ref, v3_ref, b4_ref, v4_ref,
                    wd_ref, bd_ref,
                    out_ref,
                    s1_ref, s2_ref, s3_ref, s4_ref, flat_ref,
                    *, N, H):
    layers = ((b1_ref, v1_ref, s1_ref), (b2_ref, v2_ref, s2_ref),
              (b3_ref, v3_ref, s3_ref), (b4_ref, v4_ref, s4_ref))

    act = x_ref[...]                                   # (N*H, W*2) f32
    for b_ref, v_ref, st_ref in layers:
        wc = act.shape[-1]                             # = W * cin
        # Build the staging buffer: lane block ky = act shifted by (ky - PAD)
        # rows inside each batch element, zero where the shift falls outside.
        for ky in range(KSIZE):
            s = ky - PAD
            c0 = ky * wc
            if s == 0:
                st_ref[:, c0:c0 + wc] = act
            else:
                for n in range(N):
                    r0 = n * H
                    if s > 0:
                        st_ref[r0:r0 + H - s, c0:c0 + wc] = act[r0 + s:r0 + H, :]
                        st_ref[r0 + H - s:r0 + H, c0:c0 + wc] = (
                            jnp.zeros((s, wc), jnp.float32))
                    else:
                        t = -s
                        st_ref[r0:r0 + t, c0:c0 + wc] = (
                            jnp.zeros((t, wc), jnp.float32))
                        st_ref[r0 + t:r0 + H, c0:c0 + wc] = act[r0:r0 + H - t, :]
        # One deep-K MXU matmul per conv layer (bf16 operands, f32 accum).
        y = jnp.dot(st_ref[...].astype(jnp.bfloat16), b_ref[...],
                    preferred_element_type=jnp.float32)
        y = y + v_ref[...]                             # folded conv bias + BN
        act = jnp.maximum(y, SLOPE * y)                # LeakyReLU(0.1)

    # Flatten (N*H, W*c_last) -> (N, H*W*c_last).  The dense weight rows were
    # permuted on the host to this (y, x, c) order (PyTorch flattens NCHW).
    wc = act.shape[-1]                                 # = W * 2
    for yy in range(H):
        rows = [act[n * H + yy:n * H + yy + 1, :] for n in range(N)]
        blk = rows[0] if N == 1 else jnp.concatenate(rows, axis=0)
        flat_ref[:, yy * wc:(yy + 1) * wc] = blk       # (N, wc) lane block

    out = jnp.dot(flat_ref[...].astype(jnp.bfloat16), wd_ref[...],
                  preferred_element_type=jnp.float32) + bd_ref[...]
    out_ref[...] = out.astype(out_ref.dtype)


# ----------------------------------------------------------------------------
# Host-side parameter preparation (run ONCE, outside the jitted forward).
# ----------------------------------------------------------------------------
def _build_banded(w_hwio, scale, W):
    """(7,7,cin,cout) HWIO weights (BN scale folded) -> (7*W*cin, W*cout)."""
    k, _, cin, cout = w_hwio.shape
    w = w_hwio * scale.reshape(1, 1, 1, cout)
    xin = jnp.arange(W)[:, None]
    xout = jnp.arange(W)[None, :]
    kx = xin - xout + PAD                              # (W, W)
    valid = (kx >= 0) & (kx < k)
    kxc = jnp.clip(kx, 0, k - 1)
    b5 = w[:, kxc]                                     # (k, xin, xout, ci, co)
    b5 = jnp.where(valid[None, :, :, None, None], b5, 0.0)
    b5 = b5.transpose(0, 1, 3, 2, 4).reshape(k, W * cin, W * cout)
    return b5.reshape(k * W * cin, W * cout)           # ky-concat along K


def prepare_params(params, H, W, latent_dim):
    """One-time prep: fold BN, build banded conv matrices, permute dense."""
    prepped = []
    for i, (cin, cout) in enumerate(CHANNELS):
        p = params[f"conv{i + 1}"]
        scale = p["gamma"] * jax.lax.rsqrt(p["var"] + EPS)
        shift = p["beta"] + (p["b"] - p["mean"]) * scale
        prepped.append(_build_banded(p["w"], scale, W).astype(jnp.bfloat16))
        prepped.append(jnp.tile(shift, W).reshape(1, W * cout)
                       .astype(jnp.float32))
    d = params["dense"]
    c_last = CHANNELS[-1][1]
    # Permute dense weight rows from PyTorch's NCHW flatten (c, y, x) order to
    # the kernel's (y, x, c) activation order.
    wd = d["w"].reshape(c_last, H, W, latent_dim).transpose(1, 2, 0, 3)
    prepped.append(wd.reshape(H * W * c_last, latent_dim).astype(jnp.bfloat16))
    prepped.append(d["b"].reshape(1, latent_dim).astype(jnp.float32))
    return tuple(prepped)


# ----------------------------------------------------------------------------
# Encoder forward (single fused, grid-less pallas_call).
# ----------------------------------------------------------------------------
@jax.jit
def encoder_forward(prepped, x_nchw):
    (b1, v1, b2, v2, b3, v3, b4, v4, wd, bd) = prepped
    N, Cin, H, W = x_nchw.shape
    latent_dim = wd.shape[1]

    # NCHW -> (N*H, W*Cin) with lane index x*Cin + c (tiny one-time relayout).
    x_rows = jnp.transpose(x_nchw, (0, 2, 3, 1)).reshape(N * H, W * Cin)
    x_rows = x_rows.astype(jnp.float32)

    kern = functools.partial(_encoder_kernel, N=N, H=H)
    vmem_spec = pl.BlockSpec(memory_space=pltpu.MemorySpace.VMEM)

    c_last = CHANNELS[-1][1]
    scratch = [pltpu.VMEM((N * H, KSIZE * W * cin), jnp.float32)
               for (cin, _) in CHANNELS]
    scratch.append(pltpu.VMEM((N, H * W * c_last), jnp.float32))

    return pl.pallas_call(
        kern,
        out_shape=jax.ShapeDtypeStruct((N, latent_dim), jnp.float32),
        in_specs=[vmem_spec] * 11,
        out_specs=vmem_spec,
        scratch_shapes=scratch,
    )(x_rows, b1, v1, b2, v2, b3, v3, b4, v4, wd, bd)


# ----------------------------------------------------------------------------
# Synthetic deterministic parameters + pure-JAX reference (eval-mode BN).
# ----------------------------------------------------------------------------
def init_params(key, n_chan, H, W, latent_dim):
    params = {}
    for i, (cin, cout) in enumerate(CHANNELS):
        key, k1, k2, k3, k4, k5, k6 = jax.random.split(key, 7)
        fan_in = cin * KSIZE * KSIZE
        params[f"conv{i + 1}"] = dict(
            w=jax.random.normal(k1, (KSIZE, KSIZE, cin, cout), jnp.float32)
              / jnp.sqrt(fan_in),
            b=0.1 * jax.random.normal(k2, (cout,), jnp.float32),
            gamma=1.0 + 0.1 * jax.random.normal(k3, (cout,), jnp.float32),
            beta=0.1 * jax.random.normal(k4, (cout,), jnp.float32),
            mean=0.1 * jax.random.normal(k5, (cout,), jnp.float32),
            var=1.0 + 0.1 * jax.random.uniform(k6, (cout,), jnp.float32),
        )
    key, kd1, kd2 = jax.random.split(key, 3)
    K = H * W * n_chan
    params["dense"] = dict(
        w=jax.random.normal(kd1, (K, latent_dim), jnp.float32) / jnp.sqrt(K),
        b=0.1 * jax.random.normal(kd2, (latent_dim,), jnp.float32),
    )
    return params


def encoder_reference(params, x_nchw):
    """Pure-JAX reference mirroring the PyTorch forward (eval-mode BN)."""
    x = x_nchw.astype(jnp.float32)
    for i in range(4):
        p = params[f"conv{i + 1}"]
        w_oihw = jnp.transpose(p["w"], (3, 2, 0, 1))
        x = jax.lax.conv_general_dilated(
            x, w_oihw, window_strides=(1, 1),
            padding=((PAD, PAD), (PAD, PAD)),
            dimension_numbers=("NCHW", "OIHW", "NCHW"))
        x = x + p["b"].reshape(1, -1, 1, 1)
        x = (x - p["mean"].reshape(1, -1, 1, 1)) / jnp.sqrt(
            p["var"].reshape(1, -1, 1, 1) + EPS)
        x = x * p["gamma"].reshape(1, -1, 1, 1) + p["beta"].reshape(1, -1, 1, 1)
        x = jnp.where(x >= 0, x, SLOPE * x)
    x = x.reshape(x.shape[0], -1)
    d = params["dense"]
    return x @ d["w"] + d["b"]


if __name__ == "__main__":
    # Module-consistent shapes: batch=2, in-chan=2 (fixed by conv1), H=W=16,
    # latent=32.
    N, n_chan, H, W, latent_dim = 2, 2, 16, 16, 32
    key = jax.random.PRNGKey(0)
    key, kx = jax.random.split(key)
    x = jax.random.normal(kx, (N, 2, H, W), jnp.float32)  # NCHW

    params = init_params(key, n_chan, H, W, latent_dim)

    # One-time host prep (hoisted out of the jitted forward).
    prepped = prepare_params(params, H, W, latent_dim)
    prepped = jax.block_until_ready(prepped)

    out = jax.block_until_ready(encoder_forward(prepped, x))
    assert out.shape == (N, latent_dim), out.shape

    ref = jax.block_until_ready(encoder_reference(params, x))
    # bf16 MXU operands with f32 accumulation -> slightly looser tolerance
    # than a pure-f32 comparison.
    assert jnp.allclose(out, ref, atol=2e-2, rtol=2e-2), (
        float(jnp.max(jnp.abs(out - ref))))

    print("KERNEL_OK")
</pallas_src>

<mosaic_0001>
module attributes {stable_mosaic.version = 11 : i64} {
  func.func @_encoder_kernel(%arg0: memref<32x32xf32, #tpu.memory_space<vmem>>, %arg1: memref<224x256xbf16, #tpu.memory_space<vmem>>, %arg2: memref<1x256xf32, #tpu.memory_space<vmem>>, %arg3: memref<1792x128xbf16, #tpu.memory_space<vmem>>, %arg4: memref<1x128xf32, #tpu.memory_space<vmem>>, %arg5: memref<896x64xbf16, #tpu.memory_space<vmem>>, %arg6: memref<1x64xf32, #tpu.memory_space<vmem>>, %arg7: memref<448x32xbf16, #tpu.memory_space<vmem>>, %arg8: memref<1x32xf32, #tpu.memory_space<vmem>>, %arg9: memref<512x32xbf16, #tpu.memory_space<vmem>>, %arg10: memref<1x32xf32, #tpu.memory_space<vmem>>, %arg11: memref<2x32xf32, #tpu.memory_space<vmem>>, %arg12: memref<32x224xf32, #tpu.memory_space<vmem>>, %arg13: memref<32x1792xf32, #tpu.memory_space<vmem>>, %arg14: memref<32x896xf32, #tpu.memory_space<vmem>>, %arg15: memref<32x448xf32, #tpu.memory_space<vmem>>, %arg16: memref<2x512xf32, #tpu.memory_space<vmem>>) attributes {dimension_semantics = [], scalar_prefetch = 0 : i64, scratch_operands = 5 : i64, tpu.core_type = #tpu.core_type<tc>} {
    %c0 = arith.constant 0 : index
    %c0_0 = arith.constant 0 : index
    %0 = vector.load %arg0[%c0, %c0_0] : memref<32x32xf32, #tpu.memory_space<vmem>>, vector<32x32xf32>
    %cst = arith.constant 0.000000e+00 : f32
    %1 = vector.broadcast %cst : f32 to vector<3x32xf32>
    %c0_1 = arith.constant 0 : index
    %c0_2 = arith.constant 0 : index
    %2 = vector.load %arg12[%c0_1, %c0_2] : memref<32x224xf32, #tpu.memory_space<vmem>>, vector<3x32xf32>
    tpu.vector_store %arg12[%c0_1, %c0_2], %1 {strides = array<i32>} : memref<32x224xf32, #tpu.memory_space<vmem>>, vector<3x32xf32>,
    %3 = vector.extract_strided_slice %0 {offsets = [0, 0], sizes = [13, 32], strides = [1, 1]} : vector<32x32xf32> to vector<13x32xf32>
    %c3 = arith.constant 3 : index
    %c0_3 = arith.constant 0 : index
    %4 = vector.load %arg12[%c3, %c0_3] : memref<32x224xf32, #tpu.memory_space<vmem>>, vector<13x32xf32>
    tpu.vector_store %arg12[%c3, %c0_3], %3 {strides = array<i32>} : memref<32x224xf32, #tpu.memory_space<vmem>>, vector<13x32xf32>,
    %cst_4 = arith.constant 0.000000e+00 : f32
    %5 = vector.broadcast %cst_4 : f32 to vector<3x32xf32>
    %c16 = arith.constant 16 : index
    %c0_5 = arith.constant 0 : index
    %6 = vector.load %arg12[%c16, %c0_5] : memref<32x224xf32, #tpu.memory_space<vmem>>, vector<3x32xf32>
    tpu.vector_store %arg12[%c16, %c0_5], %5 {strides = array<i32>} : memref<32x224xf32, #tpu.memory_space<vmem>>, vector<3x32xf32>,
    %7 = vector.extract_strided_slice %0 {offsets = [16, 0], sizes = [13, 32], strides = [1, 1]} : vector<32x32xf32> to vector<13x32xf32>
    %c19 = arith.constant 19 : index
    %c0_6 = arith.constant 0 : index
    %8 = vector.load %arg12[%c19, %c0_6] : memref<32x224xf32, #tpu.memory_space<vmem>>, vector<13x32xf32>
    tpu.vector_store %arg12[%c19, %c0_6], %7 {strides = array<i32>} : memref<32x224xf32, #tpu.memory_space<vmem>>, vector<13x32xf32>,
    %cst_7 = arith.constant 0.000000e+00 : f32
    %9 = vector.broadcast %cst_7 : f32 to vector<2x32xf32>
    %c0_8 = arith.constant 0 : index
    %c32 = arith.constant 32 : index
    %10 = vector.load %arg12[%c0_8, %c32] : memref<32x224xf32, #tpu.memory_space<vmem>>, vector<2x32xf32>
    tpu.vector_store %arg12[%c0_8, %c32], %9 {strides = array<i32>} : memref<32x224xf32, #tpu.memory_space<vmem>>, vector<2x32xf32>,
    %11 = vector.extract_strided_slice %0 {offsets = [0, 0], sizes = [14, 32], strides = [1, 1]} : vector<32x32xf32> to vector<14x32xf32>
    %c2 = arith.constant 2 : index
    %c32_9 = arith.constant 32 : index
    %12 = vector.load %arg12[%c2, %c32_9] : memref<32x224xf32, #tpu.memory_space<vmem>>, vector<14x32xf32>
    tpu.vector_store %arg12[%c2, %c32_9], %11 {strides = array<i32>} : memref<32x224xf32, #tpu.memory_space<vmem>>, vector<14x32xf32>,
    %cst_10 = arith.constant 0.000000e+00 : f32
    %13 = vector.broadcast %cst_10 : f32 to vector<2x32xf32>
    %c16_11 = arith.constant 16 : index
    %c32_12 = arith.constant 32 : index
    %14 = vector.load %arg12[%c16_11, %c32_12] : memref<32x224xf32, #tpu.memory_space<vmem>>, vector<2x32xf32>
    tpu.vector_store %arg12[%c16_11, %c32_12], %13 {strides = array<i32>} : memref<32x224xf32, #tpu.memory_space<vmem>>, vector<2x32xf32>,
    %15 = vector.extract_strided_slice %0 {offsets = [16, 0], sizes = [14, 32], strides = [1, 1]} : vector<32x32xf32> to vector<14x32xf32>
    %c18 = arith.constant 18 : index
    %c32_13 = arith.constant 32 : index
    %16 = vector.load %arg12[%c18, %c32_13] : memref<32x224xf32, #tpu.memory_space<vmem>>, vector<14x32xf32>
    tpu.vector_store %arg12[%c18, %c32_13], %15 {strides = array<i32>} : memref<32x224xf32, #tpu.memory_space<vmem>>, vector<14x32xf32>,
    %cst_14 = arith.constant 0.000000e+00 : f32
    %17 = vector.broadcast %cst_14 : f32 to vector<1x32xf32>
    %c0_15 = arith.constant 0 : index
    %c64 = arith.constant 64 : index
    %18 = vector.load %arg12[%c0_15, %c64] : memref<32x224xf32, #tpu.memory_space<vmem>>, vector<1x32xf32>
    tpu.vector_store %arg12[%c0_15, %c64], %17 {strides = array<i32>} : memref<32x224xf32, #tpu.memory_space<vmem>>, vector<1x32xf32>,
    %19 = vector.extract_strided_slice %0 {offsets = [0, 0], sizes = [15, 32], strides = [1, 1]} : vector<32x32xf32> to vector<15x32xf32>
    %c1 = arith.constant 1 : index
    %c64_16 = arith.constant 64 : index
    %20 = vector.load %arg12[%c1, %c64_16] : memref<32x224xf32, #tpu.memory_space<vmem>>, vector<15x32xf32>
    tpu.vector_store %arg12[%c1, %c64_16], %19 {strides = array<i32>} : memref<32x224xf32, #tpu.memory_space<vmem>>, vector<15x32xf32>,
    %cst_17 = arith.constant 0.000000e+00 : f32
    %21 = vector.broadcast %cst_17 : f32 to vector<1x32xf32>
    %c16_18 = arith.constant 16 : index
    %c64_19 = arith.constant 64 : index
    %22 = vector.load %arg12[%c16_18, %c64_19] : memref<32x224xf32, #tpu.memory_space<vmem>>, vector<1x32xf32>
    tpu.vector_store %arg12[%c16_18, %c64_19], %21 {strides = array<i32>} : memref<32x224xf32, #tpu.memory_space<vmem>>, vector<1x32xf32>,
    %23 = vector.extract_strided_slice %0 {offsets = [16, 0], sizes = [15, 32], strides = [1, 1]} : vector<32x32xf32> to vector<15x32xf32>
    %c17 = arith.constant 17 : index
    %c64_20 = arith.constant 64 : index
    %24 = vector.load %arg12[%c17, %c64_20] : memref<32x224xf32, #tpu.memory_space<vmem>>, vector<15x32xf32>
    tpu.vector_store %arg12[%c17, %c64_20], %23 {strides = array<i32>} : memref<32x224xf32, #tpu.memory_space<vmem>>, vector<15x32xf32>,
    %c0_21 = arith.constant 0 : index
    %c96 = arith.constant 96 : index
    %25 = vector.load %arg12[%c0_21, %c96] : memref<32x224xf32, #tpu.memory_space<vmem>>, vector<32x32xf32>
    tpu.vector_store %arg12[%c0_21, %c96], %0 {strides = array<i32>} : memref<32x224xf32, #tpu.memory_space<vmem>>, vector<32x32xf32>,
    %26 = vector.extract_strided_slice %0 {offsets = [1, 0], sizes = [15, 32], strides = [1, 1]} : vector<32x32xf32> to vector<15x32xf32>
    %c0_22 = arith.constant 0 : index
    %c128 = arith.constant 128 : index
    %27 = vector.load %arg12[%c0_22, %c128] : memref<32x224xf32, #tpu.memory_space<vmem>>, vector<15x32xf32>
    tpu.vector_store %arg12[%c0_22, %c128], %26 {strides = array<i32>} : memref<32x224xf32, #tpu.memory_space<vmem>>, vector<15x32xf32>,
    %cst_23 = arith.constant 0.000000e+00 : f32
    %28 = vector.broadcast %cst_23 : f32 to vector<1x32xf32>
    %c15 = arith.constant 15 : index
    %c128_24 = arith.constant 128 : index
    %29 = vector.load %arg12[%c15, %c128_24] : memref<32x224xf32, #tpu.memory_space<vmem>>, vector<1x32xf32>
    tpu.vector_store %arg12[%c15, %c128_24], %28 {strides = array<i32>} : memref<32x224xf32, #tpu.memory_space<vmem>>, vector<1x32xf32>,
    %30 = vector.extract_strided_slice %0 {offsets = [17, 0], sizes = [15, 32], strides = [1, 1]} : vector<32x32xf32> to vector<15x32xf32>
    %c16_25 = arith.constant 16 : index
    %c128_26 = arith.constant 128 : index
    %31 = vector.load %arg12[%c16_25, %c128_26] : memref<32x224xf32, #tpu.memory_space<vmem>>, vector<15x32xf32>
    tpu.vector_store %arg12[%c16_25, %c128_26], %30 {strides = array<i32>} : memref<32x224xf32, #tpu.memory_space<vmem>>, vector<15x32xf32>,
    %cst_27 = arith.constant 0.000000e+00 : f32
    %32 = vector.broadcast %cst_27 : f32 to vector<1x32xf32>
    %c31 = arith.constant 31 : index
    %c128_28 = arith.constant 128 : index
    %33 = vector.load %arg12[%c31, %c128_28] : memref<32x224xf32, #tpu.memory_space<vmem>>, vector<1x32xf32>
    tpu.vector_store %arg12[%c31, %c128_28], %32 {strides = array<i32>} : memref<32x224xf32, #tpu.memory_space<vmem>>, vector<1x32xf32>,
    %34 = vector.extract_strided_slice %0 {offsets = [2, 0], sizes = [14, 32], strides = [1, 1]} : vector<32x32xf32> to vector<14x32xf32>
    %c0_29 = arith.constant 0 : index
    %c160 = arith.constant 160 : index
    %35 = vector.load %arg12[%c0_29, %c160] : memref<32x224xf32, #tpu.memory_space<vmem>>, vector<14x32xf32>
    tpu.vector_store %arg12[%c0_29, %c160], %34 {strides = array<i32>} : memref<32x224xf32, #tpu.memory_space<vmem>>, vector<14x32xf32>,
    %cst_30 = arith.constant 0.000000e+00 : f32
    %36 = vector.broadcast %cst_30 : f32 to vector<2x32xf32>
    %c14 = arith.constant 14 : index
    %c160_31 = arith.constant 160 : index
    %37 = vector.load %arg12[%c14, %c160_31] : memref<32x224xf32, #tpu.memory_space<vmem>>, vector<2x32xf32>
    tpu.vector_store %arg12[%c14, %c160_31], %36 {strides = array<i32>} : memref<32x224xf32, #tpu.memory_space<vmem>>, vector<2x32xf32>,
    %38 = vector.extract_strided_slice %0 {offsets = [18, 0], sizes = [14, 32], strides = [1, 1]} : vector<32x32xf32> to vector<14x32xf32>
    %c16_32 = arith.constant 16 : index
    %c160_33 = arith.constant 160 : index
    %39 = vector.load %arg12[%c16_32, %c160_33] : memref<32x224xf32, #tpu.memory_space<vmem>>, vector<14x32xf32>
    tpu.vector_store %arg12[%c16_32, %c160_33], %38 {strides = array<i32>} : memref<32x224xf32, #tpu.memory_space<vmem>>, vector<14x32xf32>,
    %cst_34 = arith.constant 0.000000e+00 : f32
    %40 = vector.broadcast %cst_34 : f32 to vector<2x32xf32>
    %c30 = arith.constant 30 : index
    %c160_35 = arith.constant 160 : index
    %41 = vector.load %arg12[%c30, %c160_35] : memref<32x224xf32, #tpu.memory_space<vmem>>, vector<2x32xf32>
    tpu.vector_store %arg12[%c30, %c160_35], %40 {strides = array<i32>} : memref<32x224xf32, #tpu.memory_space<vmem>>, vector<2x32xf32>,
    %42 = vector.extract_strided_slice %0 {offsets = [3, 0], sizes = [13, 32], strides = [1, 1]} : vector<32x32xf32> to vector<13x32xf32>
    %c0_36 = arith.constant 0 : index
    %c192 = arith.constant 192 : index
    %43 = vector.load %arg12[%c0_36, %c192] : memref<32x224xf32, #tpu.memory_space<vmem>>, vector<13x32xf32>
    tpu.vector_store %arg12[%c0_36, %c192], %42 {strides = array<i32>} : memref<32x224xf32, #tpu.memory_space<vmem>>, vector<13x32xf32>,
    %cst_37 = arith.constant 0.000000e+00 : f32
    %44 = vector.broadcast %cst_37 : f32 to vector<3x32xf32>
    %c13 = arith.constant 13 : index
    %c192_38 = arith.constant 192 : index
    %45 = vector.load %arg12[%c13, %c192_38] : memref<32x224xf32, #tpu.memory_space<vmem>>, vector<3x32xf32>
    tpu.vector_store %arg12[%c13, %c192_38], %44 {strides = array<i32>} : memref<32x224xf32, #tpu.memory_space<vmem>>, vector<3x32xf32>,
    %46 = vector.extract_strided_slice %0 {offsets = [19, 0], sizes = [13, 32], strides = [1, 1]} : vector<32x32xf32> to vector<13x32xf32>
    %c16_39 = arith.constant 16 : index
    %c192_40 = arith.constant 192 : index
    %47 = vector.load %arg12[%c16_39, %c192_40] : memref<32x224xf32, #tpu.memory_space<vmem>>, vector<13x32xf32>
    tpu.vector_store %arg12[%c16_39, %c192_40], %46 {strides = array<i32>} : memref<32x224xf32, #tpu.memory_space<vmem>>, vector<13x32xf32>,
    %cst_41 = arith.constant 0.000000e+00 : f32
    %48 = vector.broadcast %cst_41 : f32 to vector<3x32xf32>
    %c29 = arith.constant 29 : index
    %c192_42 = arith.constant 192 : index
    %49 = vector.load %arg12[%c29, %c192_42] : memref<32x224xf32, #tpu.memory_space<vmem>>, vector<3x32xf32>
    tpu.vector_store %arg12[%c29, %c192_42], %48 {strides = array<i32>} : memref<32x224xf32, #tpu.memory_space<vmem>>, vector<3x32xf32>,
    %c0_43 = arith.constant 0 : index
    %c0_44 = arith.constant 0 : index
    %50 = vector.load %arg12[%c0_43, %c0_44] : memref<32x224xf32, #tpu.memory_space<vmem>>, vector<32x224xf32>
    %51 = arith.truncf %50 : vector<32x224xf32> to vector<32x224xbf16>
    %c0_45 = arith.constant 0 : index
    %c0_46 = arith.constant 0 : index
    %52 = vector.load %arg1[%c0_45, %c0_46] : memref<224x256xbf16, #tpu.memory_space<vmem>>, vector<224x256xbf16>
    %cst_47 = arith.constant dense<0.000000e+00> : vector<32x256xf32>
    %53 = tpu.matmul %51, %52, %cst_47 {dimension_numbers = #tpu.dot_dimension_numbers<[1], [0], [0], [1], [0, 0, 1, 1], [], []>} : vector<32x224xbf16>, vector<224x256xbf16>, vector<32x256xf32> -> vector<32x256xf32>
    %c0_48 = arith.constant 0 : index
    %c0_49 = arith.constant 0 : index
    %54 = vector.load %arg2[%c0_48, %c0_49] : memref<1x256xf32, #tpu.memory_space<vmem>>, vector<1x256xf32>
    %55 = vector.broadcast %54 : vector<1x256xf32> to vector<32x256xf32>
    %56 = arith.addf %53, %55 : vector<32x256xf32>
    %cst_50 = arith.constant 1.000000e-01 : f32
    %57 = vector.broadcast %cst_50 : f32 to vector<32x256xf32>
    %58 = arith.mulf %57, %56 : vector<32x256xf32>
    %59 = arith.maximumf %56, %58 : vector<32x256xf32>
    %cst_51 = arith.constant 0.000000e+00 : f32
    %60 = vector.broadcast %cst_51 : f32 to vector<3x256xf32>
    %c0_52 = arith.constant 0 : index
    %c0_53 = arith.constant 0 : index
    %61 = vector.load %arg13[%c0_52, %c0_53] : memref<32x1792xf32, #tpu.memory_space<vmem>>, vector<3x256xf32>
    tpu.vector_store %arg13[%c0_52, %c0_53], %60 {strides = array<i32>} : memref<32x1792xf32, #tpu.memory_space<vmem>>, vector<3x256xf32>,
    %62 = vector.extract_strided_slice %59 {offsets = [0, 0], sizes = [13, 256], strides = [1, 1]} : vector<32x256xf32> to vector<13x256xf32>
    %c3_54 = arith.constant 3 : index
    %c0_55 = arith.constant 0 : index
    %63 = vector.load %arg13[%c3_54, %c0_55] : memref<32x1792xf32, #tpu.memory_space<vmem>>, vector<13x256xf32>
    tpu.vector_store %arg13[%c3_54, %c0_55], %62 {strides = array<i32>} : memref<32x1792xf32, #tpu.memory_space<vmem>>, vector<13x256xf32>,
    %cst_56 = arith.constant 0.000000e+00 : f32
    %64 = vector.broadcast %cst_56 : f32 to vector<3x256xf32>
    %c16_57 = arith.constant 16 : index
    %c0_58 = arith.constant 0 : index
    %65 = vector.load %arg13[%c16_57, %c0_58] : memref<32x1792xf32, #tpu.memory_space<vmem>>, vector<3x256xf32>
    tpu.vector_store %arg13[%c16_57, %c0_58], %64 {strides = array<i32>} : memref<32x1792xf32, #tpu.memory_space<vmem>>, vector<3x256xf32>,
    %66 = vector.extract_strided_slice %59 {offsets = [16, 0], sizes = [13, 256], strides = [1, 1]} : vector<32x256xf32> to vector<13x256xf32>
    %c19_59 = arith.constant 19 : index
    %c0_60 = arith.constant 0 : index
    %67 = vector.load %arg13[%c19_59, %c0_60] : memref<32x1792xf32, #tpu.memory_space<vmem>>, vector<13x256xf32>
    tpu.vector_store %arg13[%c19_59, %c0_60], %66 {strides = array<i32>} : memref<32x1792xf32, #tpu.memory_space<vmem>>, vector<13x256xf32>,
    %cst_61 = arith.constant 0.000000e+00 : f32
    %68 = vector.broadcast %cst_61 : f32 to vector<2x256xf32>
    %c0_62 = arith.constant 0 : index
    %c256 = arith.constant 256 : index
    %69 = vector.load %arg13[%c0_62, %c256] : memref<32x1792xf32, #tpu.memory_space<vmem>>, vector<2x256xf32>
    tpu.vector_store %arg13[%c0_62, %c256], %68 {strides = array<i32>} : memref<32x1792xf32, #tpu.memory_space<vmem>>, vector<2x256xf32>,
    %70 = vector.extract_strided_slice %59 {offsets = [0, 0], sizes = [14, 256], strides = [1, 1]} : vector<32x256xf32> to vector<14x256xf32>
    %c2_63 = arith.constant 2 : index
    %c256_64 = arith.constant 256 : index
    %71 = vector.load %arg13[%c2_63, %c256_64] : memref<32x1792xf32, #tpu.memory_space<vmem>>, vector<14x256xf32>
    tpu.vector_store %arg13[%c2_63, %c256_64], %70 {strides = array<i32>} : memref<32x1792xf32, #tpu.memory_space<vmem>>, vector<14x256xf32>,
    %cst_65 = arith.constant 0.000000e+00 : f32
    %72 = vector.broadcast %cst_65 : f32 to vector<2x256xf32>
    %c16_66 = arith.constant 16 : index
    %c256_67 = arith.constant 256 : index
    %73 = vector.load %arg13[%c16_66, %c256_67] : memref<32x1792xf32, #tpu.memory_space<vmem>>, vector<2x256xf32>
    tpu.vector_store %arg13[%c16_66, %c256_67], %72 {strides = array<i32>} : memref<32x1792xf32, #tpu.memory_space<vmem>>, vector<2x256xf32>,
    %74 = vector.extract_strided_slice %59 {offsets = [16, 0], sizes = [14, 256], strides = [1, 1]} : vector<32x256xf32> to vector<14x256xf32>
    %c18_68 = arith.constant 18 : index
    %c256_69 = arith.constant 256 : index
    %75 = vector.load %arg13[%c18_68, %c256_69] : memref<32x1792xf32, #tpu.memory_space<vmem>>, vector<14x256xf32>
    tpu.vector_store %arg13[%c18_68, %c256_69], %74 {strides = array<i32>} : memref<32x1792xf32, #tpu.memory_space<vmem>>, vector<14x256xf32>,
    %cst_70 = arith.constant 0.000000e+00 : f32
    %76 = vector.broadcast %cst_70 : f32 to vector<1x256xf32>
    %c0_71 = arith.constant 0 : index
    %c512 = arith.constant 512 : index
    %77 = vector.load %arg13[%c0_71, %c512] : memref<32x1792xf32, #tpu.memory_space<vmem>>, vector<1x256xf32>
    tpu.vector_store %arg13[%c0_71, %c512], %76 {strides = array<i32>} : memref<32x1792xf32, #tpu.memory_space<vmem>>, vector<1x256xf32>,
    %78 = vector.extract_strided_slice %59 {offsets = [0, 0], sizes = [15, 256], strides = [1, 1]} : vector<32x256xf32> to vector<15x256xf32>
    %c1_72 = arith.constant 1 : index
    %c512_73 = arith.constant 512 : index
    %79 = vector.load %arg13[%c1_72, %c512_73] : memref<32x1792xf32, #tpu.memory_space<vmem>>, vector<15x256xf32>
    tpu.vector_store %arg13[%c1_72, %c512_73], %78 {strides = array<i32>} : memref<32x1792xf32, #tpu.memory_space<vmem>>, vector<15x256xf32>,
    %cst_74 = arith.constant 0.000000e+00 : f32
    %80 = vector.broadcast %cst_74 : f32 to vector<1x256xf32>
    %c16_75 = arith.constant 16 : index
    %c512_76 = arith.constant 512 : index
    %81 = vector.load %arg13[%c16_75, %c512_76] : memref<32x1792xf32, #tpu.memory_space<vmem>>, vector<1x256xf32>
    tpu.vector_store %arg13[%c16_75, %c512_76], %80 {strides = array<i32>} : memref<32x1792xf32, #tpu.memory_space<vmem>>, vector<1x256xf32>,
    %82 = vector.extract_strided_slice %59 {offsets = [16, 0], sizes = [15, 256], strides = [1, 1]} : vector<32x256xf32> to vector<15x256xf32>
    %c17_77 = arith.constant 17 : index
    %c512_78 = arith.constant 512 : index
    %83 = vector.load %arg13[%c17_77, %c512_78] : memref<32x1792xf32, #tpu.memory_space<vmem>>, vector<15x256xf32>
    tpu.vector_store %arg13[%c17_77, %c512_78], %82 {strides = array<i32>} : memref<32x1792xf32, #tpu.memory_space<vmem>>, vector<15x256xf32>,
    %c0_79 = arith.constant 0 : index
    %c768 = arith.constant 768 : index
    %84 = vector.load %arg13[%c0_79, %c768] : memref<32x1792xf32, #tpu.memory_space<vmem>>, vector<32x256xf32>
    tpu.vector_store %arg13[%c0_79, %c768], %59 {strides = array<i32>} : memref<32x1792xf32, #tpu.memory_space<vmem>>, vector<32x256xf32>,
    %85 = vector.extract_strided_slice %59 {offsets = [1, 0], sizes = [15, 256], strides = [1, 1]} : vector<32x256xf32> to vector<15x256xf32>
    %c0_80 = arith.constant 0 : index
    %c1024 = arith.constant 1024 : index
    %86 = vector.load %arg13[%c0_80, %c1024] : memref<32x1792xf32, #tpu.memory_space<vmem>>, vector<15x256xf32>
    tpu.vector_store %arg13[%c0_80, %c1024], %85 {strides = array<i32>} : memref<32x1792xf32, #tpu.memory_space<vmem>>, vector<15x256xf32>,
    %cst_81 = arith.constant 0.000000e+00 : f32
    %87 = vector.broadcast %cst_81 : f32 to vector<1x256xf32>
    %c15_82 = arith.constant 15 : index
    %c1024_83 = arith.constant 1024 : index
    %88 = vector.load %arg13[%c15_82, %c1024_83] : memref<32x1792xf32, #tpu.memory_space<vmem>>, vector<1x256xf32>
    tpu.vector_store %arg13[%c15_82, %c1024_83], %87 {strides = array<i32>} : memref<32x1792xf32, #tpu.memory_space<vmem>>, vector<1x256xf32>,
    %89 = vector.extract_strided_slice %59 {offsets = [17, 0], sizes = [15, 256], strides = [1, 1]} : vector<32x256xf32> to vector<15x256xf32>
    %c16_84 = arith.constant 16 : index
    %c1024_85 = arith.constant 1024 : index
    %90 = vector.load %arg13[%c16_84, %c1024_85] : memref<32x1792xf32, #tpu.memory_space<vmem>>, vector<15x256xf32>
    tpu.vector_store %arg13[%c16_84, %c1024_85], %89 {strides = array<i32>} : memref<32x1792xf32, #tpu.memory_space<vmem>>, vector<15x256xf32>,
    %cst_86 = arith.constant 0.000000e+00 : f32
    %91 = vector.broadcast %cst_86 : f32 to vector<1x256xf32>
    %c31_87 = arith.constant 31 : index
    %c1024_88 = arith.constant 1024 : index
    %92 = vector.load %arg13[%c31_87, %c1024_88] : memref<32x1792xf32, #tpu.memory_space<vmem>>, vector<1x256xf32>
    tpu.vector_store %arg13[%c31_87, %c1024_88], %91 {strides = array<i32>} : memref<32x1792xf32, #tpu.memory_space<vmem>>, vector<1x256xf32>,
    %93 = vector.extract_strided_slice %59 {offsets = [2, 0], sizes = [14, 256], strides = [1, 1]} : vector<32x256xf32> to vector<14x256xf32>
    %c0_89 = arith.constant 0 : index
    %c1280 = arith.constant 1280 : index
    %94 = vector.load %arg13[%c0_89, %c1280] : memref<32x1792xf32, #tpu.memory_space<vmem>>, vector<14x256xf32>
    tpu.vector_store %arg13[%c0_89, %c1280], %93 {strides = array<i32>} : memref<32x1792xf32, #tpu.memory_space<vmem>>, vector<14x256xf32>,
    %cst_90 = arith.constant 0.000000e+00 : f32
    %95 = vector.broadcast %cst_90 : f32 to vector<2x256xf32>
    %c14_91 = arith.constant 14 : index
    %c1280_92 = arith.constant 1280 : index
    %96 = vector.load %arg13[%c14_91, %c1280_92] : memref<32x1792xf32, #tpu.memory_space<vmem>>, vector<2x256xf32>
    tpu.vector_store %arg13[%c14_91, %c1280_92], %95 {strides = array<i32>} : memref<32x1792xf32, #tpu.memory_space<vmem>>, vector<2x256xf32>,
    %97 = vector.extract_strided_slice %59 {offsets = [18, 0], sizes = [14, 256], strides = [1, 1]} : vector<32x256xf32> to vector<14x256xf32>
    %c16_93 = arith.constant 16 : index
    %c1280_94 = arith.constant 1280 : index
    %98 = vector.load %arg13[%c16_93, %c1280_94] : memref<32x1792xf32, #tpu.memory_space<vmem>>, vector<14x256xf32>
    tpu.vector_store %arg13[%c16_93, %c1280_94], %97 {strides = array<i32>} : memref<32x1792xf32, #tpu.memory_space<vmem>>, vector<14x256xf32>,
    %cst_95 = arith.constant 0.000000e+00 : f32
    %99 = vector.broadcast %cst_95 : f32 to vector<2x256xf32>
    %c30_96 = arith.constant 30 : index
    %c1280_97 = arith.constant 1280 : index
    %100 = vector.load %arg13[%c30_96, %c1280_97] : memref<32x1792xf32, #tpu.memory_space<vmem>>, vector<2x256xf32>
    tpu.vector_store %arg13[%c30_96, %c1280_97], %99 {strides = array<i32>} : memref<32x1792xf32, #tpu.memory_space<vmem>>, vector<2x256xf32>,
    %101 = vector.extract_strided_slice %59 {offsets = [3, 0], sizes = [13, 256], strides = [1, 1]} : vector<32x256xf32> to vector<13x256xf32>
    %c0_98 = arith.constant 0 : index
    %c1536 = arith.constant 1536 : index
    %102 = vector.load %arg13[%c0_98, %c1536] : memref<32x1792xf32, #tpu.memory_space<vmem>>, vector<13x256xf32>
    tpu.vector_store %arg13[%c0_98, %c1536], %101 {strides = array<i32>} : memref<32x1792xf32, #tpu.memory_space<vmem>>, vector<13x256xf32>,
    %cst_99 = arith.constant 0.000000e+00 : f32
    %103 = vector.broadcast %cst_99 : f32 to vector<3x256xf32>
    %c13_100 = arith.constant 13 : index
    %c1536_101 = arith.constant 1536 : index
    %104 = vector.load %arg13[%c13_100, %c1536_101] : memref<32x1792xf32, #tpu.memory_space<vmem>>, vector<3x256xf32>
    tpu.vector_store %arg13[%c13_100, %c1536_101], %103 {strides = array<i32>} : memref<32x1792xf32, #tpu.memory_space<vmem>>, vector<3x256xf32>,
    %105 = vector.extract_strided_slice %59 {offsets = [19, 0], sizes = [13, 256], strides = [1, 1]} : vector<32x256xf32> to vector<13x256xf32>
    %c16_102 = arith.constant 16 : index
    %c1536_103 = arith.constant 1536 : index
    %106 = vector.load %arg13[%c16_102, %c1536_103] : memref<32x1792xf32, #tpu.memory_space<vmem>>, vector<13x256xf32>
    tpu.vector_store %arg13[%c16_102, %c1536_103], %105 {strides = array<i32>} : memref<32x1792xf32, #tpu.memory_space<vmem>>, vector<13x256xf32>,
    %cst_104 = arith.constant 0.000000e+00 : f32
    %107 = vector.broadcast %cst_104 : f32 to vector<3x256xf32>
    %c29_105 = arith.constant 29 : index
    %c1536_106 = arith.constant 1536 : index
    %108 = vector.load %arg13[%c29_105, %c1536_106] : memref<32x1792xf32, #tpu.memory_space<vmem>>, vector<3x256xf32>
    tpu.vector_store %arg13[%c29_105, %c1536_106], %107 {strides = array<i32>} : memref<32x1792xf32, #tpu.memory_space<vmem>>, vector<3x256xf32>,
    %c0_107 = arith.constant 0 : index
    %c0_108 = arith.constant 0 : index
    %109 = vector.load %arg13[%c0_107, %c0_108] : memref<32x1792xf32, #tpu.memory_space<vmem>>, vector<32x1792xf32>
    %110 = arith.truncf %109 : vector<32x1792xf32> to vector<32x1792xbf16>
    %c0_109 = arith.constant 0 : index
    %c0_110 = arith.constant 0 : index
    %111 = vector.load %arg3[%c0_109, %c0_110] : memref<1792x128xbf16, #tpu.memory_space<vmem>>, vector<1792x128xbf16>
    %cst_111 = arith.constant dense<0.000000e+00> : vector<32x128xf32>
    %112 = tpu.matmul %110, %111, %cst_111 {dimension_numbers = #tpu.dot_dimension_numbers<[1], [0], [0], [1], [0, 0, 1, 1], [], []>} : vector<32x1792xbf16>, vector<1792x128xbf16>, vector<32x128xf32> -> vector<32x128xf32>
    %c0_112 = arith.constant 0 : index
    %c0_113 = arith.constant 0 : index
    %113 = vector.load %arg4[%c0_112, %c0_113] : memref<1x128xf32, #tpu.memory_space<vmem>>, vector<1x128xf32>
    %114 = vector.broadcast %113 : vector<1x128xf32> to vector<32x128xf32>
    %115 = arith.addf %112, %114 : vector<32x128xf32>
    %cst_114 = arith.constant 1.000000e-01 : f32
    %116 = vector.broadcast %cst_114 : f32 to vector<32x128xf32>
    %117 = arith.mulf %116, %115 : vector<32x128xf32>
    %118 = arith.maximumf %115, %117 : vector<32x128xf32>
    %cst_115 = arith.constant 0.000000e+00 : f32
    %119 = vector.broadcast %cst_115 : f32 to vector<3x128xf32>
    %c0_116 = arith.constant 0 : index
    %c0_117 = arith.constant 0 : index
    %120 = vector.load %arg14[%c0_116, %c0_117] : memref<32x896xf32, #tpu.memory_space<vmem>>, vector<3x128xf32>
    tpu.vector_store %arg14[%c0_116, %c0_117], %119 {strides = array<i32>} : memref<32x896xf32, #tpu.memory_space<vmem>>, vector<3x128xf32>,
    %121 = vector.extract_strided_slice %118 {offsets = [0, 0], sizes = [13, 128], strides = [1, 1]} : vector<32x128xf32> to vector<13x128xf32>
    %c3_118 = arith.constant 3 : index
    %c0_119 = arith.constant 0 : index
    %122 = vector.load %arg14[%c3_118, %c0_119] : memref<32x896xf32, #tpu.memory_space<vmem>>, vector<13x128xf32>
    tpu.vector_store %arg14[%c3_118, %c0_119], %121 {strides = array<i32>} : memref<32x896xf32, #tpu.memory_space<vmem>>, vector<13x128xf32>,
    %cst_120 = arith.constant 0.000000e+00 : f32
    %123 = vector.broadcast %cst_120 : f32 to vector<3x128xf32>
    %c16_121 = arith.constant 16 : index
    %c0_122 = arith.constant 0 : index
    %124 = vector.load %arg14[%c16_121, %c0_122] : memref<32x896xf32, #tpu.memory_space<vmem>>, vector<3x128xf32>
    tpu.vector_store %arg14[%c16_121, %c0_122], %123 {strides = array<i32>} : memref<32x896xf32, #tpu.memory_space<vmem>>, vector<3x128xf32>,
    %125 = vector.extract_strided_slice %118 {offsets = [16, 0], sizes = [13, 128], strides = [1, 1]} : vector<32x128xf32> to vector<13x128xf32>
    %c19_123 = arith.constant 19 : index
    %c0_124 = arith.constant 0 : index
    %126 = vector.load %arg14[%c19_123, %c0_124] : memref<32x896xf32, #tpu.memory_space<vmem>>, vector<13x128xf32>
    tpu.vector_store %arg14[%c19_123, %c0_124], %125 {strides = array<i32>} : memref<32x896xf32, #tpu.memory_space<vmem>>, vector<13x128xf32>,
    %cst_125 = arith.constant 0.000000e+00 : f32
    %127 = vector.broadcast %cst_125 : f32 to vector<2x128xf32>
    %c0_126 = arith.constant 0 : index
    %c128_127 = arith.constant 128 : index
    %128 = vector.load %arg14[%c0_126, %c128_127] : memref<32x896xf32, #tpu.memory_space<vmem>>, vector<2x128xf32>
    tpu.vector_store %arg14[%c0_126, %c128_127], %127 {strides = array<i32>} : memref<32x896xf32, #tpu.memory_space<vmem>>, vector<2x128xf32>,
    %129 = vector.extract_strided_slice %118 {offsets = [0, 0], sizes = [14, 128], strides = [1, 1]} : vector<32x128xf32> to vector<14x128xf32>
    %c2_128 = arith.constant 2 : index
    %c128_129 = arith.constant 128 : index
    %130 = vector.load %arg14[%c2_128, %c128_129] : memref<32x896xf32, #tpu.memory_space<vmem>>, vector<14x128xf32>
    tpu.vector_store %arg14[%c2_128, %c128_129], %129 {strides = array<i32>} : memref<32x896xf32, #tpu.memory_space<vmem>>, vector<14x128xf32>,
    %cst_130 = arith.constant 0.000000e+00 : f32
    %131 = vector.broadcast %cst_130 : f32 to vector<2x128xf32>
    %c16_131 = arith.constant 16 : index
    %c128_132 = arith.constant 128 : index
    %132 = vector.load %arg14[%c16_131, %c128_132] : memref<32x896xf32, #tpu.memory_space<vmem>>, vector<2x128xf32>
    tpu.vector_store %arg14[%c16_131, %c128_132], %131 {strides = array<i32>} : memref<32x896xf32, #tpu.memory_space<vmem>>, vector<2x128xf32>,
    %133 = vector.extract_strided_slice %118 {offsets = [16, 0], sizes = [14, 128], strides = [1, 1]} : vector<32x128xf32> to vector<14x128xf32>
    %c18_133 = arith.constant 18 : index
    %c128_134 = arith.constant 128 : index
    %134 = vector.load %arg14[%c18_133, %c128_134] : memref<32x896xf32, #tpu.memory_space<vmem>>, vector<14x128xf32>
    tpu.vector_store %arg14[%c18_133, %c128_134], %133 {strides = array<i32>} : memref<32x896xf32, #tpu.memory_space<vmem>>, vector<14x128xf32>,
    %cst_135 = arith.constant 0.000000e+00 : f32
    %135 = vector.broadcast %cst_135 : f32 to vector<1x128xf32>
    %c0_136 = arith.constant 0 : index
    %c256_137 = arith.constant 256 : index
    %136 = vector.load %arg14[%c0_136, %c256_137] : memref<32x896xf32, #tpu.memory_space<vmem>>, vector<1x128xf32>
    tpu.vector_store %arg14[%c0_136, %c256_137], %135 {strides = array<i32>} : memref<32x896xf32, #tpu.memory_space<vmem>>, vector<1x128xf32>,
    %137 = vector.extract_strided_slice %118 {offsets = [0, 0], sizes = [15, 128], strides = [1, 1]} : vector<32x128xf32> to vector<15x128xf32>
    %c1_138 = arith.constant 1 : index
    %c256_139 = arith.constant 256 : index
    %138 = vector.load %arg14[%c1_138, %c256_139] : memref<32x896xf32, #tpu.memory_space<vmem>>, vector<15x128xf32>
    tpu.vector_store %arg14[%c1_138, %c256_139], %137 {strides = array<i32>} : memref<32x896xf32, #tpu.memory_space<vmem>>, vector<15x128xf32>,
    %cst_140 = arith.constant 0.000000e+00 : f32
    %139 = vector.broadcast %cst_140 : f32 to vector<1x128xf32>
    %c16_141 = arith.constant 16 : index
    %c256_142 = arith.constant 256 : index
    %140 = vector.load %arg14[%c16_141, %c256_142] : memref<32x896xf32, #tpu.memory_space<vmem>>, vector<1x128xf32>
    tpu.vector_store %arg14[%c16_141, %c256_142], %139 {strides = array<i32>} : memref<32x896xf32, #tpu.memory_space<vmem>>, vector<1x128xf32>,
    %141 = vector.extract_strided_slice %118 {offsets = [16, 0], sizes = [15, 128], strides = [1, 1]} : vector<32x128xf32> to vector<15x128xf32>
    %c17_143 = arith.constant 17 : index
    %c256_144 = arith.constant 256 : index
    %142 = vector.load %arg14[%c17_143, %c256_144] : memref<32x896xf32, #tpu.memory_space<vmem>>, vector<15x128xf32>
    tpu.vector_store %arg14[%c17_143, %c256_144], %141 {strides = array<i32>} : memref<32x896xf32, #tpu.memory_space<vmem>>, vector<15x128xf32>,
    %c0_145 = arith.constant 0 : index
    %c384 = arith.constant 384 : index
    %143 = vector.load %arg14[%c0_145, %c384] : memref<32x896xf32, #tpu.memory_space<vmem>>, vector<32x128xf32>
    tpu.vector_store %arg14[%c0_145, %c384], %118 {strides = array<i32>} : memref<32x896xf32, #tpu.memory_space<vmem>>, vector<32x128xf32>,
    %144 = vector.extract_strided_slice %118 {offsets = [1, 0], sizes = [15, 128], strides = [1, 1]} : vector<32x128xf32> to vector<15x128xf32>
    %c0_146 = arith.constant 0 : index
    %c512_147 = arith.constant 512 : index
    %145 = vector.load %arg14[%c0_146, %c512_147] : memref<32x896xf32, #tpu.memory_space<vmem>>, vector<15x128xf32>
    tpu.vector_store %arg14[%c0_146, %c512_147], %144 {strides = array<i32>} : memref<32x896xf32, #tpu.memory_space<vmem>>, vector<15x128xf32>,
    %cst_148 = arith.constant 0.000000e+00 : f32
    %146 = vector.broadcast %cst_148 : f32 to vector<1x128xf32>
    %c15_149 = arith.constant 15 : index
    %c512_150 = arith.constant 512 : index
    %147 = vector.load %arg14[%c15_149, %c512_150] : memref<32x896xf32, #tpu.memory_space<vmem>>, vector<1x128xf32>
    tpu.vector_store %arg14[%c15_149, %c512_150], %146 {strides = array<i32>} : memref<32x896xf32, #tpu.memory_space<vmem>>, vector<1x128xf32>,
    %148 = vector.extract_strided_slice %118 {offsets = [17, 0], sizes = [15, 128], strides = [1, 1]} : vector<32x128xf32> to vector<15x128xf32>
    %c16_151 = arith.constant 16 : index
    %c512_152 = arith.constant 512 : index
    %149 = vector.load %arg14[%c16_151, %c512_152] : memref<32x896xf32, #tpu.memory_space<vmem>>, vector<15x128xf32>
    tpu.vector_store %arg14[%c16_151, %c512_152], %148 {strides = array<i32>} : memref<32x896xf32, #tpu.memory_space<vmem>>, vector<15x128xf32>,
    %cst_153 = arith.constant 0.000000e+00 : f32
    %150 = vector.broadcast %cst_153 : f32 to vector<1x128xf32>
    %c31_154 = arith.constant 31 : index
    %c512_155 = arith.constant 512 : index
    %151 = vector.load %arg14[%c31_154, %c512_155] : memref<32x896xf32, #tpu.memory_space<vmem>>, vector<1x128xf32>
    tpu.vector_store %arg14[%c31_154, %c512_155], %150 {strides = array<i32>} : memref<32x896xf32, #tpu.memory_space<vmem>>, vector<1x128xf32>,
    %152 = vector.extract_strided_slice %118 {offsets = [2, 0], sizes = [14, 128], strides = [1, 1]} : vector<32x128xf32> to vector<14x128xf32>
    %c0_156 = arith.constant 0 : index
    %c640 = arith.constant 640 : index
    %153 = vector.load %arg14[%c0_156, %c640] : memref<32x896xf32, #tpu.memory_space<vmem>>, vector<14x128xf32>
    tpu.vector_store %arg14[%c0_156, %c640], %152 {strides = array<i32>} : memref<32x896xf32, #tpu.memory_space<vmem>>, vector<14x128xf32>,
    %cst_157 = arith.constant 0.000000e+00 : f32
    %154 = vector.broadcast %cst_157 : f32 to vector<2x128xf32>
    %c14_158 = arith.constant 14 : index
    %c640_159 = arith.constant 640 : index
    %155 = vector.load %arg14[%c14_158, %c640_159] : memref<32x896xf32, #tpu.memory_space<vmem>>, vector<2x128xf32>
    tpu.vector_store %arg14[%c14_158, %c640_159], %154 {strides = array<i32>} : memref<32x896xf32, #tpu.memory_space<vmem>>, vector<2x128xf32>,
    %156 = vector.extract_strided_slice %118 {offsets = [18, 0], sizes = [14, 128], strides = [1, 1]} : vector<32x128xf32> to vector<14x128xf32>
    %c16_160 = arith.constant 16 : index
    %c640_161 = arith.constant 640 : index
    %157 = vector.load %arg14[%c16_160, %c640_161] : memref<32x896xf32, #tpu.memory_space<vmem>>, vector<14x128xf32>
    tpu.vector_store %arg14[%c16_160, %c640_161], %156 {strides = array<i32>} : memref<32x896xf32, #tpu.memory_space<vmem>>, vector<14x128xf32>,
    %cst_162 = arith.constant 0.000000e+00 : f32
    %158 = vector.broadcast %cst_162 : f32 to vector<2x128xf32>
    %c30_163 = arith.constant 30 : index
    %c640_164 = arith.constant 640 : index
    %159 = vector.load %arg14[%c30_163, %c640_164] : memref<32x896xf32, #tpu.memory_space<vmem>>, vector<2x128xf32>
    tpu.vector_store %arg14[%c30_163, %c640_164], %158 {strides = array<i32>} : memref<32x896xf32, #tpu.memory_space<vmem>>, vector<2x128xf32>,
    %160 = vector.extract_strided_slice %118 {offsets = [3, 0], sizes = [13, 128], strides = [1, 1]} : vector<32x128xf32> to vector<13x128xf32>
    %c0_165 = arith.constant 0 : index
    %c768_166 = arith.constant 768 : index
    %161 = vector.load %arg14[%c0_165, %c768_166] : memref<32x896xf32, #tpu.memory_space<vmem>>, vector<13x128xf32>
    tpu.vector_store %arg14[%c0_165, %c768_166], %160 {strides = array<i32>} : memref<32x896xf32, #tpu.memory_space<vmem>>, vector<13x128xf32>,
    %cst_167 = arith.constant 0.000000e+00 : f32
    %162 = vector.broadcast %cst_167 : f32 to vector<3x128xf32>
    %c13_168 = arith.constant 13 : index
    %c768_169 = arith.constant 768 : index
    %163 = vector.load %arg14[%c13_168, %c768_169] : memref<32x896xf32, #tpu.memory_space<vmem>>, vector<3x128xf32>
    tpu.vector_store %arg14[%c13_168, %c768_169], %162 {strides = array<i32>} : memref<32x896xf32, #tpu.memory_space<vmem>>, vector<3x128xf32>,
    %164 = vector.extract_strided_slice %118 {offsets = [19, 0], sizes = [13, 128], strides = [1, 1]} : vector<32x128xf32> to vector<13x128xf32>
    %c16_170 = arith.constant 16 : index
    %c768_171 = arith.constant 768 : index
    %165 = vector.load %arg14[%c16_170, %c768_171] : memref<32x896xf32, #tpu.memory_space<vmem>>, vector<13x128xf32>
    tpu.vector_store %arg14[%c16_170, %c768_171], %164 {strides = array<i32>} : memref<32x896xf32, #tpu.memory_space<vmem>>, vector<13x128xf32>,
    %cst_172 = arith.constant 0.000000e+00 : f32
    %166 = vector.broadcast %cst_172 : f32 to vector<3x128xf32>
    %c29_173 = arith.constant 29 : index
    %c768_174 = arith.constant 768 : index
    %167 = vector.load %arg14[%c29_173, %c768_174] : memref<32x896xf32, #tpu.memory_space<vmem>>, vector<3x128xf32>
    tpu.vector_store %arg14[%c29_173, %c768_174], %166 {strides = array<i32>} : memref<32x896xf32, #tpu.memory_space<vmem>>, vector<3x128xf32>,
    %c0_175 = arith.constant 0 : index
    %c0_176 = arith.constant 0 : index
    %168 = vector.load %arg14[%c0_175, %c0_176] : memref<32x896xf32, #tpu.memory_space<vmem>>, vector<32x896xf32>
    %169 = arith.truncf %168 : vector<32x896xf32> to vector<32x896xbf16>
    %c0_177 = arith.constant 0 : index
    %c0_178 = arith.constant 0 : index
    %170 = vector.load %arg5[%c0_177, %c0_178] : memref<896x64xbf16, #tpu.memory_space<vmem>>, vector<896x64xbf16>
    %cst_179 = arith.constant dense<0.000000e+00> : vector<32x64xf32>
    %171 = tpu.matmul %169, %170, %cst_179 {dimension_numbers = #tpu.dot_dimension_numbers<[1], [0], [0], [1], [0, 0, 1, 1], [], []>} : vector<32x896xbf16>, vector<896x64xbf16>, vector<32x64xf32> -> vector<32x64xf32>
    %c0_180 = arith.constant 0 : index
    %c0_181 = arith.constant 0 : index
    %172 = vector.load %arg6[%c0_180, %c0_181] : memref<1x64xf32, #tpu.memory_space<vmem>>, vector<1x64xf32>
    %173 = vector.broadcast %172 : vector<1x64xf32> to vector<32x64xf32>
    %174 = arith.addf %171, %173 : vector<32x64xf32>
    %cst_182 = arith.constant 1.000000e-01 : f32
    %175 = vector.broadcast %cst_182 : f32 to vector<32x64xf32>
    %176 = arith.mulf %175, %174 : vector<32x64xf32>
    %177 = arith.maximumf %174, %176 : vector<32x64xf32>
    %cst_183 = arith.constant 0.000000e+00 : f32
    %178 = vector.broadcast %cst_183 : f32 to vector<3x64xf32>
    %c0_184 = arith.constant 0 : index
    %c0_185 = arith.constant 0 : index
    %179 = vector.load %arg15[%c0_184, %c0_185] : memref<32x448xf32, #tpu.memory_space<vmem>>, vector<3x64xf32>
    tpu.vector_store %arg15[%c0_184, %c0_185], %178 {strides = array<i32>} : memref<32x448xf32, #tpu.memory_space<vmem>>, vector<3x64xf32>,
    %180 = vector.extract_strided_slice %177 {offsets = [0, 0], sizes = [13, 64], strides = [1, 1]} : vector<32x64xf32> to vector<13x64xf32>
    %c3_186 = arith.constant 3 : index
    %c0_187 = arith.constant 0 : index
    %181 = vector.load %arg15[%c3_186, %c0_187] : memref<32x448xf32, #tpu.memory_space<vmem>>, vector<13x64xf32>
    tpu.vector_store %arg15[%c3_186, %c0_187], %180 {strides = array<i32>} : memref<32x448xf32, #tpu.memory_space<vmem>>, vector<13x64xf32>,
    %cst_188 = arith.constant 0.000000e+00 : f32
    %182 = vector.broadcast %cst_188 : f32 to vector<3x64xf32>
    %c16_189 = arith.constant 16 : index
    %c0_190 = arith.constant 0 : index
    %183 = vector.load %arg15[%c16_189, %c0_190] : memref<32x448xf32, #tpu.memory_space<vmem>>, vector<3x64xf32>
    tpu.vector_store %arg15[%c16_189, %c0_190], %182 {strides = array<i32>} : memref<32x448xf32, #tpu.memory_space<vmem>>, vector<3x64xf32>,
    %184 = vector.extract_strided_slice %177 {offsets = [16, 0], sizes = [13, 64], strides = [1, 1]} : vector<32x64xf32> to vector<13x64xf32>
    %c19_191 = arith.constant 19 : index
    %c0_192 = arith.constant 0 : index
    %185 = vector.load %arg15[%c19_191, %c0_192] : memref<32x448xf32, #tpu.memory_space<vmem>>, vector<13x64xf32>
    tpu.vector_store %arg15[%c19_191, %c0_192], %184 {strides = array<i32>} : memref<32x448xf32, #tpu.memory_space<vmem>>, vector<13x64xf32>,
    %cst_193 = arith.constant 0.000000e+00 : f32
    %186 = vector.broadcast %cst_193 : f32 to vector<2x64xf32>
    %c0_194 = arith.constant 0 : index
    %c64_195 = arith.constant 64 : index
    %187 = vector.load %arg15[%c0_194, %c64_195] : memref<32x448xf32, #tpu.memory_space<vmem>>, vector<2x64xf32>
    tpu.vector_store %arg15[%c0_194, %c64_195], %186 {strides = array<i32>} : memref<32x448xf32, #tpu.memory_space<vmem>>, vector<2x64xf32>,
    %188 = vector.extract_strided_slice %177 {offsets = [0, 0], sizes = [14, 64], strides = [1, 1]} : vector<32x64xf32> to vector<14x64xf32>
    %c2_196 = arith.constant 2 : index
    %c64_197 = arith.constant 64 : index
    %189 = vector.load %arg15[%c2_196, %c64_197] : memref<32x448xf32, #tpu.memory_space<vmem>>, vector<14x64xf32>
    tpu.vector_store %arg15[%c2_196, %c64_197], %188 {strides = array<i32>} : memref<32x448xf32, #tpu.memory_space<vmem>>, vector<14x64xf32>,
    %cst_198 = arith.constant 0.000000e+00 : f32
    %190 = vector.broadcast %cst_198 : f32 to vector<2x64xf32>
    %c16_199 = arith.constant 16 : index
    %c64_200 = arith.constant 64 : index
    %191 = vector.load %arg15[%c16_199, %c64_200] : memref<32x448xf32, #tpu.memory_space<vmem>>, vector<2x64xf32>
    tpu.vector_store %arg15[%c16_199, %c64_200], %190 {strides = array<i32>} : memref<32x448xf32, #tpu.memory_space<vmem>>, vector<2x64xf32>,
    %192 = vector.extract_strided_slice %177 {offsets = [16, 0], sizes = [14, 64], strides = [1, 1]} : vector<32x64xf32> to vector<14x64xf32>
    %c18_201 = arith.constant 18 : index
    %c64_202 = arith.constant 64 : index
    %193 = vector.load %arg15[%c18_201, %c64_202] : memref<32x448xf32, #tpu.memory_space<vmem>>, vector<14x64xf32>
    tpu.vector_store %arg15[%c18_201, %c64_202], %192 {strides = array<i32>} : memref<32x448xf32, #tpu.memory_space<vmem>>, vector<14x64xf32>,
    %cst_203 = arith.constant 0.000000e+00 : f32
    %194 = vector.broadcast %cst_203 : f32 to vector<1x64xf32>
    %c0_204 = arith.constant 0 : index
    %c128_205 = arith.constant 128 : index
    %195 = vector.load %arg15[%c0_204, %c128_205] : memref<32x448xf32, #tpu.memory_space<vmem>>, vector<1x64xf32>
    tpu.vector_store %arg15[%c0_204, %c128_205], %194 {strides = array<i32>} : memref<32x448xf32, #tpu.memory_space<vmem>>, vector<1x64xf32>,
    %196 = vector.extract_strided_slice %177 {offsets = [0, 0], sizes = [15, 64], strides = [1, 1]} : vector<32x64xf32> to vector<15x64xf32>
    %c1_206 = arith.constant 1 : index
    %c128_207 = arith.constant 128 : index
    %197 = vector.load %arg15[%c1_206, %c128_207] : memref<32x448xf32, #tpu.memory_space<vmem>>, vector<15x64xf32>
    tpu.vector_store %arg15[%c1_206, %c128_207], %196 {strides = array<i32>} : memref<32x448xf32, #tpu.memory_space<vmem>>, vector<15x64xf32>,
    %cst_208 = arith.constant 0.000000e+00 : f32
    %198 = vector.broadcast %cst_208 : f32 to vector<1x64xf32>
    %c16_209 = arith.constant 16 : index
    %c128_210 = arith.constant 128 : index
    %199 = vector.load %arg15[%c16_209, %c128_210] : memref<32x448xf32, #tpu.memory_space<vmem>>, vector<1x64xf32>
    tpu.vector_store %arg15[%c16_209, %c128_210], %198 {strides = array<i32>} : memref<32x448xf32, #tpu.memory_space<vmem>>, vector<1x64xf32>,
    %200 = vector.extract_strided_slice %177 {offsets = [16, 0], sizes = [15, 64], strides = [1, 1]} : vector<32x64xf32> to vector<15x64xf32>
    %c17_211 = arith.constant 17 : index
    %c128_212 = arith.constant 128 : index
    %201 = vector.load %arg15[%c17_211, %c128_212] : memref<32x448xf32, #tpu.memory_space<vmem>>, vector<15x64xf32>
    tpu.vector_store %arg15[%c17_211, %c128_212], %200 {strides = array<i32>} : memref<32x448xf32, #tpu.memory_space<vmem>>, vector<15x64xf32>,
    %c0_213 = arith.constant 0 : index
    %c192_214 = arith.constant 192 : index
    %202 = vector.load %arg15[%c0_213, %c192_214] : memref<32x448xf32, #tpu.memory_space<vmem>>, vector<32x64xf32>
    tpu.vector_store %arg15[%c0_213, %c192_214], %177 {strides = array<i32>} : memref<32x448xf32, #tpu.memory_space<vmem>>, vector<32x64xf32>,
    %203 = vector.extract_strided_slice %177 {offsets = [1, 0], sizes = [15, 64], strides = [1, 1]} : vector<32x64xf32> to vector<15x64xf32>
    %c0_215 = arith.constant 0 : index
    %c256_216 = arith.constant 256 : index
    %204 = vector.load %arg15[%c0_215, %c256_216] : memref<32x448xf32, #tpu.memory_space<vmem>>, vector<15x64xf32>
    tpu.vector_store %arg15[%c0_215, %c256_216], %203 {strides = array<i32>} : memref<32x448xf32, #tpu.memory_space<vmem>>, vector<15x64xf32>,
    %cst_217 = arith.constant 0.000000e+00 : f32
    %205 = vector.broadcast %cst_217 : f32 to vector<1x64xf32>
    %c15_218 = arith.constant 15 : index
    %c256_219 = arith.constant 256 : index
    %206 = vector.load %arg15[%c15_218, %c256_219] : memref<32x448xf32, #tpu.memory_space<vmem>>, vector<1x64xf32>
    tpu.vector_store %arg15[%c15_218, %c256_219], %205 {strides = array<i32>} : memref<32x448xf32, #tpu.memory_space<vmem>>, vector<1x64xf32>,
    %207 = vector.extract_strided_slice %177 {offsets = [17, 0], sizes = [15, 64], strides = [1, 1]} : vector<32x64xf32> to vector<15x64xf32>
    %c16_220 = arith.constant 16 : index
    %c256_221 = arith.constant 256 : index
    %208 = vector.load %arg15[%c16_220, %c256_221] : memref<32x448xf32, #tpu.memory_space<vmem>>, vector<15x64xf32>
    tpu.vector_store %arg15[%c16_220, %c256_221], %207 {strides = array<i32>} : memref<32x448xf32, #tpu.memory_space<vmem>>, vector<15x64xf32>,
    %cst_222 = arith.constant 0.000000e+00 : f32
    %209 = vector.broadcast %cst_222 : f32 to vector<1x64xf32>
    %c31_223 = arith.constant 31 : index
    %c256_224 = arith.constant 256 : index
    %210 = vector.load %arg15[%c31_223, %c256_224] : memref<32x448xf32, #tpu.memory_space<vmem>>, vector<1x64xf32>
    tpu.vector_store %arg15[%c31_223, %c256_224], %209 {strides = array<i32>} : memref<32x448xf32, #tpu.memory_space<vmem>>, vector<1x64xf32>,
    %211 = vector.extract_strided_slice %177 {offsets = [2, 0], sizes = [14, 64], strides = [1, 1]} : vector<32x64xf32> to vector<14x64xf32>
    %c0_225 = arith.constant 0 : index
    %c320 = arith.constant 320 : index
    %212 = vector.load %arg15[%c0_225, %c320] : memref<32x448xf32, #tpu.memory_space<vmem>>, vector<14x64xf32>
    tpu.vector_store %arg15[%c0_225, %c320], %211 {strides = array<i32>} : memref<32x448xf32, #tpu.memory_space<vmem>>, vector<14x64xf32>,
    %cst_226 = arith.constant 0.000000e+00 : f32
    %213 = vector.broadcast %cst_226 : f32 to vector<2x64xf32>
    %c14_227 = arith.constant 14 : index
    %c320_228 = arith.constant 320 : index
    %214 = vector.load %arg15[%c14_227, %c320_228] : memref<32x448xf32, #tpu.memory_space<vmem>>, vector<2x64xf32>
    tpu.vector_store %arg15[%c14_227, %c320_228], %213 {strides = array<i32>} : memref<32x448xf32, #tpu.memory_space<vmem>>, vector<2x64xf32>,
    %215 = vector.extract_strided_slice %177 {offsets = [18, 0], sizes = [14, 64], strides = [1, 1]} : vector<32x64xf32> to vector<14x64xf32>
    %c16_229 = arith.constant 16 : index
    %c320_230 = arith.constant 320 : index
    %216 = vector.load %arg15[%c16_229, %c320_230] : memref<32x448xf32, #tpu.memory_space<vmem>>, vector<14x64xf32>
    tpu.vector_store %arg15[%c16_229, %c320_230], %215 {strides = array<i32>} : memref<32x448xf32, #tpu.memory_space<vmem>>, vector<14x64xf32>,
    %cst_231 = arith.constant 0.000000e+00 : f32
    %217 = vector.broadcast %cst_231 : f32 to vector<2x64xf32>
    %c30_232 = arith.constant 30 : index
    %c320_233 = arith.constant 320 : index
    %218 = vector.load %arg15[%c30_232, %c320_233] : memref<32x448xf32, #tpu.memory_space<vmem>>, vector<2x64xf32>
    tpu.vector_store %arg15[%c30_232, %c320_233], %217 {strides = array<i32>} : memref<32x448xf32, #tpu.memory_space<vmem>>, vector<2x64xf32>,
    %219 = vector.extract_strided_slice %177 {offsets = [3, 0], sizes = [13, 64], strides = [1, 1]} : vector<32x64xf32> to vector<13x64xf32>
    %c0_234 = arith.constant 0 : index
    %c384_235 = arith.constant 384 : index
    %220 = vector.load %arg15[%c0_234, %c384_235] : memref<32x448xf32, #tpu.memory_space<vmem>>, vector<13x64xf32>
    tpu.vector_store %arg15[%c0_234, %c384_235], %219 {strides = array<i32>} : memref<32x448xf32, #tpu.memory_space<vmem>>, vector<13x64xf32>,
    %cst_236 = arith.constant 0.000000e+00 : f32
    %221 = vector.broadcast %cst_236 : f32 to vector<3x64xf32>
    %c13_237 = arith.constant 13 : index
    %c384_238 = arith.constant 384 : index
    %222 = vector.load %arg15[%c13_237, %c384_238] : memref<32x448xf32, #tpu.memory_space<vmem>>, vector<3x64xf32>
    tpu.vector_store %arg15[%c13_237, %c384_238], %221 {strides = array<i32>} : memref<32x448xf32, #tpu.memory_space<vmem>>, vector<3x64xf32>,
    %223 = vector.extract_strided_slice %177 {offsets = [19, 0], sizes = [13, 64], strides = [1, 1]} : vector<32x64xf32> to vector<13x64xf32>
    %c16_239 = arith.constant 16 : index
    %c384_240 = arith.constant 384 : index
    %224 = vector.load %arg15[%c16_239, %c384_240] : memref<32x448xf32, #tpu.memory_space<vmem>>, vector<13x64xf32>
    tpu.vector_store %arg15[%c16_239, %c384_240], %223 {strides = array<i32>} : memref<32x448xf32, #tpu.memory_space<vmem>>, vector<13x64xf32>,
    %cst_241 = arith.constant 0.000000e+00 : f32
    %225 = vector.broadcast %cst_241 : f32 to vector<3x64xf32>
    %c29_242 = arith.constant 29 : index
    %c384_243 = arith.constant 384 : index
    %226 = vector.load %arg15[%c29_242, %c384_243] : memref<32x448xf32, #tpu.memory_space<vmem>>, vector<3x64xf32>
    tpu.vector_store %arg15[%c29_242, %c384_243], %225 {strides = array<i32>} : memref<32x448xf32, #tpu.memory_space<vmem>>, vector<3x64xf32>,
    %c0_244 = arith.constant 0 : index
    %c0_245 = arith.constant 0 : index
    %227 = vector.load %arg15[%c0_244, %c0_245] : memref<32x448xf32, #tpu.memory_space<vmem>>, vector<32x448xf32>
    %228 = arith.truncf %227 : vector<32x448xf32> to vector<32x448xbf16>
    %c0_246 = arith.constant 0 : index
    %c0_247 = arith.constant 0 : index
    %229 = vector.load %arg7[%c0_246, %c0_247] : memref<448x32xbf16, #tpu.memory_space<vmem>>, vector<448x32xbf16>
    %cst_248 = arith.constant dense<0.000000e+00> : vector<32x32xf32>
    %230 = tpu.matmul %228, %229, %cst_248 {dimension_numbers = #tpu.dot_dimension_numbers<[1], [0], [0], [1], [0, 0, 1, 1], [], []>} : vector<32x448xbf16>, vector<448x32xbf16>, vector<32x32xf32> -> vector<32x32xf32>
    %c0_249 = arith.constant 0 : index
    %c0_250 = arith.constant 0 : index
    %231 = vector.load %arg8[%c0_249, %c0_250] : memref<1x32xf32, #tpu.memory_space<vmem>>, vector<1x32xf32>
    %232 = vector.broadcast %231 : vector<1x32xf32> to vector<32x32xf32>
    %233 = arith.addf %230, %232 : vector<32x32xf32>
    %cst_251 = arith.constant 1.000000e-01 : f32
    %234 = vector.broadcast %cst_251 : f32 to vector<32x32xf32>
    %235 = arith.mulf %234, %233 : vector<32x32xf32>
    %236 = arith.maximumf %233, %235 : vector<32x32xf32>
    %237 = vector.extract_strided_slice %236 {offsets = [0, 0], sizes = [1, 32], strides = [1, 1]} : vector<32x32xf32> to vector<1x32xf32>
    %238 = vector.extract_strided_slice %236 {offsets = [16, 0], sizes = [1, 32], strides = [1, 1]} : vector<32x32xf32> to vector<1x32xf32>
    %239 = tpu.concatenate %237, %238 in 0 : vector<1x32xf32>, vector<1x32xf32> -> vector<2x32xf32>
    %c0_252 = arith.constant 0 : index
    %c0_253 = arith.constant 0 : index
    %240 = vector.load %arg16[%c0_252, %c0_253] : memref<2x512xf32, #tpu.memory_space<vmem>>, vector<2x32xf32>
    tpu.vector_store %arg16[%c0_252, %c0_253], %239 {strides = array<i32>} : memref<2x512xf32, #tpu.memory_space<vmem>>, vector<2x32xf32>,
    %241 = vector.extract_strided_slice %236 {offsets = [1, 0], sizes = [1, 32], strides = [1, 1]} : vector<32x32xf32> to vector<1x32xf32>
    %242 = vector.extract_strided_slice %236 {offsets = [17, 0], sizes = [1, 32], strides = [1, 1]} : vector<32x32xf32> to vector<1x32xf32>
    %243 = tpu.concatenate %241, %242 in 0 : vector<1x32xf32>, vector<1x32xf32> -> vector<2x32xf32>
    %c0_254 = arith.constant 0 : index
    %c32_255 = arith.constant 32 : index
    %244 = vector.load %arg16[%c0_254, %c32_255] : memref<2x512xf32, #tpu.memory_space<vmem>>, vector<2x32xf32>
    tpu.vector_store %arg16[%c0_254, %c32_255], %243 {strides = array<i32>} : memref<2x512xf32, #tpu.memory_space<vmem>>, vector<2x32xf32>,
    %245 = vector.extract_strided_slice %236 {offsets = [2, 0], sizes = [1, 32], strides = [1, 1]} : vector<32x32xf32> to vector<1x32xf32>
    %246 = vector.extract_strided_slice %236 {offsets = [18, 0], sizes = [1, 32], strides = [1, 1]} : vector<32x32xf32> to vector<1x32xf32>
    %247 = tpu.concatenate %245, %246 in 0 : vector<1x32xf32>, vector<1x32xf32> -> vector<2x32xf32>
    %c0_256 = arith.constant 0 : index
    %c64_257 = arith.constant 64 : index
    %248 = vector.load %arg16[%c0_256, %c64_257] : memref<2x512xf32, #tpu.memory_space<vmem>>, vector<2x32xf32>
    tpu.vector_store %arg16[%c0_256, %c64_257], %247 {strides = array<i32>} : memref<2x512xf32, #tpu.memory_space<vmem>>, vector<2x32xf32>,
    %249 = vector.extract_strided_slice %236 {offsets = [3, 0], sizes = [1, 32], strides = [1, 1]} : vector<32x32xf32> to vector<1x32xf32>
    %250 = vector.extract_strided_slice %236 {offsets = [19, 0], sizes = [1, 32], strides = [1, 1]} : vector<32x32xf32> to vector<1x32xf32>
    %251 = tpu.concatenate %249, %250 in 0 : vector<1x32xf32>, vector<1x32xf32> -> vector<2x32xf32>
    %c0_258 = arith.constant 0 : index
    %c96_259 = arith.constant 96 : index
    %252 = vector.load %arg16[%c0_258, %c96_259] : memref<2x512xf32, #tpu.memory_space<vmem>>, vector<2x32xf32>
    tpu.vector_store %arg16[%c0_258, %c96_259], %251 {strides = array<i32>} : memref<2x512xf32, #tpu.memory_space<vmem>>, vector<2x32xf32>,
    %253 = vector.extract_strided_slice %236 {offsets = [4, 0], sizes = [1, 32], strides = [1, 1]} : vector<32x32xf32> to vector<1x32xf32>
    %254 = vector.extract_strided_slice %236 {offsets = [20, 0], sizes = [1, 32], strides = [1, 1]} : vector<32x32xf32> to vector<1x32xf32>
    %255 = tpu.concatenate %253, %254 in 0 : vector<1x32xf32>, vector<1x32xf32> -> vector<2x32xf32>
    %c0_260 = arith.constant 0 : index
    %c128_261 = arith.constant 128 : index
    %256 = vector.load %arg16[%c0_260, %c128_261] : memref<2x512xf32, #tpu.memory_space<vmem>>, vector<2x32xf32>
    tpu.vector_store %arg16[%c0_260, %c128_261], %255 {strides = array<i32>} : memref<2x512xf32, #tpu.memory_space<vmem>>, vector<2x32xf32>,
    %257 = vector.extract_strided_slice %236 {offsets = [5, 0], sizes = [1, 32], strides = [1, 1]} : vector<32x32xf32> to vector<1x32xf32>
    %258 = vector.extract_strided_slice %236 {offsets = [21, 0], sizes = [1, 32], strides = [1, 1]} : vector<32x32xf32> to vector<1x32xf32>
    %259 = tpu.concatenate %257, %258 in 0 : vector<1x32xf32>, vector<1x32xf32> -> vector<2x32xf32>
    %c0_262 = arith.constant 0 : index
    %c160_263 = arith.constant 160 : index
    %260 = vector.load %arg16[%c0_262, %c160_263] : memref<2x512xf32, #tpu.memory_space<vmem>>, vector<2x32xf32>
    tpu.vector_store %arg16[%c0_262, %c160_263], %259 {strides = array<i32>} : memref<2x512xf32, #tpu.memory_space<vmem>>, vector<2x32xf32>,
    %261 = vector.extract_strided_slice %236 {offsets = [6, 0], sizes = [1, 32], strides = [1, 1]} : vector<32x32xf32> to vector<1x32xf32>
    %262 = vector.extract_strided_slice %236 {offsets = [22, 0], sizes = [1, 32], strides = [1, 1]} : vector<32x32xf32> to vector<1x32xf32>
    %263 = tpu.concatenate %261, %262 in 0 : vector<1x32xf32>, vector<1x32xf32> -> vector<2x32xf32>
    %c0_264 = arith.constant 0 : index
    %c192_265 = arith.constant 192 : index
    %264 = vector.load %arg16[%c0_264, %c192_265] : memref<2x512xf32, #tpu.memory_space<vmem>>, vector<2x32xf32>
    tpu.vector_store %arg16[%c0_264, %c192_265], %263 {strides = array<i32>} : memref<2x512xf32, #tpu.memory_space<vmem>>, vector<2x32xf32>,
    %265 = vector.extract_strided_slice %236 {offsets = [7, 0], sizes = [1, 32], strides = [1, 1]} : vector<32x32xf32> to vector<1x32xf32>
    %266 = vector.extract_strided_slice %236 {offsets = [23, 0], sizes = [1, 32], strides = [1, 1]} : vector<32x32xf32> to vector<1x32xf32>
    %267 = tpu.concatenate %265, %266 in 0 : vector<1x32xf32>, vector<1x32xf32> -> vector<2x32xf32>
    %c0_266 = arith.constant 0 : index
    %c224 = arith.constant 224 : index
    %268 = vector.load %arg16[%c0_266, %c224] : memref<2x512xf32, #tpu.memory_space<vmem>>, vector<2x32xf32>
    tpu.vector_store %arg16[%c0_266, %c224], %267 {strides = array<i32>} : memref<2x512xf32, #tpu.memory_space<vmem>>, vector<2x32xf32>,
    %269 = vector.extract_strided_slice %236 {offsets = [8, 0], sizes = [1, 32], strides = [1, 1]} : vector<32x32xf32> to vector<1x32xf32>
    %270 = vector.extract_strided_slice %236 {offsets = [24, 0], sizes = [1, 32], strides = [1, 1]} : vector<32x32xf32> to vector<1x32xf32>
    %271 = tpu.concatenate %269, %270 in 0 : vector<1x32xf32>, vector<1x32xf32> -> vector<2x32xf32>
    %c0_267 = arith.constant 0 : index
    %c256_268 = arith.constant 256 : index
    %272 = vector.load %arg16[%c0_267, %c256_268] : memref<2x512xf32, #tpu.memory_space<vmem>>, vector<2x32xf32>
    tpu.vector_store %arg16[%c0_267, %c256_268], %271 {strides = array<i32>} : memref<2x512xf32, #tpu.memory_space<vmem>>, vector<2x32xf32>,
    %273 = vector.extract_strided_slice %236 {offsets = [9, 0], sizes = [1, 32], strides = [1, 1]} : vector<32x32xf32> to vector<1x32xf32>
    %274 = vector.extract_strided_slice %236 {offsets = [25, 0], sizes = [1, 32], strides = [1, 1]} : vector<32x32xf32> to vector<1x32xf32>
    %275 = tpu.concatenate %273, %274 in 0 : vector<1x32xf32>, vector<1x32xf32> -> vector<2x32xf32>
    %c0_269 = arith.constant 0 : index
    %c288 = arith.constant 288 : index
    %276 = vector.load %arg16[%c0_269, %c288] : memref<2x512xf32, #tpu.memory_space<vmem>>, vector<2x32xf32>
    tpu.vector_store %arg16[%c0_269, %c288], %275 {strides = array<i32>} : memref<2x512xf32, #tpu.memory_space<vmem>>, vector<2x32xf32>,
    %277 = vector.extract_strided_slice %236 {offsets = [10, 0], sizes = [1, 32], strides = [1, 1]} : vector<32x32xf32> to vector<1x32xf32>
    %278 = vector.extract_strided_slice %236 {offsets = [26, 0], sizes = [1, 32], strides = [1, 1]} : vector<32x32xf32> to vector<1x32xf32>
    %279 = tpu.concatenate %277, %278 in 0 : vector<1x32xf32>, vector<1x32xf32> -> vector<2x32xf32>
    %c0_270 = arith.constant 0 : index
    %c320_271 = arith.constant 320 : index
    %280 = vector.load %arg16[%c0_270, %c320_271] : memref<2x512xf32, #tpu.memory_space<vmem>>, vector<2x32xf32>
    tpu.vector_store %arg16[%c0_270, %c320_271], %279 {strides = array<i32>} : memref<2x512xf32, #tpu.memory_space<vmem>>, vector<2x32xf32>,
    %281 = vector.extract_strided_slice %236 {offsets = [11, 0], sizes = [1, 32], strides = [1, 1]} : vector<32x32xf32> to vector<1x32xf32>
    %282 = vector.extract_strided_slice %236 {offsets = [27, 0], sizes = [1, 32], strides = [1, 1]} : vector<32x32xf32> to vector<1x32xf32>
    %283 = tpu.concatenate %281, %282 in 0 : vector<1x32xf32>, vector<1x32xf32> -> vector<2x32xf32>
    %c0_272 = arith.constant 0 : index
    %c352 = arith.constant 352 : index
    %284 = vector.load %arg16[%c0_272, %c352] : memref<2x512xf32, #tpu.memory_space<vmem>>, vector<2x32xf32>
    tpu.vector_store %arg16[%c0_272, %c352], %283 {strides = array<i32>} : memref<2x512xf32, #tpu.memory_space<vmem>>, vector<2x32xf32>,
    %285 = vector.extract_strided_slice %236 {offsets = [12, 0], sizes = [1, 32], strides = [1, 1]} : vector<32x32xf32> to vector<1x32xf32>
    %286 = vector.extract_strided_slice %236 {offsets = [28, 0], sizes = [1, 32], strides = [1, 1]} : vector<32x32xf32> to vector<1x32xf32>
    %287 = tpu.concatenate %285, %286 in 0 : vector<1x32xf32>, vector<1x32xf32> -> vector<2x32xf32>
    %c0_273 = arith.constant 0 : index
    %c384_274 = arith.constant 384 : index
    %288 = vector.load %arg16[%c0_273, %c384_274] : memref<2x512xf32, #tpu.memory_space<vmem>>, vector<2x32xf32>
    tpu.vector_store %arg16[%c0_273, %c384_274], %287 {strides = array<i32>} : memref<2x512xf32, #tpu.memory_space<vmem>>, vector<2x32xf32>,
    %289 = vector.extract_strided_slice %236 {offsets = [13, 0], sizes = [1, 32], strides = [1, 1]} : vector<32x32xf32> to vector<1x32xf32>
    %290 = vector.extract_strided_slice %236 {offsets = [29, 0], sizes = [1, 32], strides = [1, 1]} : vector<32x32xf32> to vector<1x32xf32>
    %291 = tpu.concatenate %289, %290 in 0 : vector<1x32xf32>, vector<1x32xf32> -> vector<2x32xf32>
    %c0_275 = arith.constant 0 : index
    %c416 = arith.constant 416 : index
    %292 = vector.load %arg16[%c0_275, %c416] : memref<2x512xf32, #tpu.memory_space<vmem>>, vector<2x32xf32>
    tpu.vector_store %arg16[%c0_275, %c416], %291 {strides = array<i32>} : memref<2x512xf32, #tpu.memory_space<vmem>>, vector<2x32xf32>,
    %293 = vector.extract_strided_slice %236 {offsets = [14, 0], sizes = [1, 32], strides = [1, 1]} : vector<32x32xf32> to vector<1x32xf32>
    %294 = vector.extract_strided_slice %236 {offsets = [30, 0], sizes = [1, 32], strides = [1, 1]} : vector<32x32xf32> to vector<1x32xf32>
    %295 = tpu.concatenate %293, %294 in 0 : vector<1x32xf32>, vector<1x32xf32> -> vector<2x32xf32>
    %c0_276 = arith.constant 0 : index
    %c448 = arith.constant 448 : index
    %296 = vector.load %arg16[%c0_276, %c448] : memref<2x512xf32, #tpu.memory_space<vmem>>, vector<2x32xf32>
    tpu.vector_store %arg16[%c0_276, %c448], %295 {strides = array<i32>} : memref<2x512xf32, #tpu.memory_space<vmem>>, vector<2x32xf32>,
    %297 = vector.extract_strided_slice %236 {offsets = [15, 0], sizes = [1, 32], strides = [1, 1]} : vector<32x32xf32> to vector<1x32xf32>
    %298 = vector.extract_strided_slice %236 {offsets = [31, 0], sizes = [1, 32], strides = [1, 1]} : vector<32x32xf32> to vector<1x32xf32>
    %299 = tpu.concatenate %297, %298 in 0 : vector<1x32xf32>, vector<1x32xf32> -> vector<2x32xf32>
    %c0_277 = arith.constant 0 : index
    %c480 = arith.constant 480 : index
    %300 = vector.load %arg16[%c0_277, %c480] : memref<2x512xf32, #tpu.memory_space<vmem>>, vector<2x32xf32>
    tpu.vector_store %arg16[%c0_277, %c480], %299 {strides = array<i32>} : memref<2x512xf32, #tpu.memory_space<vmem>>, vector<2x32xf32>,
    %c0_278 = arith.constant 0 : index
    %c0_279 = arith.constant 0 : index
    %301 = vector.load %arg16[%c0_278, %c0_279] : memref<2x512xf32, #tpu.memory_space<vmem>>, vector<2x512xf32>
    %302 = arith.truncf %301 : vector<2x512xf32> to vector<2x512xbf16>
    %c0_280 = arith.constant 0 : index
    %c0_281 = arith.constant 0 : index
    %303 = vector.load %arg9[%c0_280, %c0_281] : memref<512x32xbf16, #tpu.memory_space<vmem>>, vector<512x32xbf16>
    %cst_282 = arith.constant dense<0.000000e+00> : vector<2x32xf32>
    %304 = tpu.matmul %302, %303, %cst_282 {dimension_numbers = #tpu.dot_dimension_numbers<[1], [0], [0], [1], [0, 0, 1, 1], [], []>} : vector<2x512xbf16>, vector<512x32xbf16>, vector<2x32xf32> -> vector<2x32xf32>
    %c0_283 = arith.constant 0 : index
    %c0_284 = arith.constant 0 : index
    %305 = vector.load %arg10[%c0_283, %c0_284] : memref<1x32xf32, #tpu.memory_space<vmem>>, vector<1x32xf32>
    %306 = vector.broadcast %305 : vector<1x32xf32> to vector<2x32xf32>
    %307 = arith.addf %304, %306 : vector<2x32xf32>
    %c0_285 = arith.constant 0 : index
    %c0_286 = arith.constant 0 : index
    %308 = vector.load %arg11[%c0_285, %c0_286] : memref<2x32xf32, #tpu.memory_space<vmem>>, vector<2x32xf32>
    tpu.vector_store %arg11[%c0_285, %c0_286], %307 {strides = array<i32>} : memref<2x32xf32, #tpu.memory_space<vmem>>, vector<2x32xf32>,
    return
  }
}

</mosaic_0001>

<bundles_post_ra>
// kernel: encoder_forward.1
= control target key start
LH: loop header
LB: loop body
LE: loop exit
PB: predicated region body
PF: predicated region fallthrough
CT: control target
= control target key end

     0   :  { %vm160_vm0 = vcmask 1045504   ;;  %vm70_vm1 = vcmask 1041408   ;;  %s4911_s21 = smov 32   ;;  %vm98_vm2 = vcmask 1040384   ;;  %vm150_vm3 = vcmask 253952   ;;  %s4913_s13 = smov 64   ;;  %s6299_s0 = inlined_call_operand.vmem [shape: f32[32,32], index: 0, kind: input, shape index: {}]   ;;  %s6300_s1 = inlined_call_operand.vmem [shape: bf16[224,256], index: 1, kind: input, shape index: {}]   ;;  %s6301_s2 = inlined_call_operand.vmem [shape: f32[1,256], index: 2, kind: input, shape index: {}]   ;;  %s6302_s3 = inlined_call_operand.vmem [shape: bf16[1792,128], index: 3, kind: input, shape index: {}]   ;;  %s6303_s4 = inlined_call_operand.vmem [shape: f32[1,128], index: 4, kind: input, shape index: {}]   ;;  %s6304_s5 = inlined_call_operand.vmem [shape: bf16[896,64], index: 5, kind: input, shape index: {}]   ;;  %s6305_s6 = inlined_call_operand.vmem [shape: f32[1,64], index: 6, kind: input, shape index: {}]   ;;  %s6306_s7 = inlined_call_operand.vmem [shape: bf16[448,32], index: 7, kind: input, shape index: {}]   ;;  %s6307_s8 = inlined_call_operand.vmem [shape: f32[1,32], index: 8, kind: input, shape index: {}]   ;;  %s6308_s9 = inlined_call_operand.vmem [shape: bf16[512,32], index: 9, kind: input, shape index: {}]   ;;  %s6309_s10 = inlined_call_operand.vmem [shape: f32[1,32], index: 10, kind: input, shape index: {}]   ;;  %s6310_s11 = inlined_call_operand.hbm [shape: f32[2,32], index: 11, kind: output, shape index: {}]  }
   0x1   :  { %v4981_v0 = vld [vmem:[%s6299_s0 + $0x8] sm:$0xff]  ;;  %v4986_v1 = vld [vmem:[%s6299_s0] sm:$0xff]  ;;  %v4618_v10 = vld [vmem:[%s6300_s1 + $0x74] ss:$8 sps:$4 sm:$0xff]   ;;  %v4912_v17 = vmov 0.0   ;;  %vm187_vm4 = vcmask 1044480  }
   0x2   :  { %v162_v2 = vrot.slane %v4981_v0, 2  ;;  %v71_v3 = vrot.slane %v4986_v1, 6  ;;  %v161_v4 = vrot.slane %v4986_v1, 2  ;;  %v72_v5 = vrot.slane %v4981_v0, 6  ;;  %v4620_v11 = vld [vmem:[%s6300_s1 + $0x70] ss:$8 sps:$4 sm:$0xff]   ;;  %413 = vmatprep.subr.bf16.mxu0 %v4618_v10 }
   0x3   :  { %v99_v8 = vrot.slane %v4986_v1, 7  ;;  %v100_v9 = vrot.slane %v4981_v0, 7  ;;  %v4621_v12 = vld [vmem:[%s6300_s1 + $0x64] ss:$8 sps:$4 sm:$0xff]   ;;  %v189_v14 = vrot.slane %v4981_v0, 3  ;;  %v188_v15 = vrot.slane %v4986_v1, 3  ;;  %414 = vmatpush1.bf16.msra.mxu0 %v4620_v11 }
   0x4   :  { %166 = vrot.lane.b32.xlu1 %v162_v2, %s4911_s21  ;;  %74 = vrot.lane.b32.xlu0 %v71_v3, %s4911_s21  ;;  %v163_v6 = vsel %vm160_vm0, %v161_v4, %v162_v2  ;;  %v73_v7 = vsel %vm70_vm1, %v71_v3, %v72_v5  ;;  %v4623_v16 = vld [vmem:[%s6300_s1 + $0x60] ss:$8 sps:$4 sm:$0xff]   ;;  %151 = vst.msk [vmem:[#allocation2 + $0x1f] sm:$0x1] %vm150_vm3, %v4912_v17  ;;  %159 = vst.msk [vmem:[#allocation2 + $0x3f] sm:$0x1] %vm150_vm3, %v4912_v17 }
   0x5   :  { %v101_v13 = vsel %vm98_vm2, %v99_v8, %v100_v9  ;;  %482 = vst [vmem:[#allocation3] sm:$0x7] %v4912_v17  ;;  %483 = vst [vmem:[#allocation3 + $0x8] sm:$0x7] %v4912_v17  ;;  %415 = vmatprep.subr.bf16.mxu0 %v4621_v12  ;;  %v4624_v18 = vld [vmem:[%s6300_s1 + $0x54] ss:$8 sps:$4 sm:$0xff]   ;;  %v190_v21 = vsel %vm187_vm4, %v188_v15, %v189_v14 }
   0x6   :  { %502 = vst [vmem:[#allocation3 + $0xe0] sm:$0x7] %v4912_v17  ;;  %503 = vst [vmem:[#allocation3 + $0xe8] sm:$0x7] %v4912_v17  ;;  %vm148_vm5 = vcmask 260096   ;;  %vm173_vm6 = vcmask 523526  }
   0x7   :  { %522 = vst [vmem:[#allocation3 + $0x10] sm:$0x3] %v4912_v17  ;;  %523 = vst [vmem:[#allocation3 + $0x18] sm:$0x3] %v4912_v17  ;;  %v143_v19 = vrot.slane %v4981_v0, 1  ;;  %vm44_vm7 = vcmask 256000   ;;  %416 = vmatpush1.bf16.msra.mxu0 %v4623_v16 }
   0x8   :  { %164 = vrot.lane.b32.xlu1 %v163_v6, %s4911_s21  ;;  %76 = vrot.lane.b32.xlu0 %v73_v7, %s4911_s21  ;;  %538 = vst [vmem:[#allocation3 + $0xf0] sm:$0x3] %v4912_v17  ;;  %539 = vst [vmem:[#allocation3 + $0xf8] sm:$0x3] %v4912_v17  ;;  %vm54_vm8 = vcmask 261123   ;;  %v49_v20 = vrot.slane %v4986_v1, 5 }
   0x9   :  { %648 = vst [vmem:[#allocation3 + $0xc0] sm:$0xc0] %v4912_v17  ;;  %649 = vst [vmem:[#allocation3 + $0xc8] sm:$0xc0] %v4912_v17  ;;  %v5056_v22 = vld [vmem:[%s6299_s0 + $0x10] sm:$0xff]  ;;  %v5067_v24 = vld [vmem:[%s6299_s0 + $0x18] sm:$0xff]  ;;  %417 = vmatprep.subr.bf16.mxu0 %v4624_v18 }
   0xa   :  { %664 = vst [vmem:[#allocation3 + $0x1a0] sm:$0xc0] %v4912_v17  ;;  %665 = vst [vmem:[#allocation3 + $0x1a8] sm:$0xc0] %v4912_v17  ;;  %v4626_v23 = vld [vmem:[%s6300_s1 + $0x50] ss:$8 sps:$4 sm:$0xff]  }
   0xb   :  { %680 = vst [vmem:[#allocation3 + $0xd0] sm:$0xe0] %v4912_v17  ;;  %681 = vst [vmem:[#allocation3 + $0xd8] sm:$0xe0] %v4912_v17  ;;  %v4627_v25 = vld [vmem:[%s6300_s1 + $0x44] ss:$8 sps:$4 sm:$0xff]   ;;  %418 = vmatpush1.bf16.msra.mxu0 %v4626_v23 }
   0xc   :  { %696 = vst [vmem:[#allocation3 + $0x1b0] sm:$0xe0] %v4912_v17  ;;  %697 = vst [vmem:[#allocation3 + $0x1b8] sm:$0xe0] %v4912_v17  ;;  %104 = vrot.lane.b32.xlu1 %v101_v13, %s4913_s13  ;;  %102 = vrot.lane.b32.xlu0 %v99_v8, %s4913_s13  ;;  %vm56_vm9 = vcmask 261120   ;;  %vm141_vm10 = vcmask 1046528  }
   0xd   :  { %2036 = vst [vmem:[#allocation4] sm:$0x7] %v4912_v17  ;;  %2046 = vst [vmem:[#allocation4 + $0x70] sm:$0x7] %v4912_v17  ;;  %v142_v26 = vrot.slane %v4986_v1, 1  ;;  %vm48_vm11 = vcmask 1042432   ;;  %419 = vmatprep.subr.bf16.mxu0 %v4627_v25 }
   0xe   :  { %2056 = vst [vmem:[#allocation4 + $0x8] sm:$0x3] %v4912_v17  ;;  %2064 = vst [vmem:[#allocation4 + $0x78] sm:$0x3] %v4912_v17  ;;  %v50_v27 = vrot.slane %v4981_v0, 5  ;;  %v85_v28 = vrot.slane %v5056_v22, 6 }
   0xf   :  { %2072 = vst [vmem:[#allocation4 + $0x10] sm:$0x1] %v4912_v17  ;;  %2080 = vst [vmem:[#allocation4 + $0x80] sm:$0x1] %v4912_v17  ;;  %v86_v29 = vrot.slane %v5067_v24, 6  ;;  %v144_v31 = vsel %vm141_vm10, %v142_v26, %v143_v19  ;;  %vm68_vm12 = vcmask 517376  }
  0x10   :  { %2099 = vst [vmem:[#allocation4 + $0x5f] sm:$0x1] %v4912_v17  ;;  %2107 = vst [vmem:[#allocation4 + $0xcf] sm:$0x1] %v4912_v17  ;;  %193 = vrot.lane.b32.xlu1 %v189_v14, %s4913_s13  ;;  %191 = vrot.lane.b32.xlu0 %v190_v21, %s4913_s13  ;;  %v4629_v30 = vld [vmem:[%s6300_s1 + $0x40] ss:$8 sps:$4 sm:$0xff]   ;;  %v51_v33 = vsel %vm48_vm11, %v49_v20, %v50_v27 }
  0x11   :  { %2115 = vst [vmem:[#allocation4 + $0x60] sm:$0xc0] %v4912_v17  ;;  %2123 = vst [vmem:[#allocation4 + $0xd0] sm:$0xc0] %v4912_v17  ;;  %v4630_v32 = vld [vmem:[%s6300_s1 + $0x34] ss:$8 sps:$4 sm:$0xff]   ;;  %v87_v37 = vsel %vm70_vm1, %v85_v28, %v86_v29  ;;  %420 = vmatpush1.bf16.msra.mxu0 %v4629_v30 }
  0x12   :  { %2131 = vst [vmem:[#allocation4 + $0x68] sm:$0xe0] %v4912_v17  ;;  %2139 = vst [vmem:[#allocation4 + $0xd8] sm:$0xe0] %v4912_v17  ;;  %vm96_vm13 = vcmask 778752   ;;  %s4914_s26 = smov 96   ;;  %421 = vmatprep.subr.bf16.mxu0 %v4630_v32 }
  0x13   :  { %149 = vst.msk [vmem:[#allocation2 + $0x18] sm:$0x7f] %vm148_vm5, %v143_v19  ;;  %v176_v34 = vrot.slane %v5067_v24, 2  ;;  %v61_v35 = vrot.slane %v5056_v22, 5  ;;  %v62_v36 = vrot.slane %v5067_v24, 5  ;;  %v175_v38 = vrot.slane %v5056_v22, 2 }
  0x14   :  { %45 = vst.msk [vmem:[#allocation2] sm:$0x7] %vm44_vm7, %v4912_v17  ;;  %58 = vst.msk [vmem:[#allocation2 + $0x20] sm:$0x7] %vm44_vm7, %v4912_v17  ;;  %126 = vrot.lane.b32.xlu1 %v4981_v0, %s4914_s26  ;;  %124 = vrot.lane.b32.xlu0 %v4986_v1, %s4914_s26  ;;  %v4632_v39 = vld [vmem:[%s6300_s1 + $0x30] ss:$8 sps:$4 sm:$0xff]  }
  0x15   :  { %174 = vst.msk [vmem:[#allocation2 + $0x18] sm:$0xc0] %vm173_vm6, %v4912_v17  ;;  %v153_v40 = vrot.slane %v5067_v24, 1  ;;  %v4633_v41 = vld [vmem:[%s6300_s1 + $0x24] ss:$8 sps:$4 sm:$0xff]   ;;  %v63_v42 = vsel %vm48_vm11, %v61_v35, %v62_v36  ;;  %v152_v43 = vrot.slane %v5056_v22, 1  ;;  %v177_v48 = vsel %vm160_vm0, %v175_v38, %v176_v34  ;;  %422 = vmatpush1.bf16.msra.mxu0 %v4632_v39 }
  0x16   :  { %55 = vst.msk [vmem:[#allocation2] sm:$0xf8] %vm54_vm8, %v49_v20  ;;  %66 = vst.msk [vmem:[#allocation2 + $0x20] sm:$0xf8] %vm54_vm8, %v61_v35  ;;  %v113_v44 = vrot.slane %v5056_v22, 7  ;;  %v114_v45 = vrot.slane %v5067_v24, 7  ;;  %423 = vmatprep.subr.bf16.mxu0 %v4633_v41 }
  0x17   :  { %147 = vst.msk [vmem:[#allocation2 + $0x8] sm:$0xff] %vm56_vm9, %v144_v31  ;;  %57 = vst.msk [vmem:[#allocation2 + $0x10] sm:$0xff] %vm56_vm9, %v51_v33  ;;  %v4635_v46 = vld [vmem:[%s6300_s1 + $0x20] ss:$8 sps:$4 sm:$0xff]   ;;  %v154_v47 = vsel %vm141_vm10, %v152_v43, %v153_v40  ;;  %v4636_v49 = vld [vmem:[%s6300_s1 + $0x14] ss:$8 sps:$4 sm:$0xff]  }
  0x18   :  { %69 = vst.msk [vmem:[#allocation2] sm:$0x3] %vm68_vm12, %v4912_v17  ;;  %84 = vst.msk [vmem:[#allocation2 + $0x20] sm:$0x3] %vm68_vm12, %v4912_v17  ;;  %90 = vrot.lane.b32.xlu1 %v87_v37, %s4911_s21  ;;  %88 = vrot.lane.b32.xlu0 %v85_v28, %s4911_s21  ;;  %v4638_v50 = vld [vmem:[%s6300_s1 + $0x10] ss:$8 sps:$4 sm:$0xff]   ;;  %v115_v54 = vsel %vm98_vm2, %v113_v44, %v114_v45 }
  0x19   :  { %97 = vst.msk [vmem:[#allocation2] sm:$0x1] %vm96_vm13, %v4912_v17  ;;  %112 = vst.msk [vmem:[#allocation2 + $0x20] sm:$0x1] %vm96_vm13, %v4912_v17  ;;  %v203_v51 = vrot.slane %v5067_v24, 3  ;;  %v202_v52 = vrot.slane %v5056_v22, 3  ;;  %424 = vmatpush1.bf16.msra.mxu0 %v4635_v46 }
  0x1a   :  { %67 = vst.msk [vmem:[#allocation2 + $0x30] sm:$0xff] %vm56_vm9, %v63_v42  ;;  %157 = vst.msk [vmem:[#allocation2 + $0x28] sm:$0xff] %vm56_vm9, %v154_v47  ;;  %v4639_v53 = vld [vmem:[%s6300_s1 + $0x4] ss:$8 sps:$4 sm:$0xff]   ;;  %425 = vmatprep.subr.bf16.mxu0 %v4636_v49  ;;  %v4641_v55 = vld [vmem:[%s6300_s1] ss:$8 sps:$4 sm:$0xff]  }
  0x1b   :  { %158 = vst.msk [vmem:[#allocation2 + $0x38] sm:$0x7f] %vm148_vm5, %v153_v40  ;;  %v4642_v56 = vld [vmem:[%s6300_s1 + $0xd4] ss:$8 sps:$4 sm:$0xff]   ;;  %v204_v57 = vsel %vm187_vm4, %v202_v52, %v203_v51  ;;  %v4644_v58 = vld [vmem:[%s6300_s1 + $0xd0] ss:$8 sps:$4 sm:$0xff]  }
  0x1c   :  { %186 = vst.msk [vmem:[#allocation2 + $0x38] sm:$0xc0] %vm173_vm6, %v4912_v17  ;;  %180 = vrot.lane.b32.xlu1 %v176_v34, %s4911_s21  ;;  %178 = vrot.lane.b32.xlu0 %v177_v48, %s4911_s21  ;;  %v4660_v59 = vld [vmem:[%s6302_s3 + $0x78] sm:$0xff]   ;;  %v4645_v61 = vld [vmem:[%s6300_s1 + $0xc4] ss:$8 sps:$4 sm:$0xff]   ;;  %vm171_vm14 = vcmask 521472  }
  0x1d   :  { %426 = vmatpush1.bf16.msra.mxu0 %v4638_v50  ;;  %v4662_v60 = vld [vmem:[%s6302_s3 + $0x38] sm:$0xff]   ;;  %v4664_v62 = vld [vmem:[%s6302_s3 + $0x70] sm:$0xff]   ;;  %v4647_v63 = vld [vmem:[%s6300_s1 + $0xc0] ss:$8 sps:$4 sm:$0xff]   ;;  %4229 = vmatprep.subr.bf16.mxu1 %v4660_v59  ;;  %vm80_vm15 = vcmask 523522   ;;  %vm200_vm3 = vcmask 785925  }
  0x1e   :  { %427 = vmatprep.subr.bf16.mxu0 %v4639_v53  ;;  %v4648_v0 = vld [vmem:[%s6300_s1 + $0xb4] ss:$8 sps:$4 sm:$0xff]   ;;  %4230 = vmatpush3.bf16.msra.mxu1 %v4662_v60  ;;  %v4650_v2 = vld [vmem:[%s6300_s1 + $0xb0] ss:$8 sps:$4 sm:$0xff]   ;;  %v4651_v3 = vld [vmem:[%s6300_s1 + $0xa4] ss:$8 sps:$4 sm:$0xff]  }
  0x1f   :  { %v4666_v1 = vld [vmem:[%s6302_s3 + $0x30] sm:$0xff]   ;;  %4231 = vmatprep.subr.bf16.mxu1 %v4664_v62  ;;  %v4653_v4 = vld [vmem:[%s6300_s1 + $0xa0] ss:$8 sps:$4 sm:$0xff]   ;;  %v4657_v7 = vld [vmem:[%s6300_s1 + $0x84] ss:$8 sps:$4 sm:$0xff]   ;;  %vm82_vm5 = vcmask 523520  }
  0x20   :  { %118 = vrot.lane.b32.xlu1 %v115_v54, %s4913_s13  ;;  %116 = vrot.lane.b32.xlu0 %v113_v44, %s4913_s13  ;;  %v4654_v5 = vld [vmem:[%s6300_s1 + $0x94] ss:$8 sps:$4 sm:$0xff]   ;;  %v4656_v6 = vld [vmem:[%s6300_s1 + $0x90] ss:$8 sps:$4 sm:$0xff]   ;;  %vm110_vm6 = vcmask 785920   ;;  %vm108_vm7 = vcmask 785921  }
  0x21   :  { %428 = vmatpush1.bf16.msra.mxu0 %v4641_v55  ;;  %v4659_v8 = vld [vmem:[%s6300_s1 + $0x80] ss:$8 sps:$4 sm:$0xff]   ;;  %v4661_v9 = vld [vmem:[%s6302_s3 + $0x178] sm:$0xff]   ;;  %vm198_vm8 = vcmask 782848   ;;  %vm136_vm9 = vcmask 1048320   ;;  %vm406_vm13 = vcmask 785408  }
  0x22   :  { %433 = vmatprep.subr.bf16.mxu0 %v4642_v56  ;;  %4232 = vmatpush3.bf16.msra.mxu1 %v4666_v1  ;;  %v4663_v26 = vld [vmem:[%s6302_s3 + $0x138] sm:$0xff]   ;;  %v4665_v27 = vld [vmem:[%s6302_s3 + $0x170] sm:$0xff]  }
  0x23   :  { %v4667_v33 = vld [vmem:[%s6302_s3 + $0x130] sm:$0xff]  }
  0x24   :  { %207 = vrot.lane.b32.xlu1 %v203_v51, %s4913_s13  ;;  %205 = vrot.lane.b32.xlu0 %v204_v57, %s4913_s13 }
  0x25   :  { %434 = vmatpush2.bf16.msra.mxu0 %v4644_v58 }
  0x26   :  { %435 = vmatprep.subr.bf16.mxu0 %v4645_v61 }
  0x28   :  { %130 = vrot.lane.b32.xlu1 %v5067_v24, %s4914_s26  ;;  %128 = vrot.lane.b32.xlu0 %v5056_v22, %s4914_s26 }
  0x29   :  { %436 = vmatpush2.bf16.msra.mxu0 %v4647_v63 }
  0x2a   :  { %437 = vmatprep.subr.bf16.mxu0 %v4648_v0 }
  0x2d   :  { %438 = vmatpush2.bf16.msra.mxu0 %v4650_v2 }
  0x2e   :  { %439 = vmatprep.subr.bf16.mxu0 %v4651_v3 }
  0x31   :  { %440 = vmatpush2.bf16.msra.mxu0 %v4653_v4 }
  0x32   :  { %441 = vmatprep.subr.bf16.mxu0 %v4654_v5 }
  0x35   :  { %442 = vmatpush2.bf16.msra.mxu0 %v4656_v6 }
  0x36   :  { %443 = vmatprep.subr.bf16.mxu0 %v4657_v7 }
  0x39   :  { %444 = vmatpush2.bf16.msra.mxu0 %v4659_v8 }
  0x3a   :  { %4285 = vmatprep.subr.bf16.mxu0 %v4661_v9 }
  0x76   :  { %v167_v10 = vpop.permute.xlu1 %166  ;;  %v75_v11 = vpop.permute.xlu0 %74 }
  0x77   :  { %172 = vst.msk [vmem:[#allocation2 + $0x18] sm:$0x3f] %vm171_vm14, %v167_v10 }
  0x78   :  { %81 = vst.msk [vmem:[#allocation2] sm:$0xfc] %vm80_vm15, %v75_v11 }
  0x79   :  { %201 = vst.msk [vmem:[#allocation2 + $0x18] sm:$0xe0] %vm200_vm3, %v4912_v17 }
  0x7a   :  { %v165_v12 = vpop.permute.xlu1 %164  ;;  %v77_v13 = vpop.permute.xlu0 %76 }
  0x7b   :  { %170 = vst.msk [vmem:[#allocation2 + $0x8] sm:$0xff] %vm82_vm5, %v165_v12  ;;  %83 = vst.msk [vmem:[#allocation2 + $0x10] sm:$0xff] %vm82_vm5, %v77_v13 }
  0x7e   :  { %v105_v14 = vpop.permute.xlu1 %104  ;;  %v103_v15 = vpop.permute.xlu0 %102 }
  0x7f   :  { %111 = vst.msk [vmem:[#allocation2 + $0x10] sm:$0xff] %vm110_vm6, %v105_v14 }
  0x80   :  { %109 = vst.msk [vmem:[#allocation2] sm:$0xfe] %vm108_vm7, %v103_v15 }
  0x82   :  { %v194_v16 = vpop.permute.xlu1 %193  ;;  %v192_v18 = vpop.permute.xlu0 %191 }
  0x83   :  { %199 = vst.msk [vmem:[#allocation2 + $0x18] sm:$0x1f] %vm198_vm8, %v194_v16 }
  0x84   :  { %197 = vst.msk [vmem:[#allocation2 + $0x8] sm:$0xff] %vm110_vm6, %v192_v18 }
  0x86   :  { %v127_v19 = vpop.permute.xlu1 %126  ;;  %v125_v20 = vpop.permute.xlu0 %124 }
  0x87   :  { %138 = vst.msk [vmem:[#allocation2 + $0x10] sm:$0xff] %vm136_vm9, %v127_v19  ;;  %137 = vst.msk [vmem:[#allocation2] sm:$0xff] %vm136_vm9, %v125_v20 }
  0x8a   :  { %v91_v21 = vpop.permute.xlu1 %90  ;;  %v89_v22 = vpop.permute.xlu0 %88  ;;  %v217_v24 = vld [vmem:[#allocation2 + $0x18] sm:$0xff] }
  0x8b   :  { %v215_v23 = vld [vmem:[#allocation2 + $0x8] sm:$0xff]  ;;  %95 = vst.msk [vmem:[#allocation2 + $0x30] sm:$0xff] %vm82_vm5, %v91_v21 }
  0x8c   :  { %94 = vst.msk [vmem:[#allocation2 + $0x20] sm:$0xfc] %vm80_vm15, %v89_v22  ;;  %v223_v25 = vpack.c.bf16 %v217_v24, %v215_v23 }
  0x8e   :  { %3993 = vmatprep.mubr.msk.bf16.mxu0 %vm406_vm13, %v223_v25  ;;  %v181_v28 = vpop.permute.xlu1 %180  ;;  %v179_v29 = vpop.permute.xlu0 %178  ;;  %v214_v30 = vld [vmem:[#allocation2] sm:$0xff]  ;;  %v216_v31 = vld [vmem:[#allocation2 + $0x10] sm:$0xff] }
  0x8f   :  { %185 = vst.msk [vmem:[#allocation2 + $0x38] sm:$0x3f] %vm171_vm14, %v181_v28  ;;  %v222_v32 = vpack.c.bf16 %v216_v31, %v214_v30 }
  0x90   :  { %184 = vst.msk [vmem:[#allocation2 + $0x28] sm:$0xff] %vm82_vm5, %v179_v29 }
  0x91   :  { %213 = vst.msk [vmem:[#allocation2 + $0x38] sm:$0xe0] %vm200_vm3, %v4912_v17  ;;  %446 = vmatmul.mubr.bf16.vlgmr.msra.gmra.mxu0 %v222_v32 }
  0x92   :  { %v119_v34 = vpop.permute.xlu1 %118  ;;  %v117_v35 = vpop.permute.xlu0 %116  ;;  %4286 = vmatpush3.bf16.msra.mxu0 %v4663_v26 }
  0x93   :  { %123 = vst.msk [vmem:[#allocation2 + $0x30] sm:$0xff] %vm110_vm6, %v119_v34  ;;  %4287 = vmatprep.subr.bf16.mxu0 %v4665_v27 }
  0x94   :  { %122 = vst.msk [vmem:[#allocation2 + $0x20] sm:$0xfe] %vm108_vm7, %v117_v35 }
  0x96   :  { %v208_v36 = vpop.permute.xlu1 %207  ;;  %v206_v37 = vpop.permute.xlu0 %205  ;;  %4288 = vmatpush3.bf16.msra.mxu0 %v4667_v33 }
  0x97   :  { %212 = vst.msk [vmem:[#allocation2 + $0x38] sm:$0x1f] %vm198_vm8, %v208_v36 }
  0x98   :  { %211 = vst.msk [vmem:[#allocation2 + $0x28] sm:$0xff] %vm110_vm6, %v206_v37 }
  0x9a   :  { %v131_v38 = vpop.permute.xlu1 %130  ;;  %v129_v39 = vpop.permute.xlu0 %128 }
  0x9b   :  { %140 = vst.msk [vmem:[#allocation2 + $0x30] sm:$0xff] %vm136_vm9, %v131_v38  ;;  %139 = vst.msk [vmem:[#allocation2 + $0x20] sm:$0xff] %vm136_vm9, %v129_v39 }
  0x9e   :  { %v221_v41 = vld [vmem:[#allocation2 + $0x38] sm:$0xff] }
  0x9f   :  { %v219_v40 = vld [vmem:[#allocation2 + $0x28] sm:$0xff] }
  0xa0   :  { %v225_v42 = vpack.c.bf16 %v221_v41, %v219_v40 }
  0xa2   :  { %3994 = vmatprep.mubr.msk.bf16.mxu0 %vm406_vm13, %v225_v42  ;;  %v218_v43 = vld [vmem:[#allocation2 + $0x20] sm:$0xff]  ;;  %v220_v44 = vld [vmem:[#allocation2 + $0x30] sm:$0xff] }
  0xa3   :  { %v224_v45 = vpack.c.bf16 %v220_v44, %v218_v43 }
  0xa5   :  { %456 = vmatmul.mubr.bf16.gmra.mxu0 %v224_v45 }
  0xa6   :  { %16 = vsyncpa [#allocation8], 0  ;;  %v4668_v46 = vld [vmem:[%s6302_s3 + $0x68] sm:$0xff]   ;;  %v4672_v50 = vld [vmem:[%s6302_s3 + $0x60] sm:$0xff]   ;;  %v256_v54 = vlaneseq  ;;  %vm2976_vm15 = vcmask 523269   ;;  %vm2891_vm3 = vcmask 516096  }
  0xa7   :  { %v4669_v47 = vld [vmem:[%s6302_s3 + $0x168] sm:$0xff]   ;;  %4233 = vmatprep.subr.bf16.mxu1 %v4668_v46  ;;  %v4673_v51 = vld [vmem:[%s6302_s3 + $0x160] sm:$0xff]   ;;  %v4676_v55 = vld [vmem:[%s6302_s3 + $0x58] sm:$0xff]   ;;  %2977 = vst.msk [vmem:[#allocation5 + $0x38] sm:$0xe0] %vm2976_vm15, %v4912_v17  ;;  %vm2841_vm5 = vcmask 518144  }
  0xa8   :  { %v4670_v48 = vld [vmem:[%s6302_s3 + $0x28] sm:$0xff]   ;;  %4289 = vmatprep.subr.bf16.mxu0 %v4669_v47  ;;  %v4674_v52 = vld [vmem:[%s6302_s3 + $0x20] sm:$0xff]   ;;  %v4677_v56 = vld [vmem:[%s6302_s3 + $0x158] sm:$0xff]   ;;  %vm556_vm14 = vcmp.lt.s32.totalorder %v256_v54, 256  ;;  %v5324_v9 = vshrl.u32 %v256_v54, 7  ;;  %vm2864_vm6 = vcmask 1041920  }
  0xa9   :  { %v4671_v49 = vld [vmem:[%s6302_s3 + $0x128] sm:$0xff]   ;;  %4234 = vmatpush3.bf16.msra.mxu1 %v4670_v48  ;;  %v4675_v53 = vld [vmem:[%s6302_s3 + $0x120] sm:$0xff]   ;;  %v4678_v57 = vld [vmem:[%s6302_s3 + $0x18] sm:$0xff]   ;;  %559 = vst.msk [vmem:[#allocation3 + $0x20] ss:$8 sm:$0x3] %vm556_vm14, %v4912_v17 }
  0xaa   :  { %4290 = vmatpush3.bf16.msra.mxu0 %v4671_v49  ;;  %4235 = vmatprep.subr.bf16.mxu1 %v4672_v50  ;;  %v4679_v58 = vld [vmem:[%s6302_s3 + $0x118] sm:$0xff]   ;;  %576 = vst.msk [vmem:[#allocation3 + $0x100] ss:$8 sm:$0x3] %vm556_vm14, %v4912_v17  ;;  %v4680_v59 = vld [vmem:[%s6302_s3 + $0x50] sm:$0xff]   ;;  %v4684_v63 = vld [vmem:[%s6302_s3 + $0x48] sm:$0xff]  }
  0xab   :  { %4291 = vmatprep.subr.bf16.mxu0 %v4673_v51  ;;  %615 = vst.msk [vmem:[#allocation3 + $0xb7] ss:$8 sm:$0x3] %vm556_vm14, %v4912_v17  ;;  %632 = vst.msk [vmem:[#allocation3 + $0x197] ss:$8 sm:$0x3] %vm556_vm14, %v4912_v17 }
  0xac   :  { %v4681_v60 = vld [vmem:[%s6302_s3 + $0x150] sm:$0xff]   ;;  %v4685_v0 = vld [vmem:[%s6302_s3 + $0x148] sm:$0xff]   ;;  %v4688_v3 = vld [vmem:[%s6302_s3 + $0x40] sm:$0xff]   ;;  %v258_v10 = vsub.s32 0, %v5324_v9  ;;  %v262_v12 = vsub.s32 1, %v5324_v9  ;;  %vm2898_vm7 = vcmask 523265  }
  0xad   :  { %4236 = vmatpush3.bf16.msra.mxu1 %v4674_v52  ;;  %v4682_v61 = vld [vmem:[%s6302_s3 + $0x10] sm:$0xff]   ;;  %v4686_v1 = vld [vmem:[%s6302_s3 + $0x8] sm:$0xff]   ;;  %v4689_v4 = vld [vmem:[%s6302_s3 + $0x140] sm:$0xff]   ;;  %2985 = vst.msk [vmem:[#allocation5 + $0x78] sm:$0xe0] %vm2976_vm15, %v4912_v17  ;;  %vm2974_vm8 = vcmask 520192  }
  0xae   :  { %4292 = vmatpush3.bf16.msra.mxu0 %v4675_v53  ;;  %4237 = vmatprep.subr.bf16.mxu1 %v4676_v55  ;;  %v4683_v62 = vld [vmem:[%s6302_s3 + $0x110] sm:$0xff]   ;;  %v4687_v2 = vld [vmem:[%s6302_s3 + $0x108] sm:$0xff]   ;;  %v4690_v5 = vld [vmem:[%s6302_s3] sm:$0xff]   ;;  %2892 = vst.msk [vmem:[#allocation5 + $0x8] sm:$0x1] %vm2891_vm3, %v4912_v17  ;;  %vm2850_vm9 = vcmask 523267  }
  0xaf   :  { %4293 = vmatprep.subr.bf16.mxu0 %v4677_v56  ;;  %v4691_v6 = vld [vmem:[%s6302_s3 + $0x100] sm:$0xff]   ;;  %v4692_v7 = vld [vmem:[%s6302_s3 + $0xf8] sm:$0xff]   ;;  %2901 = vst.msk [vmem:[#allocation5 + $0x48] sm:$0x1] %vm2891_vm3, %v4912_v17  ;;  %2933 = vst.msk [vmem:[#allocation5 + $0x37] sm:$0x1] %vm2891_vm3, %v4912_v17 }
  0xb0   :  { %v4693_v8 = vld [vmem:[%s6302_s3 + $0x278] sm:$0xff]   ;;  %v254_v11 = vld [vmem:[%s6301_s2] sm:$0x3]  ;;  %2941 = vst.msk [vmem:[#allocation5 + $0x77] sm:$0x1] %vm2891_vm3, %v4912_v17  ;;  %vm2931_vm13 = vcmask 522240  }
  0xb1   :  { %4238 = vmatpush3.bf16.msra.mxu1 %v4678_v57  ;;  %v5331_v13 = vrot.slane %v254_v11, %v258_v10  ;;  %v5333_v14 = vrot.slane %v254_v11, %v262_v12  ;;  %v4694_v12 = vld [vmem:[%s6302_s3 + $0xb8] sm:$0xff]   ;;  %2842 = vst.msk [vmem:[#allocation5] sm:$0x7] %vm2841_vm5, %v4912_v17  ;;  %2854 = vst.msk [vmem:[#allocation5 + $0x40] sm:$0x7] %vm2841_vm5, %v4912_v17  ;;  %vm2852_vm14 = vcmask 523264  }
  0xb2   :  { %4294 = vmatpush3.bf16.msra.mxu0 %v4679_v58  ;;  %4239 = vmatprep.subr.bf16.mxu1 %v4680_v59  ;;  %2865 = vst.msk [vmem:[#allocation5] sm:$0x3] %vm2864_vm6, %v4912_v17  ;;  %2879 = vst.msk [vmem:[#allocation5 + $0x40] sm:$0x3] %vm2864_vm6, %v4912_v17  ;;  %vm2954_vm15 = vcmask 1048070  }
  0xb3   :  { %4295 = vmatprep.subr.bf16.mxu0 %v4681_v60 }
  0xb5   :  { %4240 = vmatpush3.bf16.msra.mxu1 %v4682_v61 }
  0xb6   :  { %4296 = vmatpush3.bf16.msra.mxu0 %v4683_v62  ;;  %4241 = vmatprep.subr.bf16.mxu1 %v4684_v63 }
  0xb7   :  { %4297 = vmatprep.subr.bf16.mxu0 %v4685_v0 }
  0xb9   :  { %4242 = vmatpush3.bf16.msra.mxu1 %v4686_v1 }
  0xba   :  { %4298 = vmatpush3.bf16.msra.mxu0 %v4687_v2  ;;  %4243 = vmatprep.subr.bf16.mxu1 %v4688_v3 }
  0xbb   :  { %4299 = vmatprep.subr.bf16.mxu0 %v4689_v4 }
  0xbd   :  { %4244 = vmatpush3.bf16.msra.mxu1 %v4690_v5 }
  0xbe   :  { %4300 = vmatpush3.bf16.msra.mxu0 %v4691_v6  ;;  %4257 = vmatprep.subr.bf16.mxu1 %v4692_v7 }
  0xbf   :  { %4341 = vmatprep.subr.bf16.mxu0 %v4693_v8 }
 0x151   :  { %v447_v15 = vpop.f32.mrf.mxu0 }
 0x152   :  { %v448_v16 = vadd.f32 %v447_v15, %v5331_v13  ;;  %v4695_v15 = vld [vmem:[%s6302_s3 + $0x238] sm:$0xff]  }
 0x153   :  { %v449_v18 = vpop.f32.mrf.mxu0 }
 0x154   :  { %v466_v19 = vmul.f32 0.1, %v448_v16  ;;  %v450_v20 = vadd.f32 %v449_v18, %v5333_v14 }
 0x155   :  { %v451_v21 = vpop.f32.mrf.mxu0 }
 0x156   :  { %v474_v22 = vmax.f32 %v448_v16, %v466_v19  ;;  %v467_v23 = vmul.f32 0.1, %v450_v20  ;;  %v452_v24 = vadd.f32 %v451_v21, %v5331_v13  ;;  %v4697_v21 = vld [vmem:[%s6302_s3 + $0x270] sm:$0xff]  }
 0x157   :  { %v453_v25 = vpop.f32.mrf.mxu0 }
 0x158   :  { %v488_v26 = vrot.slane %v474_v22, 5  ;;  %v524_v27 = vrot.slane %v474_v22, 6  ;;  %v561_v28 = vrot.slane %v474_v22, 7  ;;  %592 = vst [vmem:[#allocation3 + $0x30] sm:$0xff] %v474_v22  ;;  %v5338_v29 = vmax.f32 %v450_v20, %v467_v23  ;;  %v4696_v20 = vld [vmem:[%s6302_s3 + $0xf0] sm:$0xff]  }
 0x159   :  { %v468_v30 = vmul.f32 0.1, %v452_v24  ;;  %v454_v31 = vadd.f32 %v453_v25, %v5333_v14  ;;  %v600_v35 = vrot.slane %v474_v22, 1  ;;  %v634_v38 = vrot.slane %v474_v22, 2 }
 0x15a   :  { %498 = vst [vmem:[#allocation3] sm:$0xf8] %v488_v26  ;;  %534 = vst [vmem:[#allocation3 + $0x10] sm:$0xfc] %v524_v27  ;;  %v489_v32 = vrot.slane %v5338_v29, 5  ;;  %v525_v33 = vrot.slane %v5338_v29, 6 }
 0x15b   :  { %571 = vst [vmem:[#allocation3 + $0x20] sm:$0xfe] %v561_v28  ;;  %v562_v34 = vrot.slane %v5338_v29, 7  ;;  %v476_v36 = vmax.f32 %v452_v24, %v468_v30  ;;  %v469_v37 = vmul.f32 0.1, %v454_v31  ;;  %v666_v39 = vrot.slane %v474_v22, 3 }
 0x15c   :  { %499 = vst [vmem:[#allocation3 + $0x8] sm:$0xf8] %v489_v32  ;;  %535 = vst [vmem:[#allocation3 + $0x18] sm:$0xfc] %v525_v33  ;;  %v603_v40 = vrot.slane %v5338_v29, 1  ;;  %v637_v41 = vrot.slane %v5338_v29, 2 }
 0x15d   :  { %572 = vst [vmem:[#allocation3 + $0x28] sm:$0xfe] %v562_v34  ;;  %v490_v42 = vrot.slane %v476_v36, 5  ;;  %v526_v43 = vrot.slane %v476_v36, 6  ;;  %v563_v44 = vrot.slane %v476_v36, 7  ;;  %594 = vst [vmem:[#allocation3 + $0xa0] sm:$0xff] %v476_v36  ;;  %v5347_v49 = vmax.f32 %v454_v31, %v469_v37 }
 0x15e   :  { %v601_v45 = vrot.slane %v476_v36, 1  ;;  %v669_v46 = vrot.slane %v5338_v29, 3  ;;  %v635_v47 = vrot.slane %v476_v36, 2  ;;  %v667_v48 = vrot.slane %v476_v36, 3 }
 0x15f   :  { %v491_v50 = vsel %vm48_vm11, %v488_v26, %v490_v42  ;;  %v5351_v51 = vsel %vm70_vm1, %v524_v27, %v526_v43  ;;  %v564_v52 = vsel %vm98_vm2, %v561_v28, %v563_v44  ;;  %v492_v56 = vrot.slane %v5347_v49, 5  ;;  %v4698_v26 = vld [vmem:[%s6302_s3 + $0xb0] sm:$0xff]   ;;  %v4704_v42 = vld [vmem:[%s6302_s3 + $0xe0] sm:$0xff]  }
 0x160   :  { %v5355_v53 = vsel %vm141_vm10, %v600_v35, %v601_v45  ;;  %612 = vst [vmem:[#allocation3 + $0xb0] sm:$0x7f] %v601_v45  ;;  %v636_v54 = vsel %vm160_vm0, %v634_v38, %v635_v47  ;;  %646 = vst [vmem:[#allocation3 + $0xc0] sm:$0x3f] %v635_v47  ;;  %v668_v55 = vsel %vm187_vm4, %v666_v39, %v667_v48  ;;  %v528_v57 = vrot.slane %v5347_v49, 6  ;;  %v4699_v27 = vld [vmem:[%s6302_s3 + $0x230] sm:$0xff]  }
 0x161   :  { %678 = vst [vmem:[#allocation3 + $0xd0] sm:$0x1f] %v667_v48  ;;  %644 = vst [vmem:[#allocation3 + $0x50] sm:$0xff] %v636_v54  ;;  %v565_v58 = vrot.slane %v5347_v49, 7  ;;  %v604_v59 = vrot.slane %v5347_v49, 1  ;;  %v638_v60 = vrot.slane %v5347_v49, 2  ;;  %v493_v62 = vsel %vm48_vm11, %v489_v32, %v492_v56 }
 0x162   :  { %676 = vst [vmem:[#allocation3 + $0x60] sm:$0xff] %v668_v55  ;;  %v670_v61 = vrot.slane %v5347_v49, 3  ;;  %v5367_v63 = vsel %vm70_vm1, %v525_v33, %v528_v57  ;;  %v698_v0 = vld [vmem:[#allocation3] sm:$0xff]  ;;  %v4700_v32 = vld [vmem:[%s6302_s3 + $0xe8] sm:$0xff]  }
 0x163   :  { %v702_v1 = vld [vmem:[#allocation3 + $0x20] sm:$0xff]  ;;  %v566_v2 = vsel %vm98_vm2, %v562_v34, %v565_v58  ;;  %v5371_v3 = vsel %vm141_vm10, %v603_v40, %v604_v59  ;;  %613 = vst [vmem:[#allocation3 + $0xb8] sm:$0x7f] %v604_v59  ;;  %v639_v4 = vsel %vm160_vm0, %v637_v41, %v638_v60  ;;  %647 = vst [vmem:[#allocation3 + $0xc8] sm:$0x3f] %v638_v60  ;;  %v699_v6 = vld [vmem:[#allocation3 + $0x8] sm:$0xff] }
 0x164   :  { %v5375_v5 = vsel %vm187_vm4, %v669_v46, %v670_v61  ;;  %679 = vst [vmem:[#allocation3 + $0xd8] sm:$0x1f] %v670_v61  ;;  %v703_v7 = vld [vmem:[#allocation3 + $0x28] sm:$0xff]  ;;  %645 = vst [vmem:[#allocation3 + $0x58] sm:$0xff] %v639_v4  ;;  %v755_v10 = vpack.c.bf16 %v493_v62, %v699_v6  ;;  %v754_v18 = vpack.c.bf16 %v491_v50, %v698_v0  ;;  %v4705_v43 = vld [vmem:[%s6302_s3 + $0x260] sm:$0xff]  }
 0x165   :  { %v457_v8 = vpop.f32.mrf.mxu0  ;;  %v759_v11 = vpack.c.bf16 %v566_v2, %v703_v7  ;;  %v758_v19 = vpack.c.bf16 %v564_v52, %v702_v1  ;;  %v4701_v33 = vld [vmem:[%s6302_s3 + $0x268] sm:$0xff]   ;;  %v4706_v56 = vld [vmem:[%s6302_s3 + $0xa0] sm:$0xff]   ;;  %v4708_v62 = vld [vmem:[%s6302_s3 + $0xd8] sm:$0xff]  }
 0x166   :  { %v458_v16 = vadd.f32 %v457_v8, %v5331_v13  ;;  %1717 = vmatprep.mubr.bf16.mxu1 %v755_v10  ;;  %v4702_v39 = vld [vmem:[%s6302_s3 + $0xa8] sm:$0xff]   ;;  %v4707_v57 = vld [vmem:[%s6302_s3 + $0x220] sm:$0xff]   ;;  %v4709_v0 = vld [vmem:[%s6302_s3 + $0x258] sm:$0xff]  }
 0x167   :  { %v459_v22 = vpop.f32.mrf.mxu0  ;;  %1815 = vmatprep.mubr.bf16.mxu0 %v759_v11  ;;  %1718 = vmatmul.mubr.bf16.vlgmr.msra.gmra.mxu1 %v754_v18  ;;  %v4703_v40 = vld [vmem:[%s6302_s3 + $0x228] sm:$0xff]  }
 0x168   :  { %v470_v23 = vmul.f32 0.1, %v458_v16  ;;  %v460_v24 = vadd.f32 %v459_v22, %v5333_v14  ;;  %1816 = vmatmul.mubr.bf16.vlgmr.msra.gmra.mxu0 %v758_v19  ;;  %4258 = vmatpush3.bf16.msra.mxu1 %v4694_v12  ;;  %v4710_v19 = vld [vmem:[%s6302_s3 + $0x98] sm:$0xff]  }
 0x169   :  { %v461_v25 = vpop.f32.mrf.mxu0  ;;  %4342 = vmatpush3.bf16.msra.mxu0 %v4695_v15  ;;  %4259 = vmatprep.subr.bf16.mxu1 %v4696_v20  ;;  %v4711_v20 = vld [vmem:[%s6302_s3 + $0x218] sm:$0xff]  }
 0x16a   :  { %v5397_v28 = vmax.f32 %v458_v16, %v470_v23  ;;  %v471_v30 = vmul.f32 0.1, %v460_v24  ;;  %v462_v31 = vadd.f32 %v461_v25, %v5331_v13  ;;  %4343 = vmatprep.subr.bf16.mxu0 %v4697_v21  ;;  %v4712_v25 = vld [vmem:[%s6302_s3 + $0xd0] sm:$0xff]  }
 0x16b   :  { %v463_v34 = vpop.f32.mrf.mxu0 }
 0x16c   :  { %v508_v35 = vrot.slane %v5397_v28, 5  ;;  %v540_v36 = vrot.slane %v5397_v28, 6  ;;  %v578_v37 = vrot.slane %v5397_v28, 7  ;;  %v5409_v38 = vmax.f32 %v460_v24, %v471_v30  ;;  %4260 = vmatpush3.bf16.msra.mxu1 %v4698_v26  ;;  %v4713_v26 = vld [vmem:[%s6302_s3 + $0x250] sm:$0xff]  }
 0x16d   :  { %v472_v13 = vmul.f32 0.1, %v462_v31  ;;  %4344 = vmatpush3.bf16.msra.mxu0 %v4699_v27  ;;  %v464_v41 = vadd.f32 %v463_v34, %v5333_v14  ;;  %4261 = vmatprep.subr.bf16.mxu1 %v4700_v32  ;;  %v617_v47 = vrot.slane %v5397_v28, 1  ;;  %v650_v50 = vrot.slane %v5397_v28, 2 }
 0x16e   :  { %518 = vst [vmem:[#allocation3 + $0xe0] sm:$0xf8] %v508_v35  ;;  %550 = vst [vmem:[#allocation3 + $0xf0] sm:$0xfc] %v540_v36  ;;  %4345 = vmatprep.subr.bf16.mxu0 %v4701_v33  ;;  %v509_v44 = vrot.slane %v5409_v38, 5  ;;  %v541_v45 = vrot.slane %v5409_v38, 6 }
 0x16f   :  { %588 = vst [vmem:[#allocation3 + $0x100] sm:$0xfe] %v578_v37  ;;  %v579_v46 = vrot.slane %v5409_v38, 7  ;;  %v5428_v48 = vmax.f32 %v462_v31, %v472_v13  ;;  %v473_v14 = vmul.f32 0.1, %v464_v41  ;;  %v682_v52 = vrot.slane %v5397_v28, 3 }
 0x170   :  { %519 = vst [vmem:[#allocation3 + $0xe8] sm:$0xf8] %v509_v44  ;;  %551 = vst [vmem:[#allocation3 + $0xf8] sm:$0xfc] %v541_v45  ;;  %v620_v54 = vrot.slane %v5409_v38, 1  ;;  %v653_v55 = vrot.slane %v5409_v38, 2  ;;  %4262 = vmatpush3.bf16.msra.mxu1 %v4702_v39 }
 0x171   :  { %589 = vst [vmem:[#allocation3 + $0x108] sm:$0xfe] %v579_v46  ;;  %4346 = vmatpush3.bf16.msra.mxu0 %v4703_v40  ;;  %v510_v58 = vrot.slane %v5428_v48, 5  ;;  %v542_v59 = vrot.slane %v5428_v48, 6  ;;  %v580_v60 = vrot.slane %v5428_v48, 7  ;;  %v618_v61 = vrot.slane %v5428_v48, 1  ;;  %4263 = vmatprep.subr.bf16.mxu1 %v4704_v42 }
 0x172   :  { %4347 = vmatprep.subr.bf16.mxu0 %v4705_v43  ;;  %v685_v1 = vrot.slane %v5409_v38, 3  ;;  %v651_v2 = vrot.slane %v5428_v48, 2  ;;  %v683_v4 = vrot.slane %v5428_v48, 3  ;;  %v5453_v6 = vmax.f32 %v464_v41, %v473_v14  ;;  %v4714_v39 = vld [vmem:[%s6302_s3 + $0x90] sm:$0xff]   ;;  %v701_v43 = vld [vmem:[#allocation3 + $0x18] sm:$0xff]  ;;  %v4717_v14 = vld [vmem:[%s6302_s3 + $0x248] sm:$0xff]  }
 0x173   :  { %v511_v7 = vsel %vm48_vm11, %v508_v35, %v510_v58  ;;  %v5457_v8 = vsel %vm70_vm1, %v540_v36, %v542_v59  ;;  %v581_v10 = vsel %vm98_vm2, %v578_v37, %v580_v60  ;;  %v5461_v11 = vsel %vm141_vm10, %v617_v47, %v618_v61  ;;  %629 = vst [vmem:[#allocation3 + $0x190] sm:$0x7f] %v618_v61  ;;  %v4715_v42 = vld [vmem:[%s6302_s3 + $0x210] sm:$0xff]   ;;  %v4716_v47 = vld [vmem:[%s6302_s3 + $0xc8] sm:$0xff]   ;;  %v4724_v58 = vld [vmem:[%s6302_s3 + $0x1f8] sm:$0xff]  }
 0x174   :  { %v5464_v12 = vsel %vm160_vm0, %v650_v50, %v651_v2  ;;  %662 = vst [vmem:[#allocation3 + $0x1a0] sm:$0x3f] %v651_v2  ;;  %v5467_v15 = vsel %vm187_vm4, %v682_v52, %v683_v4  ;;  %694 = vst [vmem:[#allocation3 + $0x1b0] sm:$0x1f] %v683_v4  ;;  %v512_v16 = vrot.slane %v5453_v6, 5  ;;  %v544_v18 = vrot.slane %v5453_v6, 6  ;;  %4264 = vmatpush3.bf16.msra.mxu1 %v4706_v56 }
 0x175   :  { %4348 = vmatpush3.bf16.msra.mxu0 %v4707_v57  ;;  %v582_v21 = vrot.slane %v5453_v6, 7  ;;  %v621_v22 = vrot.slane %v5453_v6, 1  ;;  %v654_v23 = vrot.slane %v5453_v6, 2  ;;  %v686_v24 = vrot.slane %v5453_v6, 3  ;;  %4265 = vmatprep.subr.bf16.mxu1 %v4708_v62  ;;  %v726_v31 = vld [vmem:[#allocation3 + $0xe0] sm:$0xff]  ;;  %v4725_v59 = vld [vmem:[%s6302_s3 + $0x378] sm:$0xff]  }
 0x176   :  { %4349 = vmatprep.subr.bf16.mxu0 %v4709_v0  ;;  %v513_v27 = vsel %vm48_vm11, %v509_v44, %v512_v16  ;;  %v5489_v30 = vsel %vm70_vm1, %v541_v45, %v544_v18  ;;  %v730_v32 = vld [vmem:[#allocation3 + $0x100] sm:$0xff]  ;;  %v721_v44 = vld [vmem:[#allocation3 + $0xb8] sm:$0xff]  ;;  %v768_v45 = vpack.c.bf16 %v511_v7, %v726_v31  ;;  %v757_v50 = vpack.c.bf16 %v5367_v63, %v701_v43  ;;  %v700_v60 = vld [vmem:[#allocation3 + $0x10] sm:$0xff] }
 0x177   :  { %v583_v33 = vsel %vm98_vm2, %v579_v46, %v582_v21  ;;  %v5493_v34 = vsel %vm141_vm10, %v620_v54, %v621_v22  ;;  %630 = vst [vmem:[#allocation3 + $0x198] sm:$0x7f] %v621_v22  ;;  %v5496_v35 = vsel %vm160_vm0, %v653_v55, %v654_v23  ;;  %663 = vst [vmem:[#allocation3 + $0x1a8] sm:$0x3f] %v654_v23  ;;  %v727_v37 = vld [vmem:[#allocation3 + $0xe8] sm:$0xff]  ;;  %v4720_v56 = vld [vmem:[%s6302_s3 + $0xc0] sm:$0xff]  }
 0x178   :  { %v5499_v36 = vsel %vm187_vm4, %v685_v1, %v686_v24  ;;  %695 = vst [vmem:[#allocation3 + $0x1b8] sm:$0x1f] %v686_v24  ;;  %v731_v13 = vld [vmem:[#allocation3 + $0x108] sm:$0xff]  ;;  %4266 = vmatpush3.bf16.msra.mxu1 %v4710_v19  ;;  %v769_v40 = vpack.c.bf16 %v513_v27, %v727_v37  ;;  %v772_v46 = vpack.c.bf16 %v581_v10, %v730_v32  ;;  %v4721_v63 = vld [vmem:[%s6302_s3 + $0x240] sm:$0xff]   ;;  %v720_v61 = vld [vmem:[#allocation3 + $0xb0] sm:$0xff] }
 0x179   :  { %4350 = vmatpush3.bf16.msra.mxu0 %v4711_v20  ;;  %v773_v41 = vpack.c.bf16 %v583_v33, %v731_v13  ;;  %4267 = vmatprep.subr.bf16.mxu1 %v4712_v25  ;;  %v763_v52 = vpack.c.bf16 %v721_v44, %v5371_v3  ;;  %v4718_v54 = vld [vmem:[%s6302_s3 + $0x88] sm:$0xff]   ;;  %v4722_v3 = vld [vmem:[%s6302_s3 + $0x80] sm:$0xff]   ;;  %v729_v62 = vld [vmem:[#allocation3 + $0xf8] sm:$0xff]  ;;  %v756_v2 = vpack.c.bf16 %v5351_v51, %v700_v60 }
 0x17a   :  { %4351 = vmatprep.subr.bf16.mxu0 %v4713_v26  ;;  %1725 = vmatprep.mubr.bf16.mxu1 %v769_v40  ;;  %v4719_v55 = vld [vmem:[%s6302_s3 + $0x208] sm:$0xff]   ;;  %v4723_v57 = vld [vmem:[%s6302_s3 + $0x200] sm:$0xff]   ;;  %v4726_v0 = vld [vmem:[%s6302_s3 + $0x1b8] sm:$0xff]   ;;  %v762_v4 = vpack.c.bf16 %v720_v61, %v5355_v53  ;;  %v771_v10 = vpack.c.bf16 %v5489_v30, %v729_v62  ;;  %v761_v31 = vpack.c.bf16 %v5347_v49, %v5338_v29 }
 0x17b   :  { %1823 = vmatprep.mubr.bf16.mxu0 %v773_v41  ;;  %1726 = vmatmul.mubr.bf16.gmra.mxu1 %v768_v45  ;;  %v4727_v7 = vld [vmem:[%s6302_s3 + $0x338] sm:$0xff]   ;;  %v4728_v16 = vld [vmem:[%s6302_s3 + $0x1f0] sm:$0xff]   ;;  %v4732_v20 = vld [vmem:[%s6302_s3 + $0x1e8] sm:$0xff]   ;;  %v775_v60 = vpack.c.bf16 %v5453_v6, %v5409_v38 }
 0x17c   :  { %1824 = vmatmul.mubr.bf16.gmra.mxu0 %v772_v46  ;;  %4268 = vmatpush3.bf16.msra.mxu1 %v4714_v39  ;;  %v4729_v18 = vld [vmem:[%s6302_s3 + $0x370] sm:$0xff]   ;;  %v4733_v23 = vld [vmem:[%s6302_s3 + $0x368] sm:$0xff]   ;;  %v725_v25 = vld [vmem:[#allocation3 + $0xd8] sm:$0xff] }
 0x17d   :  { %4352 = vmatpush3.bf16.msra.mxu0 %v4715_v42  ;;  %1766 = vmatprep.mubr.bf16.mxu1 %v757_v50  ;;  %v4730_v53 = vld [vmem:[%s6302_s3 + $0x1b0] sm:$0xff]   ;;  %v4734_v24 = vld [vmem:[%s6302_s3 + $0x1a8] sm:$0xff]   ;;  %v4736_v32 = vld [vmem:[%s6302_s3 + $0x1e0] sm:$0xff]  }
 0x17e   :  { %1913 = vmatprep.mubr.bf16.mxu0 %v763_v52  ;;  %4269 = vmatprep.subr.bf16.mxu1 %v4716_v47  ;;  %v749_v1 = vld [vmem:[#allocation3 + $0x198] sm:$0xff]  ;;  %v4731_v19 = vld [vmem:[%s6302_s3 + $0x330] sm:$0xff]   ;;  %v4735_v30 = vld [vmem:[%s6302_s3 + $0x328] sm:$0xff]  }
 0x17f   :  { %4353 = vmatprep.subr.bf16.mxu0 %v4717_v14  ;;  %v777_v51 = vpack.c.bf16 %v749_v1, %v5493_v34  ;;  %v728_v21 = vld [vmem:[#allocation3 + $0xf0] sm:$0xff]  ;;  %v4737_v33 = vld [vmem:[%s6302_s3 + $0x360] sm:$0xff]   ;;  %v4740_v49 = vld [vmem:[%s6302_s3 + $0x1d8] sm:$0xff]  }
 0x180   :  { %4270 = vmatpush3.bf16.msra.mxu1 %v4718_v54  ;;  %v748_v22 = vld [vmem:[#allocation3 + $0x190] sm:$0xff]  ;;  %v770_v26 = vpack.c.bf16 %v5457_v8, %v728_v21  ;;  %v767_v8 = vpack.c.bf16 %v725_v25, %v5375_v5  ;;  %v4739_v29 = vld [vmem:[%s6302_s3 + $0x320] sm:$0xff]   ;;  %v4741_v5 = vld [vmem:[%s6302_s3 + $0x358] sm:$0xff]  }
 0x181   :  { %4354 = vmatpush3.bf16.msra.mxu0 %v4719_v55  ;;  %4271 = vmatprep.subr.bf16.mxu1 %v4720_v56  ;;  %v776_v27 = vpack.c.bf16 %v748_v22, %v5461_v11  ;;  %v4738_v11 = vld [vmem:[%s6302_s3 + $0x1a0] sm:$0xff]   ;;  %v4742_v34 = vld [vmem:[%s6302_s3 + $0x198] sm:$0xff]   ;;  %v4744_v13 = vld [vmem:[%s6302_s3 + $0x1d0] sm:$0xff]  }
 0x182   :  { %4355 = vmatprep.subr.bf16.mxu0 %v4721_v63  ;;  %v4743_v37 = vld [vmem:[%s6302_s3 + $0x318] sm:$0xff]   ;;  %v4745_v39 = vld [vmem:[%s6302_s3 + $0x350] sm:$0xff]   ;;  %v4748_v42 = vld [vmem:[%s6302_s3 + $0x1c8] sm:$0xff]  }
 0x183   :  { %v4746_v40 = vld [vmem:[%s6302_s3 + $0x190] sm:$0xff]   ;;  %v4749_v43 = vld [vmem:[%s6302_s3 + $0x348] sm:$0xff]   ;;  %v4752_v46 = vld [vmem:[%s6302_s3 + $0x1c0] sm:$0xff]  }
 0x184   :  { %4272 = vmatpush3.bf16.msra.mxu1 %v4722_v3  ;;  %v4747_v41 = vld [vmem:[%s6302_s3 + $0x310] sm:$0xff]   ;;  %v4750_v44 = vld [vmem:[%s6302_s3 + $0x188] sm:$0xff]   ;;  %v4753_v47 = vld [vmem:[%s6302_s3 + $0x340] sm:$0xff]  }
 0x185   :  { %4356 = vmatpush3.bf16.msra.mxu0 %v4723_v57  ;;  %4313 = vmatprep.subr.bf16.mxu1 %v4724_v58  ;;  %v4751_v45 = vld [vmem:[%s6302_s3 + $0x308] sm:$0xff]   ;;  %v4754_v14 = vld [vmem:[%s6302_s3 + $0x180] sm:$0xff]   ;;  %v4756_v52 = vld [vmem:[%s6302_s3 + $0x2f8] sm:$0xff]  }
 0x186   :  { %4397 = vmatprep.subr.bf16.mxu0 %v4725_v59  ;;  %v4755_v50 = vld [vmem:[%s6302_s3 + $0x300] sm:$0xff]   ;;  %v724_v56 = vld [vmem:[#allocation3 + $0xd0] sm:$0xff]  ;;  %v753_v3 = vld [vmem:[#allocation3 + $0x1b8] sm:$0xff] }
 0x187   :  { %1767 = vmatmul.mubr.bf16.vlgmr.msra.gmra.mxu1 %v756_v2  ;;  %v718_v54 = vld [vmem:[#allocation3 + $0xa0] sm:$0xff]  ;;  %v704_v63 = vld [vmem:[#allocation3 + $0x30] sm:$0xff]  ;;  %v4757_v58 = vld [vmem:[%s6302_s3 + $0x2b8] sm:$0xff]   ;;  %v781_v62 = vpack.c.bf16 %v753_v3, %v5499_v36  ;;  %v774_v36 = vpack.c.bf16 %v5428_v48, %v5397_v28 }
 0x188   :  { %1914 = vmatmul.mubr.bf16.vlgmr.msra.gmra.mxu0 %v762_v4  ;;  %1774 = vmatprep.mubr.bf16.mxu1 %v771_v10  ;;  %v710_v55 = vld [vmem:[#allocation3 + $0x60] sm:$0xff]  ;;  %v760_v57 = vpack.c.bf16 %v718_v54, %v704_v63  ;;  %v4758_v61 = vld [vmem:[%s6302_s3 + $0x2f0] sm:$0xff]   ;;  %v4760_v38 = vld [vmem:[%s6302_s3 + $0x2e8] sm:$0xff]  }
 0x189   :  { %4314 = vmatpush3.bf16.msra.mxu1 %v4726_v0  ;;  %1921 = vmatprep.mubr.bf16.mxu0 %v777_v51  ;;  %v766_v59 = vpack.c.bf16 %v724_v56, %v710_v55  ;;  %v4759_v0 = vld [vmem:[%s6302_s3 + $0x2b0] sm:$0xff]   ;;  %v709_v1 = vld [vmem:[#allocation3 + $0x58] sm:$0xff]  ;;  %v723_v2 = vld [vmem:[#allocation3 + $0xc8] sm:$0xff] }
 0x18a   :  { %4398 = vmatpush3.bf16.msra.mxu0 %v4727_v7  ;;  %4315 = vmatprep.subr.bf16.mxu1 %v4728_v16  ;;  %v752_v6 = vld [vmem:[#allocation3 + $0x1b0] sm:$0xff]  ;;  %v4761_v4 = vld [vmem:[%s6302_s3 + $0x2a8] sm:$0xff]   ;;  %v765_v10 = vpack.c.bf16 %v723_v2, %v709_v1  ;;  %v4762_v16 = vld [vmem:[%s6302_s3 + $0x2e0] sm:$0xff]  }
 0x18b   :  { %4399 = vmatprep.subr.bf16.mxu0 %v4729_v18  ;;  %v780_v7 = vpack.c.bf16 %v752_v6, %v5467_v15  ;;  %v4763_v28 = vld [vmem:[%s6302_s3 + $0x2a0] sm:$0xff]   ;;  %v4764_v48 = vld [vmem:[%s6302_s3 + $0x2d8] sm:$0xff]   ;;  %v4766_v18 = vld [vmem:[%s6302_s3 + $0x2d0] sm:$0xff]  }
 0x18c   :  { %v4765_v15 = vld [vmem:[%s6302_s3 + $0x298] sm:$0xff]   ;;  %v4767_v51 = vld [vmem:[%s6302_s3 + $0x290] sm:$0xff]   ;;  %v4771_v21 = vld [vmem:[%s6302_s3 + $0x280] sm:$0xff]  }
 0x18d   :  { %4316 = vmatpush3.bf16.msra.mxu1 %v4730_v53  ;;  %v4768_v53 = vld [vmem:[%s6302_s3 + $0x2c8] sm:$0xff]   ;;  %v708_v22 = vld [vmem:[#allocation3 + $0x50] sm:$0xff]  ;;  %v4800_v63 = vld [vmem:[%s6304_s5 + $0xc0] sm:$0xff]  }
 0x18e   :  { %4400 = vmatpush3.bf16.msra.mxu0 %v4731_v19  ;;  %4317 = vmatprep.subr.bf16.mxu1 %v4732_v20  ;;  %v4769_v19 = vld [vmem:[%s6302_s3 + $0x288] sm:$0xff]   ;;  %v4770_v20 = vld [vmem:[%s6302_s3 + $0x2c0] sm:$0xff]  }
 0x18f   :  { %4401 = vmatprep.subr.bf16.mxu0 %v4733_v23  ;;  %1775 = vmatmul.mubr.bf16.gmra.mxu1 %v770_v26  ;;  %v722_v23 = vld [vmem:[#allocation3 + $0xc0] sm:$0xff]  ;;  %v4797_v54 = vld [vmem:[%s6304_s5 + $0x48] sm:$0xff]  }
 0x190   :  { %1922 = vmatmul.mubr.bf16.gmra.mxu0 %v776_v27  ;;  %1864 = vmatprep.mubr.bf16.mxu1 %v761_v31  ;;  %v764_v25 = vpack.c.bf16 %v722_v23, %v708_v22  ;;  %v750_v27 = vld [vmem:[#allocation3 + $0x1a0] sm:$0xff]  ;;  %v4772_v31 = vld [vmem:[%s6304_s5 + $0xf8] sm:$0xff]   ;;  %v4798_v55 = vld [vmem:[%s6304_s5 + $0x88] sm:$0xff]  }
 0x191   :  { %4318 = vmatpush3.bf16.msra.mxu1 %v4734_v24  ;;  %2011 = vmatprep.mubr.bf16.mxu0 %v767_v8  ;;  %v751_v24 = vld [vmem:[#allocation3 + $0x1a8] sm:$0xff]  ;;  %v4777_v8 = vld [vmem:[%s6304_s5 + $0x70] sm:$0xff]   ;;  %v4801_v3 = vld [vmem:[%s6304_s5 + $0x40] sm:$0xff]  }
 0x192   :  { %4402 = vmatpush3.bf16.msra.mxu0 %v4735_v30  ;;  %4319 = vmatprep.subr.bf16.mxu1 %v4736_v32  ;;  %v779_v26 = vpack.c.bf16 %v751_v24, %v5496_v35  ;;  %v778_v30 = vpack.c.bf16 %v750_v27, %v5464_v12  ;;  %v4773_v32 = vld [vmem:[%s6304_s5 + $0x78] sm:$0xff]   ;;  %v4776_v12 = vld [vmem:[%s6304_s5 + $0xf0] sm:$0xff]   ;;  %v4799_v56 = vld [vmem:[%s6304_s5 + $0x8] sm:$0xff]  }
 0x193   :  { %4403 = vmatprep.subr.bf16.mxu0 %v4737_v33  ;;  %v4774_v33 = vld [vmem:[%s6304_s5 + $0xb8] sm:$0xff]  }
 0x194   :  { %v4775_v35 = vld [vmem:[%s6304_s5 + $0x38] sm:$0xff]  }
 0x195   :  { %4320 = vmatpush3.bf16.msra.mxu1 %v4738_v11  ;;  %v4778_v11 = vld [vmem:[%s6304_s5 + $0xb0] sm:$0xff]  }
 0x196   :  { %4404 = vmatpush3.bf16.msra.mxu0 %v4739_v29  ;;  %4321 = vmatprep.subr.bf16.mxu1 %v4740_v49  ;;  %v4779_v29 = vld [vmem:[%s6304_s5 + $0x30] sm:$0xff]   ;;  %v4780_v49 = vld [vmem:[%s6304_s5 + $0xe8] sm:$0xff]  }
 0x197   :  { %4405 = vmatprep.subr.bf16.mxu0 %v4741_v5  ;;  %v4781_v5 = vld [vmem:[%s6304_s5 + $0x68] sm:$0xff]  }
 0x199   :  { %4322 = vmatpush3.bf16.msra.mxu1 %v4742_v34  ;;  %v4782_v34 = vld [vmem:[%s6304_s5 + $0xa8] sm:$0xff]  }
 0x19a   :  { %4406 = vmatpush3.bf16.msra.mxu0 %v4743_v37  ;;  %4323 = vmatprep.subr.bf16.mxu1 %v4744_v13  ;;  %v4783_v37 = vld [vmem:[%s6304_s5 + $0x28] sm:$0xff]   ;;  %v4784_v13 = vld [vmem:[%s6304_s5 + $0xe0] sm:$0xff]  }
 0x19b   :  { %4407 = vmatprep.subr.bf16.mxu0 %v4745_v39  ;;  %v4785_v39 = vld [vmem:[%s6304_s5 + $0x60] sm:$0xff]  }
 0x19d   :  { %4324 = vmatpush3.bf16.msra.mxu1 %v4746_v40  ;;  %v4786_v40 = vld [vmem:[%s6304_s5 + $0xa0] sm:$0xff]  }
 0x19e   :  { %4408 = vmatpush3.bf16.msra.mxu0 %v4747_v41  ;;  %4325 = vmatprep.subr.bf16.mxu1 %v4748_v42  ;;  %v4787_v41 = vld [vmem:[%s6304_s5 + $0x20] sm:$0xff]   ;;  %v4788_v42 = vld [vmem:[%s6304_s5 + $0xd8] sm:$0xff]  }
 0x19f   :  { %4409 = vmatprep.subr.bf16.mxu0 %v4749_v43  ;;  %v4789_v43 = vld [vmem:[%s6304_s5 + $0x58] sm:$0xff]  }
 0x1a1   :  { %4326 = vmatpush3.bf16.msra.mxu1 %v4750_v44  ;;  %v4790_v44 = vld [vmem:[%s6304_s5 + $0x98] sm:$0xff]  }
 0x1a2   :  { %4410 = vmatpush3.bf16.msra.mxu0 %v4751_v45  ;;  %4327 = vmatprep.subr.bf16.mxu1 %v4752_v46  ;;  %v4791_v45 = vld [vmem:[%s6304_s5 + $0x18] sm:$0xff]   ;;  %v4792_v46 = vld [vmem:[%s6304_s5 + $0xd0] sm:$0xff]  }
 0x1a3   :  { %4411 = vmatprep.subr.bf16.mxu0 %v4753_v47  ;;  %v4793_v47 = vld [vmem:[%s6304_s5 + $0x50] sm:$0xff]  }
 0x1a5   :  { %4328 = vmatpush3.bf16.msra.mxu1 %v4754_v14  ;;  %v4794_v14 = vld [vmem:[%s6304_s5 + $0x90] sm:$0xff]  }
 0x1a6   :  { %4412 = vmatpush3.bf16.msra.mxu0 %v4755_v50  ;;  %4369 = vmatprep.subr.bf16.mxu1 %v4756_v52  ;;  %v4795_v50 = vld [vmem:[%s6304_s5 + $0x10] sm:$0xff]   ;;  %v4796_v52 = vld [vmem:[%s6304_s5 + $0xc8] sm:$0xff]  }
 0x1a7   :  { %4453 = vmatprep.subr.bf16.mxu0 %v4772_v31 }
 0x1a8   :  { %1865 = vmatmul.mubr.bf16.vlgmr.msra.gmra.mxu1 %v760_v57  ;;  %v4802_v57 = vld [vmem:[%s6304_s5 + $0x80] sm:$0xff]  }
 0x1a9   :  { %2012 = vmatmul.mubr.bf16.vlgmr.msra.gmra.mxu0 %v766_v59  ;;  %1872 = vmatprep.mubr.bf16.mxu1 %v775_v60  ;;  %v5793_v59 = vld [vmem:[%s6304_s5 + $0x1b8] sm:$0xff]  }
 0x1aa   :  { %4370 = vmatpush3.bf16.msra.mxu1 %v4757_v58  ;;  %2019 = vmatprep.mubr.bf16.mxu0 %v781_v62  ;;  %v4803_v58 = vld [vmem:[%s6304_s5] sm:$0xff]   ;;  %v4805_v60 = vld [vmem:[%s6304_s5 + $0x178] sm:$0xff]  }
 0x1ab   :  { %4371 = vmatprep.subr.bf16.mxu1 %v4758_v61  ;;  %4454 = vmatpush3.bf16.msra.mxu0 %v4774_v33 }
 0x1ac   :  { %4455 = vmatprep.subr.bf16.mxu0 %v4776_v12 }
 0x1ae   :  { %4372 = vmatpush3.bf16.msra.mxu1 %v4759_v0 }
 0x1af   :  { %4373 = vmatprep.subr.bf16.mxu1 %v4760_v38  ;;  %4456 = vmatpush3.bf16.msra.mxu0 %v4778_v11 }
 0x1b0   :  { %1873 = vmatmul.mubr.bf16.gmra.mxu1 %v774_v36  ;;  %4457 = vmatprep.subr.bf16.mxu0 %v4780_v49 }
 0x1b1   :  { %2020 = vmatmul.mubr.bf16.gmra.mxu0 %v780_v7  ;;  %1962 = vmatprep.mubr.bf16.mxu1 %v765_v10 }
 0x1b2   :  { %4374 = vmatpush3.bf16.msra.mxu1 %v4761_v4 }
 0x1b3   :  { %4375 = vmatprep.subr.bf16.mxu1 %v4762_v16  ;;  %4458 = vmatpush3.bf16.msra.mxu0 %v4782_v34 }
 0x1b4   :  { %4459 = vmatprep.subr.bf16.mxu0 %v4784_v13 }
 0x1b6   :  { %4376 = vmatpush3.bf16.msra.mxu1 %v4763_v28 }
 0x1b7   :  { %4377 = vmatprep.subr.bf16.mxu1 %v4764_v48  ;;  %4460 = vmatpush3.bf16.msra.mxu0 %v4786_v40 }
 0x1b8   :  { %4461 = vmatprep.subr.bf16.mxu0 %v4788_v42 }
 0x1ba   :  { %4378 = vmatpush3.bf16.msra.mxu1 %v4765_v15 }
 0x1bb   :  { %4379 = vmatprep.subr.bf16.mxu1 %v4766_v18  ;;  %4462 = vmatpush3.bf16.msra.mxu0 %v4790_v44 }
 0x1bc   :  { %4463 = vmatprep.subr.bf16.mxu0 %v4792_v46 }
 0x1be   :  { %4380 = vmatpush3.bf16.msra.mxu1 %v4767_v51 }
 0x1bf   :  { %4381 = vmatprep.subr.bf16.mxu1 %v4768_v53  ;;  %4464 = vmatpush3.bf16.msra.mxu0 %v4794_v14 }
 0x1c0   :  { %4465 = vmatprep.subr.bf16.mxu0 %v4796_v52 }
 0x1c2   :  { %4382 = vmatpush3.bf16.msra.mxu1 %v4769_v19 }
 0x1c3   :  { %4383 = vmatprep.subr.bf16.mxu1 %v4770_v20  ;;  %4466 = vmatpush3.bf16.msra.mxu0 %v4798_v55 }
 0x1c4   :  { %4467 = vmatprep.subr.bf16.mxu0 %v4800_v63 }
 0x1c6   :  { %4384 = vmatpush3.bf16.msra.mxu1 %v4771_v21 }
 0x1c7   :  { %4425 = vmatprep.subr.bf16.mxu1 %v4773_v32  ;;  %4468 = vmatpush3.bf16.msra.mxu0 %v4802_v57 }
 0x1c8   :  { %4591 = vmatprep.subr.bf16.mxu0 %v5793_v59 }
 0x1c9   :  { %1963 = vmatmul.mubr.bf16.vlgmr.msra.gmra.mxu1 %v764_v25 }
 0x1ca   :  { %1970 = vmatprep.mubr.bf16.mxu1 %v779_v26  ;;  %4426 = vmatpush3.bf16.msra.mxu1 %v4775_v35 }
 0x1cb   :  { %4427 = vmatprep.subr.bf16.mxu1 %v4777_v8 }
 0x1ce   :  { %4428 = vmatpush3.bf16.msra.mxu1 %v4779_v29 }
 0x1cf   :  { %4429 = vmatprep.subr.bf16.mxu1 %v4781_v5 }
 0x1d1   :  { %1971 = vmatmul.mubr.bf16.gmra.mxu1 %v778_v30 }
 0x1d2   :  { %4430 = vmatpush3.bf16.msra.mxu1 %v4783_v37  ;;  %v3995_v37 = vld [vmem:[%s6303_s4] ss:$0 sm:$0xff] }
 0x1d3   :  { %4431 = vmatprep.subr.bf16.mxu1 %v4785_v39 }
 0x1d6   :  { %4432 = vmatpush3.bf16.msra.mxu1 %v4787_v41 }
 0x1d7   :  { %4433 = vmatprep.subr.bf16.mxu1 %v4789_v43 }
 0x1da   :  { %4434 = vmatpush3.bf16.msra.mxu1 %v4791_v45 }
 0x1db   :  { %4435 = vmatprep.subr.bf16.mxu1 %v4793_v47 }
 0x1de   :  { %4436 = vmatpush3.bf16.msra.mxu1 %v4795_v50 }
 0x1df   :  { %4437 = vmatprep.subr.bf16.mxu1 %v4797_v54 }
 0x1e2   :  { %4438 = vmatpush3.bf16.msra.mxu1 %v4799_v56 }
 0x1e3   :  { %4439 = vmatprep.subr.bf16.mxu1 %v4801_v3 }
 0x1e6   :  { %4440 = vmatpush3.bf16.msra.mxu1 %v4803_v58 }
 0x1e7   :  { %4481 = vmatprep.subr.bf16.mxu1 %v4805_v60 }
 0x227   :  { %v4245_v61 = vpop.f32.mrf.mxu1 }
 0x228   :  { %v4301_v1 = vpop.f32.mrf.mxu0 }
 0x229   :  { %v4246_v62 = vpop.f32.mrf.mxu1 }
 0x22a   :  { %v4302_v36 = vpop.f32.mrf.mxu0  ;;  %v4247_v34 = vadd.f32 %v4246_v62, %v4245_v61 }
 0x22b   :  { %v4248_v0 = vpop.f32.mrf.mxu1  ;;  %v4303_v47 = vadd.f32 %v4302_v36, %v4301_v1 }
 0x22c   :  { %v4304_v7 = vpop.f32.mrf.mxu0  ;;  %v1720_v41 = vadd.f32 %v4247_v34, %v3995_v37 }
 0x22d   :  { %v4249_v38 = vpop.f32.mrf.mxu1 }
 0x22e   :  { %v4305_v16 = vpop.f32.mrf.mxu0  ;;  %v4250_v42 = vadd.f32 %v4249_v38, %v4248_v0 }
 0x22f   :  { %v4306_v57 = vadd.f32 %v4305_v16, %v4304_v7 }
 0x230   :  { %v1723_v14 = vadd.f32 %v4250_v42, %v3995_v37 }
 0x23b   :  { %v4251_v6 = vpop.f32.mrf.mxu1 }
 0x23c   :  { %v4307_v48 = vpop.f32.mrf.mxu0 }
 0x23d   :  { %v4252_v2 = vpop.f32.mrf.mxu1 }
 0x23e   :  { %v4308_v18 = vpop.f32.mrf.mxu0  ;;  %v4253_v52 = vadd.f32 %v4252_v2, %v4251_v6 }
 0x23f   :  { %v4254_v4 = vpop.f32.mrf.mxu1 }
 0x240   :  { %v5799_v53 = vpop.f32.mrf.mxu0  ;;  %v1728_v62 = vadd.f32 %v4253_v52, %v3995_v37 }
 0x241   :  { %v4255_v10 = vpop.f32.mrf.mxu1 }
 0x242   :  { %v5801_v20 = vpop.f32.mrf.mxu0  ;;  %v4256_v58 = vadd.f32 %v4255_v10, %v4254_v4 }
 0x244   :  { %v1731_v36 = vadd.f32 %v4256_v58, %v3995_v37 }
 0x247   :  { %v4273_v28 = vpop.f32.mrf.mxu1 }
 0x248   :  { %v4357_v21 = vpop.f32.mrf.mxu0 }
 0x249   :  { %v4274_v15 = vpop.f32.mrf.mxu1 }
 0x24a   :  { %v4358_v23 = vpop.f32.mrf.mxu0  ;;  %v4275_v13 = vadd.f32 %v4274_v15, %v4273_v28 }
 0x24b   :  { %v4276_v51 = vpop.f32.mrf.mxu1  ;;  %v4359_v0 = vadd.f32 %v4358_v23, %v4357_v21  ;;  %v4312_v21 = vadd.f32 %v5801_v20, %v5799_v53 }
 0x24c   :  { %v4360_v25 = vpop.f32.mrf.mxu0  ;;  %v1769_v43 = vadd.f32 %v4275_v13, %v1720_v41 }
 0x24d   :  { %v4277_v19 = vpop.f32.mrf.mxu1 }
 0x24e   :  { %v4361_v27 = vpop.f32.mrf.mxu0  ;;  %v4278_v44 = vadd.f32 %v4277_v19, %v4276_v51  ;;  %v1818_v55 = vadd.f32 %v4303_v47, %v1769_v43 }
 0x24f   :  { %v4279_v22 = vpop.f32.mrf.mxu1 }
 0x250   :  { %v5803_v32 = vpop.f32.mrf.mxu0  ;;  %v1772_v54 = vadd.f32 %v4278_v44, %v1723_v14 }
 0x251   :  { %v4280_v24 = vpop.f32.mrf.mxu1 }
 0x252   :  { %v5805_v35 = vpop.f32.mrf.mxu0  ;;  %v4281_v63 = vadd.f32 %v4280_v24, %v4279_v22  ;;  %v1821_v15 = vadd.f32 %v4306_v57, %v1772_v54  ;;  %v4362_v24 = vadd.f32 %v4361_v27, %v4360_v25 }
 0x253   :  { %v4282_v26 = vpop.f32.mrf.mxu1  ;;  %v4365_v27 = vadd.f32 %v5805_v35, %v5803_v32 }
 0x254   :  { %v5807_v8 = vpop.f32.mrf.mxu0  ;;  %v1777_v19 = vadd.f32 %v4281_v63, %v1728_v62 }
 0x255   :  { %v4283_v30 = vpop.f32.mrf.mxu1 }
 0x256   :  { %v5809_v29 = vpop.f32.mrf.mxu0  ;;  %v4284_v38 = vadd.f32 %v4283_v30, %v4282_v26 }
 0x258   :  { %v1780_v7 = vadd.f32 %v4284_v38, %v1731_v36 }
 0x268   :  { %v4329_v31 = vpop.f32.mrf.mxu1 }
 0x269   :  { %v4413_v49 = vpop.f32.mrf.mxu0 }
 0x26a   :  { %v4330_v33 = vpop.f32.mrf.mxu1 }
 0x26b   :  { %v4414_v39 = vpop.f32.mrf.mxu0  ;;  %v4331_v50 = vadd.f32 %v4330_v33, %v4329_v31  ;;  %v4309_v33 = vadd.f32 %v4308_v18, %v4307_v48  ;;  %v1829_v18 = vadd.f32 %v4312_v21, %v1780_v7 }
 0x26c   :  { %v4332_v12 = vpop.f32.mrf.mxu1  ;;  %v4415_v4 = vadd.f32 %v4414_v39, %v4413_v49 }
 0x26d   :  { %v4416_v45 = vpop.f32.mrf.mxu0  ;;  %v1867_v60 = vadd.f32 %v4331_v50, %v1818_v55  ;;  %v1826_v23 = vadd.f32 %v4309_v33, %v1777_v19 }
 0x26e   :  { %v4333_v11 = vpop.f32.mrf.mxu1 }
 0x26f   :  { %v4417_v56 = vpop.f32.mrf.mxu0  ;;  %v4334_v61 = vadd.f32 %v4333_v11, %v4332_v12  ;;  %v1916_v6 = vadd.f32 %v4359_v0, %v1867_v60 }
 0x270   :  { %v4335_v5 = vpop.f32.mrf.mxu1  ;;  %v4418_v42 = vadd.f32 %v4417_v56, %v4416_v45 }
 0x271   :  { %v4419_v51 = vpop.f32.mrf.mxu0  ;;  %v1870_v31 = vadd.f32 %v4334_v61, %v1821_v15 }
 0x272   :  { %v4336_v40 = vpop.f32.mrf.mxu1 }
 0x273   :  { %v4337_v34 = vadd.f32 %v4336_v40, %v4335_v5  ;;  %v4420_v10 = vpop.f32.mrf.mxu0  ;;  %v1919_v11 = vadd.f32 %v4362_v24, %v1870_v31 }
 0x274   :  { %v4338_v46 = vpop.f32.mrf.mxu1  ;;  %v4421_v52 = vadd.f32 %v4420_v10, %v4419_v51 }
 0x275   :  { %v1875_v13 = vadd.f32 %v4337_v34, %v1826_v23  ;;  %v4422_v48 = vpop.f32.mrf.mxu0 }
 0x276   :  { %v4339_v3 = vpop.f32.mrf.mxu1 }
 0x277   :  { %v4340_v30 = vadd.f32 %v4339_v3, %v4338_v46  ;;  %v1924_v43 = vadd.f32 %v4365_v27, %v1875_v13  ;;  %v4368_v46 = vadd.f32 %v5809_v29, %v5807_v8  ;;  %v4423_v47 = vpop.f32.mrf.mxu0  ;;  %v4808_v27 = vld [vmem:[%s6304_s5 + $0x170] sm:$0xff]  }
 0x278   :  { %v4424_v63 = vadd.f32 %v4423_v47, %v4422_v48 }
 0x279   :  { %v1878_v39 = vadd.f32 %v4340_v30, %v1829_v18 }
 0x27b   :  { %v1927_v32 = vadd.f32 %v4368_v46, %v1878_v39 }
 0x289   :  { %v4385_v28 = vpop.f32.mrf.mxu1 }
 0x28b   :  { %v4386_v1 = vpop.f32.mrf.mxu1 }
 0x28c   :  { %v4387_v2 = vadd.f32 %v4386_v1, %v4385_v28 }
 0x28d   :  { %v4388_v22 = vpop.f32.mrf.mxu1 }
 0x28e   :  { %v1965_v16 = vadd.f32 %v4387_v2, %v1916_v6 }
 0x28f   :  { %v4389_v26 = vpop.f32.mrf.mxu1 }
 0x290   :  { %v2014_v12 = vadd.f32 %v4415_v4, %v1965_v16  ;;  %v4390_v37 = vadd.f32 %v4389_v26, %v4388_v22 }
 0x291   :  { %v4391_v41 = vpop.f32.mrf.mxu1 }
 0x292   :  { %v2028_v5 = vmul.f32 0.1, %v2014_v12  ;;  %v1968_v25 = vadd.f32 %v4390_v37, %v1919_v11 }
 0x293   :  { %v4392_v49 = vpop.f32.mrf.mxu1 }
 0x294   :  { %v2032_v40 = vmax.f32 %v2014_v12, %v2028_v5  ;;  %v2017_v53 = vadd.f32 %v4418_v42, %v1968_v25  ;;  %v4393_v20 = vadd.f32 %v4392_v49, %v4391_v41  ;;  %v4806_v41 = vld [vmem:[%s6304_s5 + $0x138] sm:$0xff]   ;;  %v4807_v42 = vld [vmem:[%s6304_s5 + $0x1b0] sm:$0xff]  }
 0x295   :  { %v4394_v44 = vpop.f32.mrf.mxu1 }
 0x296   :  { %v2039_v14 = vrot.slane %v2032_v40, 5  ;;  %v2057_v45 = vrot.slane %v2032_v40, 6  ;;  %v2073_v50 = vrot.slane %v2032_v40, 7  ;;  %v2029_v54 = vmul.f32 0.1, %v2017_v53 }
 0x297   :  { %v1973_v55 = vadd.f32 %v4393_v20, %v1924_v43  ;;  %v4395_v56 = vpop.f32.mrf.mxu1  ;;  %v2092_v58 = vrot.slane %v2032_v40, 1  ;;  %v2108_v60 = vrot.slane %v2032_v40, 2  ;;  %v2124_v61 = vrot.slane %v2032_v40, 3 }
 0x298   :  { %2044 = vst [vmem:[#allocation4] sm:$0xf8] %v2039_v14  ;;  %2062 = vst [vmem:[#allocation4 + $0x8] sm:$0xfc] %v2057_v45  ;;  %v4396_v35 = vadd.f32 %v4395_v56, %v4394_v44  ;;  %v2033_v3 = vmax.f32 %v2017_v53, %v2029_v54 }
 0x299   :  { %2078 = vst [vmem:[#allocation4 + $0x10] sm:$0xfe] %v2073_v50  ;;  %v2022_v57 = vadd.f32 %v4421_v52, %v1973_v55 }
 0x29a   :  { %v1976_v8 = vadd.f32 %v4396_v35, %v1927_v32  ;;  %v2040_v29 = vrot.slane %v2033_v3, 5  ;;  %v2058_v62 = vrot.slane %v2033_v3, 6  ;;  %v2074_v28 = vrot.slane %v2033_v3, 7 }
 0x29b   :  { %v2093_v0 = vrot.slane %v2033_v3, 1  ;;  %v2109_v38 = vrot.slane %v2033_v3, 2  ;;  %v2125_v15 = vrot.slane %v2033_v3, 3  ;;  %v2030_v51 = vmul.f32 0.1, %v2022_v57 }
 0x29c   :  { %v2025_v19 = vadd.f32 %v4424_v63, %v1976_v8  ;;  %v2041_v1 = vsel %vm48_vm11, %v2039_v14, %v2040_v29  ;;  %v2059_v36 = vsel %vm70_vm1, %v2057_v45, %v2058_v62  ;;  %v2075_v31 = vsel %vm98_vm2, %v2073_v50, %v2074_v28  ;;  %v4809_v45 = vld [vmem:[%s6304_s5 + $0x130] sm:$0xff]   ;;  %v4810_v50 = vld [vmem:[%s6304_s5 + $0x1a8] sm:$0xff]   ;;  %v4815_v29 = vld [vmem:[%s6304_s5 + $0x120] sm:$0xff]  }
 0x29d   :  { %v5824_v6 = vsel %vm141_vm10, %v2092_v58, %v2093_v0  ;;  %2098 = vst [vmem:[#allocation4 + $0x58] sm:$0x7f] %v2093_v0  ;;  %v5827_v2 = vsel %vm160_vm0, %v2108_v60, %v2109_v38  ;;  %2114 = vst [vmem:[#allocation4 + $0x60] sm:$0x3f] %v2109_v38  ;;  %v5830_v33 = vsel %vm187_vm4, %v2124_v61, %v2125_v15  ;;  %v4813_v58 = vld [vmem:[%s6304_s5 + $0x1a0] sm:$0xff]   ;;  %v4816_v62 = vld [vmem:[%s6304_s5 + $0x198] sm:$0xff]  }
 0x29e   :  { %2130 = vst [vmem:[#allocation4 + $0x68] sm:$0x1f] %v2125_v15  ;;  %v2034_v34 = vmax.f32 %v2022_v57, %v2030_v51  ;;  %v2031_v22 = vmul.f32 0.1, %v2025_v19  ;;  %v2171_v24 = vpack.c.bf16 %v2033_v3, %v2032_v40  ;;  %v4812_v3 = vld [vmem:[%s6304_s5 + $0x128] sm:$0xff]   ;;  %v4814_v61 = vld [vmem:[%s6304_s5 + $0x160] sm:$0xff]  }
 0x29f   :  { %v2141_v7 = vld [vmem:[#allocation4 + $0x8] sm:$0xff]  ;;  %v2140_v10 = vld [vmem:[#allocation4] sm:$0xff]  ;;  %v4817_v28 = vld [vmem:[%s6304_s5 + $0x158] sm:$0xff]  }
 0x2a0   :  { %v2142_v4 = vld [vmem:[#allocation4 + $0x10] sm:$0xff]  ;;  %v2049_v16 = vrot.slane %v2034_v34, 5  ;;  %v2065_v21 = vrot.slane %v2034_v34, 6  ;;  %v2081_v23 = vrot.slane %v2034_v34, 7  ;;  %v2035_v26 = vmax.f32 %v2025_v19, %v2031_v22  ;;  %2718 = vmatprep.mubr.bf16.mxu0 %v2171_v24  ;;  %v4818_v0 = vld [vmem:[%s6304_s5 + $0x118] sm:$0xff]   ;;  %v4822_v19 = vld [vmem:[%s6304_s5 + $0x188] sm:$0xff]  }
 0x2a1   :  { %v2169_v30 = vpack.c.bf16 %v2059_v36, %v2141_v7  ;;  %v2100_v12 = vrot.slane %v2034_v34, 1  ;;  %v2116_v11 = vrot.slane %v2034_v34, 2  ;;  %v2170_v37 = vpack.c.bf16 %v2075_v31, %v2142_v4  ;;  %v4819_v38 = vld [vmem:[%s6304_s5 + $0x190] sm:$0xff]   ;;  %v4824_v36 = vld [vmem:[%s6304_s5 + $0x108] sm:$0xff]   ;;  %v4825_v31 = vld [vmem:[%s6304_s5 + $0x180] sm:$0xff]  }
 0x2a2   :  { %2054 = vst [vmem:[#allocation4 + $0x70] sm:$0xf8] %v2049_v16  ;;  %2070 = vst [vmem:[#allocation4 + $0x78] sm:$0xfc] %v2065_v21  ;;  %v2168_v13 = vpack.c.bf16 %v2041_v1, %v2140_v10  ;;  %v2050_v48 = vrot.slane %v2035_v26, 5  ;;  %v2066_v18 = vrot.slane %v2035_v26, 6  ;;  %v2178_v53 = vpack.c.bf16 %v2035_v26, %v2034_v34 }
 0x2a3   :  { %2086 = vst [vmem:[#allocation4 + $0x80] sm:$0xfe] %v2081_v23  ;;  %v2082_v5 = vrot.slane %v2035_v26, 7  ;;  %v2101_v25 = vrot.slane %v2035_v26, 1  ;;  %2669 = vmatprep.mubr.bf16.mxu1 %v2169_v30  ;;  %v2132_v49 = vrot.slane %v2034_v34, 3  ;;  %v2117_v39 = vrot.slane %v2035_v26, 2  ;;  %2719 = vmatmul.mubr.bf16.vlgmr.msra.gmra.mxu0 %v2170_v37 }
 0x2a4   :  { %v2133_v40 = vrot.slane %v2035_v26, 3  ;;  %2670 = vmatmul.mubr.bf16.vlgmr.msra.gmra.mxu1 %v2168_v13  ;;  %v2051_v20 = vsel %vm48_vm11, %v2049_v16, %v2050_v48  ;;  %v2067_v43 = vsel %vm70_vm1, %v2065_v21, %v2066_v18  ;;  %4592 = vmatpush3.bf16.msra.mxu0 %v5793_v59  ;;  %v4811_v59 = vld [vmem:[%s6304_s5 + $0x168] sm:$0xff]   ;;  %v2152_v57 = vld [vmem:[#allocation4 + $0x60] sm:$0xff]  ;;  %v4820_v15 = vld [vmem:[%s6304_s5 + $0x150] sm:$0xff]  }
 0x2a5   :  { %v2083_v44 = vsel %vm98_vm2, %v2081_v23, %v2082_v5  ;;  %v5845_v46 = vsel %vm141_vm10, %v2100_v12, %v2101_v25  ;;  %2106 = vst [vmem:[#allocation4 + $0xc8] sm:$0x7f] %v2101_v25  ;;  %v5849_v47 = vsel %vm160_vm0, %v2116_v11, %v2117_v39  ;;  %2122 = vst [vmem:[#allocation4 + $0xd0] sm:$0x3f] %v2117_v39  ;;  %4482 = vmatpush3.bf16.msra.mxu1 %v4806_v41  ;;  %v2153_v52 = vld [vmem:[#allocation4 + $0x68] sm:$0xff]  ;;  %v4821_v51 = vld [vmem:[%s6304_s5 + $0x110] sm:$0xff]  }
 0x2a6   :  { %v5852_v14 = vsel %vm187_vm4, %v2132_v49, %v2133_v40  ;;  %2138 = vst [vmem:[#allocation4 + $0xd8] sm:$0x1f] %v2133_v40  ;;  %4593 = vmatprep.subr.bf16.mxu0 %v4807_v42  ;;  %4483 = vmatprep.subr.bf16.mxu1 %v4808_v27  ;;  %v2174_v60 = vpack.c.bf16 %v2153_v52, %v5830_v33  ;;  %v4823_v1 = vld [vmem:[%s6304_s5 + $0x148] sm:$0xff]   ;;  %v4827_v33 = vld [vmem:[%s6304_s5 + $0x100] sm:$0xff]   ;;  %v2151_v22 = vld [vmem:[#allocation4 + $0x58] sm:$0xff] }
 0x2a7   :  { %2726 = vmatprep.mubr.bf16.mxu0 %v2178_v53  ;;  %v2173_v8 = vpack.c.bf16 %v2152_v57, %v5827_v2  ;;  %v4826_v2 = vld [vmem:[%s6304_s5 + $0x140] sm:$0xff]   ;;  %v2172_v4 = vpack.c.bf16 %v2151_v22, %v5824_v6  ;;  %v4828_v23 = vld [vmem:[%s6306_s7 + $0xb8] sm:$0xff]   ;;  %v4915_v6 = vmov 0   ;;  %v4829_v30 = vld [vmem:[%s6306_s7 + $0xb0] sm:$0xff]   ;;  %s4917_s5 = smov [#allocation7]  }
 0x2a8   :  { %4594 = vmatpush3.bf16.msra.mxu0 %v4807_v42  ;;  %v4833_v26 = vld [vmem:[%s6306_s7 + $0x78] sm:$0xff]   ;;  %v4836_v11 = vld [vmem:[%s6306_s7 + $0x70] sm:$0xff]   ;;  %v4839_v13 = vld [vmem:[%s6306_s7 + $0x68] sm:$0xff]   ;;  %s3957_s23 = sshll.u32 %s4917_s5, 4  ;;  %s3958_s23 = int_to_ptr.vmem [resolvable:$true] %s3957_s23 }
 0x2a9   :  { %v2155_v54 = vld [vmem:[#allocation4 + $0x78] sm:$0xff]  ;;  %v2154_v56 = vld [vmem:[#allocation4 + $0x70] sm:$0xff]  ;;  %4484 = vmatpush3.bf16.msra.mxu1 %v4809_v45  ;;  %4595 = vmatprep.subr.bf16.mxu0 %v4810_v50  ;;  %v4830_v41 = vld [vmem:[%s6306_s7 + $0xa8] sm:$0xff]   ;;  %p4894_p1 = scmp.lt.s32.totalorder %s3958_s23, %s3958_s23 }
 0x2aa   :  { %v2156_v55 = vld [vmem:[#allocation4 + $0x80] sm:$0xff]  ;;  %v2176_v32 = vpack.c.bf16 %v2067_v43, %v2155_v54  ;;  %v2175_v63 = vpack.c.bf16 %v2051_v20, %v2154_v56  ;;  %4485 = vmatprep.subr.bf16.mxu1 %v4811_v59  ;;  %v4834_v12 = vld [vmem:[%s6306_s7 + $0x38] sm:$0xff]   ;;  %v4837_v37 = vld [vmem:[%s6306_s7 + $0x30] sm:$0xff]  }
 0x2ab   :  { %v2177_v35 = vpack.c.bf16 %v2083_v44, %v2156_v55  ;;  %v4840_v42 = vld [vmem:[%s6306_s7 + $0x28] sm:$0xff]   ;;  %v4831_v48 = vld [vmem:[%s6306_s7 + $0xa0] sm:$0xff]   ;;  %v4832_v18 = vld [vmem:[%s6306_s7 + $0x98] sm:$0xff]  }
 0x2ac   :  { %2677 = vmatprep.mubr.bf16.mxu1 %v2176_v32  ;;  %4596 = vmatpush3.bf16.msra.mxu0 %v4810_v50  ;;  %v2166_v24 = vld [vmem:[#allocation4 + $0xd0] sm:$0xff]  ;;  %v2165_v16 = vld [vmem:[#allocation4 + $0xc8] sm:$0xff]  ;;  %v4841_v27 = vld [vmem:[%s6306_s7 + $0x80] sm:$0xff]  }
 0x2ad   :  { %2727 = vmatmul.mubr.bf16.gmra.mxu0 %v2177_v35  ;;  %2678 = vmatmul.mubr.bf16.gmra.mxu1 %v2175_v63  ;;  %v2167_v34 = vld [vmem:[#allocation4 + $0xd8] sm:$0xff]  ;;  %v2180_v10 = vpack.c.bf16 %v2166_v24, %v5849_v47  ;;  %v2179_v21 = vpack.c.bf16 %v2165_v16, %v5845_v46  ;;  %v4835_v5 = vld [vmem:[%s6306_s7 + $0x90] sm:$0xff]   ;;  %v4838_v25 = vld [vmem:[%s6306_s7 + $0x88] sm:$0xff]  }
 0x2ae   :  { %4486 = vmatpush3.bf16.msra.mxu1 %v4812_v3  ;;  %4607 = vmatprep.mubr.bf16.mxu0 %v2174_v60  ;;  %v2181_v7 = vpack.c.bf16 %v2167_v34, %v5852_v14  ;;  %v4108_v55 = vld [vmem:[%s6305_s6] ss:$0 sm:$0xff] }
 0x2af   :  { %2767 = vmatprep.mubr.bf16.mxu1 %v2173_v8  ;;  %4597 = vmatprep.subr.bf16.mxu0 %v4813_v58  ;;  %v4843_v60 = vld [vmem:[%s6306_s7 + $0x20] sm:$0xff]  }
 0x2b0   :  { %4487 = vmatprep.subr.bf16.mxu1 %v4814_v61  ;;  %4598 = vmatpush3.bf16.msra.mxu0 %v4813_v58  ;;  %v4842_v58 = vld [vmem:[%s6306_s7 + $0x60] sm:$0xff]   ;;  %v4844_v61 = vld [vmem:[%s6306_s7 + $0xd8] sm:$0xff]  }
 0x2b1   :  { %4599 = vmatprep.subr.bf16.mxu0 %v4816_v62 }
 0x2b2   :  { %4488 = vmatpush3.bf16.msra.mxu1 %v4815_v29 }
 0x2b3   :  { %4489 = vmatprep.subr.bf16.mxu1 %v4817_v28 }
 0x2b4   :  { %4600 = vmatpush3.bf16.msra.mxu0 %v4816_v62 }
 0x2b5   :  { %4601 = vmatprep.subr.bf16.mxu0 %v4819_v38 }
 0x2b6   :  { %4490 = vmatpush3.bf16.msra.mxu1 %v4818_v0 }
 0x2b7   :  { %4491 = vmatprep.subr.bf16.mxu1 %v4820_v15 }
 0x2b8   :  { %4602 = vmatpush3.bf16.msra.mxu0 %v4819_v38 }
 0x2b9   :  { %4603 = vmatprep.subr.bf16.mxu0 %v4822_v19 }
 0x2ba   :  { %4492 = vmatpush3.bf16.msra.mxu1 %v4821_v51 }
 0x2bb   :  { %4493 = vmatprep.subr.bf16.mxu1 %v4823_v1  ;;  %v4846_v1 = vld [vmem:[%s6306_s7 + $0x18] sm:$0xff]  }
 0x2bc   :  { %4604 = vmatpush3.bf16.msra.mxu0 %v4822_v19  ;;  %v4845_v19 = vld [vmem:[%s6306_s7 + $0x58] sm:$0xff]  }
 0x2bd   :  { %4605 = vmatprep.subr.bf16.mxu0 %v4825_v31 }
 0x2be   :  { %4494 = vmatpush3.bf16.msra.mxu1 %v4824_v36  ;;  %v4847_v36 = vld [vmem:[%s6306_s7 + $0xd0] sm:$0xff]  }
 0x2bf   :  { %4495 = vmatprep.subr.bf16.mxu1 %v4826_v2 }
 0x2c0   :  { %4606 = vmatpush3.bf16.msra.mxu0 %v4825_v31 }
 0x2c1   :  { %3296 = vmatprep.subr.bf16.mxu0 %v4915_v6 }
 0x2c2   :  { %4496 = vmatpush3.bf16.msra.mxu1 %v4827_v33 }
 0x2c3   :  { %4608 = vmatmul.mubr.bf16.vlgmr.msra.gmra.mxu0 %v2181_v7  ;;  %4519 = vmatprep.subr.bf16.mxu1 %v4833_v26  ;;  %v4849_v26 = vld [vmem:[%s6306_s7 + $0x10] sm:$0xff]  }
 0x2c4   :  { %3297 = vmatpush1.bf16.msra.mxu0 %v4828_v23  ;;  %v4848_v23 = vld [vmem:[%s6306_s7 + $0x50] sm:$0xff]  }
 0x2c5   :  { %2768 = vmatmul.mubr.bf16.vlgmr.msra.gmra.mxu1 %v2172_v4  ;;  %3298 = vmatprep.subr.bf16.mxu0 %v4915_v6 }
 0x2c6   :  { %2775 = vmatprep.mubr.bf16.mxu1 %v2180_v10  ;;  %4520 = vmatpush3.bf16.msra.mxu1 %v4834_v12 }
 0x2c7   :  { %4521 = vmatprep.subr.bf16.mxu1 %v4836_v11 }
 0x2c8   :  { %3299 = vmatpush1.bf16.msra.mxu0 %v4829_v30  ;;  %v4850_v30 = vld [vmem:[%s6306_s7 + $0xc8] sm:$0xff]  }
 0x2c9   :  { %3300 = vmatprep.subr.bf16.mxu0 %v4915_v6 }
 0x2ca   :  { %4522 = vmatpush3.bf16.msra.mxu1 %v4837_v37 }
 0x2cb   :  { %4523 = vmatprep.subr.bf16.mxu1 %v4839_v13 }
 0x2cc   :  { %3301 = vmatpush1.bf16.msra.mxu0 %v4830_v41 }
 0x2cd   :  { %2776 = vmatmul.mubr.bf16.gmra.mxu1 %v2179_v21  ;;  %3302 = vmatprep.subr.bf16.mxu0 %v4915_v6 }
 0x2ce   :  { %4524 = vmatpush3.bf16.msra.mxu1 %v4840_v42 }
 0x2cf   :  { %4525 = vmatprep.subr.bf16.mxu1 %v4842_v58 }
 0x2d0   :  { %3303 = vmatpush1.bf16.msra.mxu0 %v4831_v48 }
 0x2d1   :  { %3304 = vmatprep.subr.bf16.mxu0 %v4915_v6 }
 0x2d2   :  { %4526 = vmatpush3.bf16.msra.mxu1 %v4843_v60  ;;  %v4855_v60 = vld [vmem:[%s6306_s7] sm:$0xff]  }
 0x2d3   :  { %4527 = vmatprep.subr.bf16.mxu1 %v4845_v19 }
 0x2d4   :  { %3305 = vmatpush1.bf16.msra.mxu0 %v4832_v18 }
 0x2d5   :  { %3306 = vmatprep.subr.bf16.mxu0 %v4915_v6 }
 0x2d6   :  { %4528 = vmatpush3.bf16.msra.mxu1 %v4846_v1 }
 0x2d7   :  { %4529 = vmatprep.subr.bf16.mxu1 %v4848_v23 }
 0x2d8   :  { %3307 = vmatpush1.bf16.msra.mxu0 %v4835_v5 }
 0x2d9   :  { %3308 = vmatprep.subr.bf16.mxu0 %v4915_v6 }
 0x2da   :  { %4530 = vmatpush3.bf16.msra.mxu1 %v4849_v26 }
 0x2dc   :  { %3309 = vmatpush1.bf16.msra.mxu0 %v4838_v25 }
 0x2dd   :  { %3310 = vmatprep.subr.bf16.mxu0 %v4915_v6 }
 0x2e0   :  { %3311 = vmatpush1.bf16.msra.mxu0 %v4841_v27 }
 0x2e1   :  { %3320 = vmatprep.subr.bf16.mxu0 %v4915_v6 }
 0x2e4   :  { %3321 = vmatpush2.bf16.msra.mxu0 %v4844_v61 }
 0x2e5   :  { %3322 = vmatprep.subr.bf16.mxu0 %v4915_v6 }
 0x2e8   :  { %3323 = vmatpush2.bf16.msra.mxu0 %v4847_v36 }
 0x2e9   :  { %3324 = vmatprep.subr.bf16.mxu0 %v4915_v6 }
 0x2ec   :  { %3325 = vmatpush2.bf16.msra.mxu0 %v4850_v30 }
 0x2ed   :  { %3326 = vmatprep.subr.bf16.mxu0 %v4915_v6 }
 0x363   :  { %v4469_v49 = vpop.f32.mrf.mxu0 }
 0x364   :  { %v4441_v39 = vpop.f32.mrf.mxu1 }
 0x365   :  { %v4470_v40 = vpop.f32.mrf.mxu0 }
 0x366   :  { %v4442_v53 = vpop.f32.mrf.mxu1  ;;  %v4471_v8 = vadd.f32 %v4470_v40, %v4469_v49  ;;  %v4851_v49 = vld [vmem:[%s6306_s7 + $0x48] sm:$0xff]  }
 0x367   :  { %v4472_v20 = vpop.f32.mrf.mxu0  ;;  %v4443_v54 = vadd.f32 %v4442_v53, %v4441_v39  ;;  %4531 = vmatprep.subr.bf16.mxu1 %v4851_v49 }
 0x368   :  { %v4444_v43 = vpop.f32.mrf.mxu1 }
 0x369   :  { %v4473_v44 = vpop.f32.mrf.mxu0  ;;  %v2672_v35 = vadd.f32 %v4443_v54, %v4108_v55  ;;  %v4854_v54 = vld [vmem:[%s6306_s7 + $0x40] sm:$0xff]  }
 0x36a   :  { %v4445_v46 = vpop.f32.mrf.mxu1  ;;  %v4474_v31 = vadd.f32 %v4473_v44, %v4472_v20  ;;  %v4852_v44 = vld [vmem:[%s6306_s7 + $0x8] sm:$0xff]  }
 0x36b   :  { %v4446_v63 = vadd.f32 %v4445_v46, %v4444_v43  ;;  %v2721_v38 = vadd.f32 %v4471_v8, %v2672_v35  ;;  %v4853_v46 = vld [vmem:[%s6306_s7 + $0xc0] sm:$0xff]   ;;  %4532 = vmatpush3.bf16.msra.mxu1 %v4852_v44 }
 0x36c   :  { %3327 = vmatpush2.bf16.msra.mxu0 %v4853_v46  ;;  %4533 = vmatprep.subr.bf16.mxu1 %v4854_v54 }
 0x36d   :  { %v4475_v47 = vpop.f32.mrf.mxu0  ;;  %v4447_v14 = vpop.f32.mrf.mxu1  ;;  %v2675_v0 = vadd.f32 %v4446_v63, %v4108_v55 }
 0x36f   :  { %v4476_v45 = vpop.f32.mrf.mxu0  ;;  %v4448_v50 = vpop.f32.mrf.mxu1  ;;  %v2724_v4 = vadd.f32 %v4474_v31, %v2675_v0  ;;  %4534 = vmatpush3.bf16.msra.mxu1 %v4855_v60 }
 0x370   :  { %v4449_v29 = vadd.f32 %v4448_v50, %v4447_v14  ;;  %v4477_v16 = vadd.f32 %v4476_v45, %v4475_v47 }
 0x371   :  { %v5974_v59 = vpop.f32.mrf.mxu0  ;;  %v4450_v52 = vpop.f32.mrf.mxu1 }
 0x372   :  { %v2680_v33 = vadd.f32 %v4449_v29, %v4108_v55 }
 0x373   :  { %v4479_v56 = vpop.f32.mrf.mxu0  ;;  %v4451_v32 = vpop.f32.mrf.mxu1 }
 0x374   :  { %v4452_v34 = vadd.f32 %v4451_v32, %v4450_v52  ;;  %v2729_v41 = vadd.f32 %v4477_v16, %v2680_v33  ;;  %v4480_v25 = vadd.f32 %v4479_v56, %v5974_v59 }
 0x376   :  { %v2683_v37 = vadd.f32 %v4452_v34, %v4108_v55 }
 0x378   :  { %v2732_v53 = vadd.f32 %v4480_v25, %v2683_v37 }
 0x383   :  { %v5979_v3 = vpop.f32.mrf.mxu0 }
 0x385   :  { %v4497_v57 = vpop.f32.mrf.mxu1  ;;  %v2818_v62 = vpop.f32.mrf.mxu0 }
 0x387   :  { %v4498_v28 = vpop.f32.mrf.mxu1  ;;  %v6002_v22 = vpop.f32.mrf.mxu0 }
 0x388   :  { %v4499_v15 = vadd.f32 %v4498_v28, %v4497_v57 }
 0x389   :  { %v4500_v51 = vpop.f32.mrf.mxu1  ;;  %v2821_v13 = vpop.f32.mrf.mxu0 }
 0x38a   :  { %v2770_v2 = vadd.f32 %v4499_v15, %v2721_v38 }
 0x38b   :  { %v4501_v24 = vpop.f32.mrf.mxu1 }
 0x38c   :  { %v2819_v7 = vadd.f32 %v2818_v62, %v2770_v2  ;;  %v4502_v10 = vadd.f32 %v4501_v24, %v4500_v51 }
 0x38d   :  { %v4503_v21 = vpop.f32.mrf.mxu1 }
 0x38e   :  { %v2833_v12 = vmul.f32 0.1, %v2819_v7  ;;  %v2773_v11 = vadd.f32 %v4502_v10, %v2724_v4 }
 0x38f   :  { %v4504_v42 = vpop.f32.mrf.mxu1 }
 0x390   :  { %v6016_v48 = vmax.f32 %v2819_v7, %v2833_v12  ;;  %v2822_v18 = vadd.f32 %v2821_v13, %v2773_v11  ;;  %v4505_v5 = vadd.f32 %v4504_v42, %v4503_v21 }
 0x391   :  { %v4506_v27 = vpop.f32.mrf.mxu1 }
 0x392   :  { %v2834_v39 = vmul.f32 0.1, %v2822_v18  ;;  %v2778_v40 = vadd.f32 %v4505_v5, %v2729_v41  ;;  %2909 = vrot.lane.b32.xlu0 %v6016_v48, %s4913_s13  ;;  %v2893_v43 = vrot.slane %v6016_v48, 7  ;;  %v2845_v6 = vrot.slane %v6016_v48, 5 }
 0x393   :  { %v4507_v20 = vpop.f32.mrf.mxu1  ;;  %v2866_v50 = vrot.slane %v6016_v48, 6  ;;  %v2968_v59 = vrot.slane %v6016_v48, 3  ;;  %v2942_v52 = vrot.slane %v6016_v48, 2  ;;  %v2925_v57 = vrot.slane %v6016_v48, 1 }
 0x394   :  { %v2838_v47 = vmax.f32 %v2822_v18, %v2834_v39  ;;  %v2827_v14 = vadd.f32 %v5979_v3, %v2778_v40  ;;  %v4508_v45 = vadd.f32 %v4507_v20, %v4506_v27  ;;  %2899 = vst.msk [vmem:[#allocation5 + $0x8] sm:$0xfe] %vm2898_vm7, %v2893_v43 }
 0x395   :  { %2851 = vst.msk [vmem:[#allocation5] sm:$0xf8] %vm2850_vm9, %v2845_v6 }
 0x396   :  { %v2969_v55 = vrot.slane %v2838_v47, 3  ;;  %v2835_v56 = vmul.f32 0.1, %v2827_v14  ;;  %v2781_v32 = vadd.f32 %v4508_v45, %v2732_v53  ;;  %2911 = vrot.lane.b32.xlu1 %v2838_v47, %s4913_s13  ;;  %2869 = vrot.lane.b32.xlu0 %v2866_v50, %s4913_s13  ;;  %v2943_v35 = vrot.slane %v2838_v47, 2 }
 0x397   :  { %v2894_v63 = vrot.slane %v2838_v47, 7  ;;  %v2926_v3 = vrot.slane %v2838_v47, 1  ;;  %v2846_v58 = vrot.slane %v2838_v47, 5  ;;  %v2867_v28 = vrot.slane %v2838_v47, 6 }
 0x398   :  { %v2970_v61 = vsel %vm187_vm4, %v2968_v59, %v2969_v55  ;;  %2975 = vst.msk [vmem:[#allocation5 + $0x38] sm:$0x1f] %vm2974_vm8, %v2969_v55  ;;  %v2839_v8 = vmax.f32 %v2827_v14, %v2835_v56  ;;  %v2830_v29 = vadd.f32 %v6002_v22, %v2781_v32  ;;  %v2944_v62 = vsel %vm160_vm0, %v2942_v52, %v2943_v35 }
 0x399   :  { %2973 = vst.msk [vmem:[#allocation5 + $0x18] sm:$0xff] %vm2852_vm14, %v2970_v61  ;;  %v2895_v0 = vsel %vm98_vm2, %v2893_v43, %v2894_v63  ;;  %v2927_v38 = vsel %vm141_vm10, %v2925_v57, %v2926_v3  ;;  %v2847_v15 = vsel %vm48_vm11, %v2845_v6, %v2846_v58  ;;  %v2868_v31 = vsel %vm70_vm1, %v2866_v50, %v2867_v28 }
 0x39a   :  { %2932 = vst.msk [vmem:[#allocation5 + $0x30] sm:$0x7f] %vm2931_vm13, %v2926_v3  ;;  %v2836_v51 = vmul.f32 0.1, %v2830_v29  ;;  %2947 = vrot.lane.b32.xlu1 %v2943_v35, %s4913_s13  ;;  %2945 = vrot.lane.b32.xlu0 %v2944_v62, %s4913_s13  ;;  %v2902_v19 = vrot.slane %v2839_v8, 7  ;;  %v2857_v1 = vrot.slane %v2839_v8, 5 }
 0x39b   :  { %2900 = vst.msk [vmem:[#allocation5 + $0x28] sm:$0xff] %vm2852_vm14, %v2895_v0  ;;  %2930 = vst.msk [vmem:[#allocation5 + $0x10] sm:$0xff] %vm2852_vm14, %v2927_v38  ;;  %v2978_v2 = vrot.slane %v2839_v8, 3  ;;  %v2934_v24 = vrot.slane %v2839_v8, 1  ;;  %v2880_v16 = vrot.slane %v2839_v8, 6  ;;  %v2956_v13 = vrot.slane %v2839_v8, 2 }
 0x39c   :  { %2955 = vst.msk [vmem:[#allocation5 + $0x30] sm:$0xc0] %vm2954_vm15, %v4912_v17  ;;  %v2840_v36 = vmax.f32 %v2830_v29, %v2836_v51  ;;  %v4165_v38 = vld [vmem:[%s6307_s8] ss:$0 sm:$0xff] }
 0x39d   :  { %2853 = vst.msk [vmem:[#allocation5 + $0x20] sm:$0xff] %vm2852_vm14, %v2847_v15 }
 0x39e   :  { %2907 = vst.msk [vmem:[#allocation5 + $0x48] sm:$0xfe] %vm2898_vm7, %v2902_v19  ;;  %v2979_v33 = vrot.slane %v2840_v36, 3  ;;  %2913 = vrot.lane.b32.xlu0 %v2839_v8, %s4913_s13  ;;  %2871 = vrot.lane.b32.xlu1 %v2868_v31, %s4913_s13  ;;  %v2903_v34 = vrot.slane %v2840_v36, 7  ;;  %v2935_v7 = vrot.slane %v2840_v36, 1  ;;  %v2858_v4 = vrot.slane %v2840_v36, 5 }
 0x39f   :  { %2862 = vst.msk [vmem:[#allocation5 + $0x40] sm:$0xf8] %vm2850_vm9, %v2857_v1  ;;  %v2993_v22 = vld [vmem:[#allocation5 + $0x38] sm:$0xff]  ;;  %v2957_v23 = vrot.slane %v2840_v36, 2  ;;  %v2881_v12 = vrot.slane %v2840_v36, 6 }
 0x3a0   :  { %v2980_v10 = vsel %vm187_vm4, %v2978_v2, %v2979_v33  ;;  %2984 = vst.msk [vmem:[#allocation5 + $0x78] sm:$0x1f] %vm2974_vm8, %v2979_v33  ;;  %v2989_v21 = vld [vmem:[#allocation5 + $0x18] sm:$0xff]  ;;  %v2904_v26 = vsel %vm98_vm2, %v2902_v19, %v2903_v34  ;;  %v2936_v11 = vsel %vm141_vm10, %v2934_v24, %v2935_v7  ;;  %v2859_v37 = vsel %vm48_vm11, %v2857_v1, %v2858_v4 }
 0x3a1   :  { %v3005_v30 = vpack.c.bf16 %v2993_v22, %v2989_v21  ;;  %2983 = vst.msk [vmem:[#allocation5 + $0x58] sm:$0xff] %vm2852_vm14, %v2980_v10  ;;  %2908 = vst.msk [vmem:[#allocation5 + $0x68] sm:$0xff] %vm2852_vm14, %v2904_v26  ;;  %v2958_v41 = vsel %vm160_vm0, %v2956_v13, %v2957_v23  ;;  %v2882_v42 = vsel %vm70_vm1, %v2880_v16, %v2881_v12  ;;  %vm2877_vm4 = vcmask 1048064  }
 0x3a2   :  { %2940 = vst.msk [vmem:[#allocation5 + $0x70] sm:$0x7f] %vm2931_vm13, %v2935_v7  ;;  %2883 = vrot.lane.b32.xlu0 %v2880_v16, %s4913_s13  ;;  %2915 = vrot.lane.b32.xlu1 %v2840_v36, %s4913_s13  ;;  %vm2875_vm10 = vcmask 1048066   ;;  %vm2952_vm0 = vcmask 1046016   ;;  %v4916_v22 = vmov 1983009808  }
 0x3a3   :  { %2939 = vst.msk [vmem:[#allocation5 + $0x50] sm:$0xff] %vm2852_vm14, %v2936_v11  ;;  %2863 = vst.msk [vmem:[#allocation5 + $0x60] sm:$0xff] %vm2852_vm14, %v2859_v37  ;;  %4194 = vmatprep.mubr.msk.bf16.mxu0 %vm2852_vm14, %v3005_v30  ;;  %v3365_v24 = vunpack.c.l.s4 %v4916_v22  ;;  %vm3357_vm1 = vcmask 254976   ;;  %vm3409_vm11 = vcmask 1042176  }
 0x3a4   :  { %2967 = vst.msk [vmem:[#allocation5 + $0x70] sm:$0xc0] %vm2954_vm15, %v4912_v17 }
 0x3a5   :  { %v3366_v30 = vunpack.c.0.s8 %v3365_v24 }
 0x3a6   :  { %2959 = vrot.lane.b32.xlu0 %v2958_v41, %s4913_s13  ;;  %2885 = vrot.lane.b32.xlu1 %v2882_v42, %s4913_s13  ;;  %v4856_v42 = vld [vmem:[%s6308_s9 + $0x78] sm:$0xff]  }
 0x3a7   :  { %v3001_v43 = vld [vmem:[#allocation5 + $0x78] sm:$0xff]  ;;  %4547 = vmatprep.subr.bf16.mxu1 %v4856_v42 }
 0x3a8   :  { %v2997_v20 = vld [vmem:[#allocation5 + $0x58] sm:$0xff] }
 0x3a9   :  { %v3009_v45 = vpack.c.bf16 %v3001_v43, %v2997_v20  ;;  %v4858_v20 = vld [vmem:[%s6308_s9 + $0x70] sm:$0xff]  }
 0x3aa   :  { %2961 = vrot.lane.b32.xlu1 %v2957_v23, %s4913_s13  ;;  %v4859_v43 = vld [vmem:[%s6308_s9 + $0x30] sm:$0xff]  }
 0x404   :  { %v2910_v48 = vpop.permute.xlu0 %2909 }
 0x405   :  { %2921 = vst.msk [vmem:[#allocation5 + $0x8] sm:$0xff] %vm2877_vm4, %v2910_v48  ;;  %v4857_v48 = vld [vmem:[%s6308_s9 + $0x38] sm:$0xff]  }
 0x408   :  { %v2912_v18 = vpop.permute.xlu1 %2911  ;;  %v2870_v17 = vpop.permute.xlu0 %2869 }
 0x409   :  { %2922 = vst.msk [vmem:[#allocation5 + $0x28] sm:$0xff] %vm2877_vm4, %v2912_v18 }
 0x40a   :  { %2876 = vst.msk [vmem:[#allocation5] sm:$0xfc] %vm2875_vm10, %v2870_v17 }
 0x40c   :  { %v2948_v5 = vpop.permute.xlu1 %2947  ;;  %v2946_v25 = vpop.permute.xlu0 %2945  ;;  %v2987_v39 = vld [vmem:[#allocation5 + $0x8] sm:$0xff] }
 0x40d   :  { %2953 = vst.msk [vmem:[#allocation5 + $0x30] sm:$0x3f] %vm2952_vm0, %v2948_v5 }
 0x40e   :  { %2951 = vst.msk [vmem:[#allocation5 + $0x10] sm:$0xff] %vm2877_vm4, %v2946_v25 }
 0x410   :  { %v2914_v27 = vpop.permute.xlu0 %2913  ;;  %v2872_v49 = vpop.permute.xlu1 %2871  ;;  %v2991_v40 = vld [vmem:[#allocation5 + $0x28] sm:$0xff] }
 0x411   :  { %2923 = vst.msk [vmem:[#allocation5 + $0x48] sm:$0xff] %vm2877_vm4, %v2914_v27  ;;  %2878 = vst.msk [vmem:[#allocation5 + $0x20] sm:$0xff] %vm2877_vm4, %v2872_v49  ;;  %v3003_v53 = vpack.c.bf16 %v2991_v40, %v2987_v39  ;;  %v2986_v52 = vld [vmem:[#allocation5] sm:$0xff]  ;;  %v6114_v27 = vsub.s32 %v3366_v30, %v5324_v9 }
 0x413   :  { %3279 = vmatprep.mubr.bf16.mxu1 %v3003_v53 }
 0x414   :  { %v2884_v6 = vpop.permute.xlu0 %2883  ;;  %v2916_v44 = vpop.permute.xlu1 %2915  ;;  %v2992_v47 = vld [vmem:[#allocation5 + $0x30] sm:$0xff] }
 0x415   :  { %v2988_v46 = vld [vmem:[#allocation5 + $0x10] sm:$0xff]  ;;  %2889 = vst.msk [vmem:[#allocation5 + $0x40] sm:$0xfc] %vm2875_vm10, %v2884_v6 }
 0x416   :  { %2924 = vst.msk [vmem:[#allocation5 + $0x68] sm:$0xff] %vm2877_vm4, %v2916_v44  ;;  %v3004_v14 = vpack.c.bf16 %v2992_v47, %v2988_v46 }
 0x418   :  { %3329 = vmatmul.mubr.bf16.vlgmr.msra.gmra.mxu0 %v3004_v14  ;;  %v2960_v50 = vpop.permute.xlu0 %2959  ;;  %v2886_v59 = vpop.permute.xlu1 %2885  ;;  %v2990_v54 = vld [vmem:[#allocation5 + $0x20] sm:$0xff]  ;;  %v2995_v32 = vld [vmem:[#allocation5 + $0x48] sm:$0xff] }
 0x419   :  { %4195 = vmatprep.mubr.msk.bf16.mxu0 %vm2852_vm14, %v3009_v45  ;;  %2965 = vst.msk [vmem:[#allocation5 + $0x50] sm:$0xff] %vm2877_vm4, %v2960_v50  ;;  %2890 = vst.msk [vmem:[#allocation5 + $0x60] sm:$0xff] %vm2877_vm4, %v2886_v59  ;;  %v3002_v55 = vpack.c.bf16 %v2990_v54, %v2986_v52 }
 0x41b   :  { %3280 = vmatmul.mubr.bf16.vlgmr.msra.gmra.mxu1 %v3002_v55 }
 0x41c   :  { %v2962_v56 = vpop.permute.xlu1 %2961  ;;  %v2994_v3 = vld [vmem:[#allocation5 + $0x40] sm:$0xff]  ;;  %4548 = vmatpush3.bf16.msra.mxu1 %v4857_v48 }
 0x41d   :  { %v2999_v35 = vld [vmem:[#allocation5 + $0x68] sm:$0xff]  ;;  %2966 = vst.msk [vmem:[#allocation5 + $0x70] sm:$0x3f] %vm2952_vm0, %v2962_v56  ;;  %4549 = vmatprep.subr.bf16.mxu1 %v4858_v20 }
 0x41e   :  { %v3007_v63 = vpack.c.bf16 %v2999_v35, %v2995_v32  ;;  %v4860_v35 = vld [vmem:[%s6308_s9 + $0x68] sm:$0xff]  }
 0x420   :  { %3287 = vmatprep.mubr.bf16.mxu1 %v3007_v63  ;;  %v2998_v57 = vld [vmem:[#allocation5 + $0x60] sm:$0xff]  ;;  %v2996_v60 = vld [vmem:[#allocation5 + $0x50] sm:$0xff]  ;;  %4550 = vmatpush3.bf16.msra.mxu1 %v4859_v43  ;;  %v4861_v63 = vld [vmem:[%s6308_s9 + $0x28] sm:$0xff]  }
 0x421   :  { %v3006_v58 = vpack.c.bf16 %v2998_v57, %v2994_v3  ;;  %4551 = vmatprep.subr.bf16.mxu1 %v4860_v35 }
 0x423   :  { %3288 = vmatmul.mubr.bf16.gmra.mxu1 %v3006_v58 }
 0x424   :  { %v3000_v61 = vld [vmem:[#allocation5 + $0x70] sm:$0xff]  ;;  %4552 = vmatpush3.bf16.msra.mxu1 %v4861_v63 }
 0x425   :  { %v3008_v8 = vpack.c.bf16 %v3000_v61, %v2996_v60 }
 0x427   :  { %3337 = vmatmul.mubr.bf16.gmra.mxu0 %v3008_v8 }
 0x4d8   :  { %v3330_v29 = vpop.f32.mrf.mxu0 }
 0x4da   :  { %v3332_v62 = vpop.f32.mrf.mxu0 }
 0x4db   :  { %v4535_v28 = vpop.f32.mrf.mxu1 }
 0x4dc   :  { %v3333_v0 = vpop.f32.mrf.mxu0 }
 0x4dd   :  { %v4536_v15 = vpop.f32.mrf.mxu1 }
 0x4de   :  { %v3335_v51 = vpop.f32.mrf.mxu0  ;;  %v4537_v19 = vadd.f32 %v4536_v15, %v4535_v28  ;;  %v4863_v15 = vld [vmem:[%s6308_s9 + $0x20] sm:$0xff]  }
 0x4df   :  { %v4538_v1 = vpop.f32.mrf.mxu1 }
 0x4e0   :  { %v3282_v36 = vadd.f32 %v4537_v19, %v4165_v38 }
 0x4e1   :  { %v4539_v31 = vpop.f32.mrf.mxu1 }
 0x4e2   :  { %v3331_v2 = vadd.f32 %v3330_v29, %v3282_v36  ;;  %v4540_v33 = vadd.f32 %v4539_v31, %v4538_v1 }
 0x4e3   :  { %v4541_v34 = vpop.f32.mrf.mxu1 }
 0x4e4   :  { %v3345_v4 = vmul.f32 0.1, %v3331_v2  ;;  %v3285_v16 = vadd.f32 %v4540_v33, %v4165_v38 }
 0x4e5   :  { %v4542_v7 = vpop.f32.mrf.mxu1 }
 0x4e6   :  { %v4543_v10 = vadd.f32 %v4542_v7, %v4541_v34  ;;  %v6105_v37 = vmax.f32 %v3331_v2, %v3345_v4  ;;  %v3334_v18 = vadd.f32 %v3333_v0, %v3285_v16 }
 0x4e7   :  { %v4544_v21 = vpop.f32.mrf.mxu1  ;;  %v3338_v23 = vpop.f32.mrf.mxu0 }
 0x4e8   :  { %v3290_v26 = vadd.f32 %v4543_v10, %v4165_v38  ;;  %v3360_v53 = vrot.slane %v6105_v37, 1  ;;  %v3346_v6 = vmul.f32 0.1, %v3334_v18  ;;  %v3417_v44 = vrot.slane %v6105_v37, 5 }
 0x4e9   :  { %v4545_v12 = vpop.f32.mrf.mxu1  ;;  %v3340_v11 = vpop.f32.mrf.mxu0  ;;  %v3375_v9 = vrot.slane %v6105_v37, 2  ;;  %v3434_v59 = vrot.slane %v6105_v37, 6  ;;  %v3393_v61 = vrot.slane %v6105_v37, 3  ;;  %v3451_v28 = vrot.slane %v6105_v37, 7 }
 0x4ea   :  { %v3339_v13 = vadd.f32 %v3338_v23, %v3290_v26  ;;  %v4546_v41 = vadd.f32 %v4545_v12, %v4544_v21  ;;  %v6140_v58 = vmax.f32 %v3334_v18, %v3346_v6  ;;  %v3411_v1 = vrot.slane %v6105_v37, 4  ;;  %v4864_v23 = vld [vmem:[%s6308_s9 + $0x58] sm:$0xff]  }
 0x4eb   :  { %v3341_v17 = vpop.f32.mrf.mxu0  ;;  %v4865_v26 = vld [vmem:[%s6308_s9 + $0x18] sm:$0xff]  }
 0x4ec   :  { %v3347_v5 = vmul.f32 0.1, %v3339_v13  ;;  %v3293_v25 = vadd.f32 %v4546_v41, %v4165_v38  ;;  %v4862_v38 = vld [vmem:[%s6308_s9 + $0x60] sm:$0xff]   ;;  %v3474_v2 = vrot.slane %v6140_v58, 1  ;;  %v3529_v22 = vrot.slane %v6140_v58, 5  ;;  %v4866_v41 = vld [vmem:[%s6308_s9 + $0x50] sm:$0xff]  }
 0x4ed   :  { %v3343_v49 = vpop.f32.mrf.mxu0  ;;  %4553 = vmatprep.subr.bf16.mxu1 %v4862_v38  ;;  %v3523_v7 = vrot.slane %v6140_v58, 4  ;;  %v3489_v11 = vrot.slane %v6140_v58, 2  ;;  %v3546_v18 = vrot.slane %v6140_v58, 6  ;;  %v3563_v6 = vrot.slane %v6140_v58, 7 }
 0x4ee   :  { %v3351_v39 = vmax.f32 %v3339_v13, %v3347_v5  ;;  %v3342_v40 = vadd.f32 %v3341_v17, %v3293_v25  ;;  %4554 = vmatpush3.bf16.msra.mxu1 %v4863_v15  ;;  %v4867_v5 = vld [vmem:[%s6308_s9 + $0x10] sm:$0xff]   ;;  %v4868_v49 = vld [vmem:[%s6308_s9 + $0x48] sm:$0xff]   ;;  %v4873_v15 = vld [vmem:[%s6308_s9 + $0xb8] sm:$0xff]  }
 0x4ef   :  { %4555 = vmatprep.subr.bf16.mxu1 %v4864_v23  ;;  %v4888_v23 = vld [vmem:[%s6308_s9 + $0x80] sm:$0xff]  }
 0x4f0   :  { %v3348_v46 = vmul.f32 0.1, %v3342_v40  ;;  %v3362_v47 = vsel %vm98_vm2, %v3360_v53, %v3351_v39  ;;  %v3419_v14 = vrot.slane %v3351_v39, 4  ;;  %v3377_v45 = vrot.slane %v3351_v39, 1 }
 0x4f1   :  { %v3370_v50 = vrot.slane %v3362_v47, %v6114_v27  ;;  %v3436_v52 = vrot.slane %v3351_v39, 5  ;;  %v3395_v56 = vrot.slane %v3351_v39, 2  ;;  %v3354_v32 = vrot.slane %v3351_v39, 7 }
 0x4f2   :  { %v3421_v54 = vsel %vm98_vm2, %v3417_v44, %v3419_v14  ;;  %v3379_v55 = vsel %vm98_vm2, %v3375_v9, %v3377_v45  ;;  %v6136_v3 = vmax.f32 %v3342_v40, %v3348_v46  ;;  %v3453_v8 = vrot.slane %v3351_v39, 6  ;;  %4556 = vmatpush3.bf16.msra.mxu1 %v4865_v26  ;;  %v4869_v44 = vld [vmem:[%s6308_s9 + $0x8] sm:$0xff]   ;;  %v4870_v46 = vld [vmem:[%s6308_s9 + $0x40] sm:$0xff]  }
 0x4f3   :  { %3371 = vrot.lane.b32.xlu0 %v3370_v50, %s4911_s21  ;;  %v3429_v57 = vrot.slane %v3421_v54, %v6114_v27  ;;  %v3438_v60 = vsel %vm98_vm2, %v3434_v59, %v3436_v52  ;;  %v3387_v29 = vrot.slane %v3379_v55, %v6114_v27  ;;  %v3397_v62 = vsel %vm98_vm2, %v3393_v61, %v3395_v56  ;;  %v4871_v45 = vld [vmem:[%s6308_s9] sm:$0xff]   ;;  %v4872_v59 = vld [vmem:[%s6308_s9 + $0xf8] sm:$0xff]  }
 0x4f4   :  { %v3356_v0 = vsel %vm98_vm2, %v6105_v37, %v3354_v32  ;;  %v3446_v51 = vrot.slane %v3438_v60, %v6114_v27  ;;  %v3413_v19 = vrot.slane %v3351_v39, 3  ;;  %v3469_v36 = vrot.slane %v6136_v3, 7  ;;  %4557 = vmatprep.subr.bf16.mxu1 %v4866_v41  ;;  %v4196_v41 = vld [vmem:[%s6309_s10] ss:$0 sm:$0xff] }
 0x4f5   :  { %3430 = vrot.lane.b32.xlu1 %v3429_v57, %s4911_s21  ;;  %3358 = vst.msk [vmem:[#allocation6] sm:$0x3] %vm3357_vm1, %v3356_v0  ;;  %v3455_v31 = vsel %vm98_vm2, %v3451_v28, %v3453_v8  ;;  %v3531_v33 = vrot.slane %v6136_v3, 4  ;;  %v3405_v34 = vrot.slane %v3397_v62, %v6114_v27  ;;  %v3476_v4 = vsel %vm98_vm2, %v3474_v2, %v6136_v3  ;;  %v4878_v2 = vld [vmem:[%s6308_s9 + $0xa8] sm:$0xff]  }
 0x4f6   :  { %v3415_v24 = vsel %vm98_vm2, %v3411_v1, %v3413_v19  ;;  %v3491_v10 = vrot.slane %v6136_v3, 1  ;;  %v3471_v16 = vsel %vm98_vm2, %v6140_v58, %v3469_v36  ;;  %v3525_v21 = vrot.slane %v6136_v3, 3  ;;  %4558 = vmatpush3.bf16.msra.mxu1 %v4867_v5  ;;  %v4875_v1 = vld [vmem:[%s6308_s9 + $0xf0] sm:$0xff]  }
 0x4f7   :  { %3388 = vrot.lane.b32.xlu0 %v3387_v29, %s4913_s13  ;;  %3416 = vst.msk [vmem:[#allocation6 + $0x2] sm:$0x3] %vm3357_vm1, %v3415_v24  ;;  %v3463_v30 = vrot.slane %v3455_v31, %v6114_v27  ;;  %3472 = vst.msk [vmem:[#allocation6 + $0x4] sm:$0x3] %vm3357_vm1, %v3471_v16  ;;  %v3533_v12 = vsel %vm98_vm2, %v3529_v22, %v3531_v33  ;;  %v3548_v37 = vrot.slane %v6136_v3, 5  ;;  %v3508_v17 = vrot.slane %v6136_v3, 2 }
 0x4f8   :  { %v3527_v13 = vsel %vm98_vm2, %v3523_v7, %v3525_v21  ;;  %v3484_v42 = vrot.slane %v3476_v4, %v6114_v27  ;;  %v3493_v48 = vsel %vm98_vm2, %v3489_v11, %v3491_v10  ;;  %v3541_v25 = vrot.slane %v3533_v12, %v6114_v27  ;;  %4559 = vmatprep.subr.bf16.mxu1 %v4868_v49  ;;  %v4877_v31 = vld [vmem:[%s6308_s9 + $0xe8] sm:$0xff]   ;;  %v4879_v33 = vld [vmem:[%s6308_s9 + $0xe0] sm:$0xff]   ;;  %v4881_v22 = vld [vmem:[%s6308_s9 + $0xd8] sm:$0xff]  }
 0x4f9   :  { %3447 = vrot.lane.b32.xlu1 %v3446_v51, %s4913_s13  ;;  %3528 = vst.msk [vmem:[#allocation6 + $0x6] sm:$0x3] %vm3357_vm1, %v3527_v13  ;;  %v3550_v39 = vsel %vm98_vm2, %v3546_v18, %v3548_v37  ;;  %v3506_v40 = vrot.slane %v6140_v58, 3  ;;  %v3565_v53 = vrot.slane %v6136_v3, 6  ;;  %v3501_v20 = vrot.slane %v3493_v48, %v6114_v27  ;;  %v4882_v24 = vld [vmem:[%s6308_s9 + $0x98] sm:$0xff]   ;;  %v4883_v7 = vld [vmem:[%s6308_s9 + $0xd0] sm:$0xff]  }
 0x4fa   :  { %v3558_v9 = vrot.slane %v3550_v39, %v6114_v27  ;;  %4560 = vmatpush3.bf16.msra.mxu1 %v4869_v44  ;;  %v4884_v4 = vld [vmem:[%s6308_s9 + $0x90] sm:$0xff]   ;;  %v4885_v10 = vld [vmem:[%s6308_s9 + $0xc8] sm:$0xff]   ;;  %v4887_v21 = vld [vmem:[%s6308_s9 + $0xc0] sm:$0xff]  }
 0x4fb   :  { %3406 = vrot.lane.b32.xlu0 %v3405_v34, %s4914_s26  ;;  %v3510_v43 = vsel %vm98_vm2, %v3506_v40, %v3508_v17  ;;  %v3567_v47 = vsel %vm98_vm2, %v3563_v6, %v3565_v53  ;;  %4561 = vmatprep.subr.bf16.mxu1 %v4870_v46  ;;  %vm3391_vm2 = vcmask 779776   ;;  %v4880_v34 = vld [vmem:[%s6308_s9 + $0xa0] sm:$0xff]   ;;  %v4886_v16 = vld [vmem:[%s6308_s9 + $0x88] sm:$0xff]  }
 0x4fc   :  { %v3518_v14 = vrot.slane %v3510_v43, %v6114_v27  ;;  %v3575_v50 = vrot.slane %v3567_v47, %v6114_v27 }
 0x4fd   :  { %3464 = vrot.lane.b32.xlu1 %v3463_v30, %s4914_s26 }
 0x4fe   :  { %4562 = vmatpush3.bf16.msra.mxu1 %v4871_v45 }
 0x4ff   :  { %3485 = vrot.lane.b32.xlu0 %v3484_v42, %s4911_s21  ;;  %4569 = vmatprep.subr.bf16.mxu1 %v4872_v59 }
 0x501   :  { %3542 = vrot.lane.b32.xlu1 %v3541_v25, %s4911_s21 }
 0x503   :  { %3502 = vrot.lane.b32.xlu0 %v3501_v20, %s4913_s13 }
 0x505   :  { %3559 = vrot.lane.b32.xlu1 %v3558_v9, %s4913_s13 }
 0x507   :  { %3519 = vrot.lane.b32.xlu0 %v3518_v14, %s4914_s26 }
 0x509   :  { %3576 = vrot.lane.b32.xlu1 %v3575_v50, %s4914_s26 }
 0x565   :  { %v3372_v52 = vpop.permute.xlu0 %3371 }
 0x566   :  { %3374 = vst.msk [vmem:[#allocation6] sm:$0x3] %vm68_vm12, %v3372_v52 }
 0x567   :  { %v3431_v54 = vpop.permute.xlu1 %3430 }
 0x568   :  { %3433 = vst.msk [vmem:[#allocation6 + $0x2] sm:$0x3] %vm68_vm12, %v3431_v54 }
 0x569   :  { %v3389_v55 = vpop.permute.xlu0 %3388 }
 0x56a   :  { %3392 = vst.msk [vmem:[#allocation6] sm:$0x3] %vm3391_vm2, %v3389_v55 }
 0x56b   :  { %v3448_v56 = vpop.permute.xlu1 %3447 }
 0x56c   :  { %3450 = vst.msk [vmem:[#allocation6 + $0x2] sm:$0x3] %vm3391_vm2, %v3448_v56 }
 0x56d   :  { %v3407_v32 = vpop.permute.xlu0 %3406 }
 0x56e   :  { %3410 = vst.msk [vmem:[#allocation6] sm:$0x3] %vm3409_vm11, %v3407_v32 }
 0x56f   :  { %v3465_v35 = vpop.permute.xlu1 %3464 }
 0x570   :  { %3467 = vst.msk [vmem:[#allocation6 + $0x2] sm:$0x3] %vm3409_vm11, %v3465_v35 }
 0x571   :  { %v3486_v63 = vpop.permute.xlu0 %3485 }
 0x572   :  { %3488 = vst.msk [vmem:[#allocation6 + $0x4] sm:$0x3] %vm68_vm12, %v3486_v63 }
 0x573   :  { %v3543_v3 = vpop.permute.xlu1 %3542 }
 0x574   :  { %3545 = vst.msk [vmem:[#allocation6 + $0x6] sm:$0x3] %vm68_vm12, %v3543_v3 }
 0x575   :  { %v3503_v57 = vpop.permute.xlu0 %3502 }
 0x576   :  { %3505 = vst.msk [vmem:[#allocation6 + $0x4] sm:$0x3] %vm3391_vm2, %v3503_v57 }
 0x577   :  { %v3560_v58 = vpop.permute.xlu1 %3559 }
 0x578   :  { %3562 = vst.msk [vmem:[#allocation6 + $0x6] sm:$0x3] %vm3391_vm2, %v3560_v58 }
 0x579   :  { %v3520_v60 = vpop.permute.xlu0 %3519 }
 0x57a   :  { %3522 = vst.msk [vmem:[#allocation6 + $0x4] sm:$0x3] %vm3409_vm11, %v3520_v60 }
 0x57b   :  { %v3577_v61 = vpop.permute.xlu1 %3576 }
 0x57c   :  { %3579 = vst.msk [vmem:[#allocation6 + $0x6] sm:$0x3] %vm3409_vm11, %v3577_v61 }
 0x583   :  { %v3580_v8 = vld [vmem:[#allocation6] sm:$0xff] }
 0x584   :  { %v3589_v29 = vrot.slane %v3580_v8, %v6114_v27  ;;  %v3582_v62 = vcombine.high %v3580_v8, %v3580_v8 }
 0x586   :  { %v3597_v28 = vcombine.high %v3589_v29, %v3589_v29  ;;  %v3596_v0 = vrot.slane %v3582_v62, %v6114_v27  ;;  %v3603_v19 = vpack.c.bf16 %v3589_v29, %v3589_v29  ;;  %v4876_v27 = vld [vmem:[%s6308_s9 + $0xb0] sm:$0xff]   ;;  %s4889_s9 = scalar_lea.vmem %s3958_s23, 32 }
 0x587   :  { %p4890_p0 = scmp.ne.s32.totalorder %s3958_s23, %s4889_s9  ;;  %p4895_p2 = scmp.lt.s32.totalorder %s4889_s9, %s4889_s9 }
 0x588   :  { %v3604_v38 = vpack.c.bf16 %v3597_v28, %v3597_v28  ;;  %v3598_v51 = vcombine.high %v3596_v0, %v3596_v0  ;;  %v3605_v26 = vpack.c.bf16 %v3596_v0, %v3596_v0 }
 0x589   :  { %p4896_p3 = por %p4895_p2, %p4894_p1 }
 0x58a   :  { %3902 = vmatprep.mubr.bf16.mxu1 %v3604_v38  ;;  %v3606_v36 = vpack.c.bf16 %v3598_v51, %v3598_v51 }
 0x58b   :  { %3903 = vmatmul.mubr.bf16.vlgmr.msra.gmra.mxu1 %v3603_v19  ;;  %p4897_p4 = pnand %p4896_p3, %p4890_p0 }
 0x58c   :  { %4570 = vmatpush3.bf16.msra.mxu1 %v4873_v15  ;;  %3942 = vmatprep.mubr.bf16.mxu1 %v3606_v36 }
 0x58d   :  { %4571 = vmatprep.subr.bf16.mxu1 %v4875_v1 }
 0x590   :  { %4572 = vmatpush3.bf16.msra.mxu1 %v4876_v27 }
 0x591   :  { %4573 = vmatprep.subr.bf16.mxu1 %v4877_v31 }
 0x594   :  { %4574 = vmatpush3.bf16.msra.mxu1 %v4878_v2 }
 0x595   :  { %4575 = vmatprep.subr.bf16.mxu1 %v4879_v33 }
 0x598   :  { %4576 = vmatpush3.bf16.msra.mxu1 %v4880_v34 }
 0x599   :  { %4577 = vmatprep.subr.bf16.mxu1 %v4881_v22 }
 0x59c   :  { %4578 = vmatpush3.bf16.msra.mxu1 %v4882_v24 }
 0x59d   :  { %4579 = vmatprep.subr.bf16.mxu1 %v4883_v7 }
 0x5a0   :  { %4580 = vmatpush3.bf16.msra.mxu1 %v4884_v4 }
 0x5a1   :  { %4581 = vmatprep.subr.bf16.mxu1 %v4885_v10 }
 0x5a4   :  { %4582 = vmatpush3.bf16.msra.mxu1 %v4886_v16 }
 0x5a5   :  { %4583 = vmatprep.subr.bf16.mxu1 %v4887_v21 }
 0x5a8   :  { %4584 = vmatpush3.bf16.msra.mxu1 %v4888_v23 }
 0x5ab   :  { %3943 = vmatmul.mubr.bf16.vlgmr.msra.gmra.mxu1 %v3605_v26 }
 0x64b   :  { %v4563_v30 = vpop.f32.mrf.mxu1 }
 0x64d   :  { %v4564_v12 = vpop.f32.mrf.mxu1 }
 0x64e   :  { %v4565_v13 = vadd.f32 %v4564_v12, %v4563_v30 }
 0x64f   :  { %v4566_v11 = vpop.f32.mrf.mxu1 }
 0x650   :  { %v3905_v18 = vadd.f32 %v4565_v13, %v4196_v41 }
 0x651   :  { %v4567_v37 = vpop.f32.mrf.mxu1 }
 0x66b   :  { %v4585_v42 = vpop.f32.mrf.mxu1 }
 0x66d   :  { %v4586_v48 = vpop.f32.mrf.mxu1 }
 0x66e   :  { %v4587_v17 = vadd.f32 %v4586_v48, %v4585_v42 }
 0x66f   :  { %v4588_v5 = vpop.f32.mrf.mxu1 }
 0x670   :  { %v3945_v25 = vadd.f32 %v4587_v17, %v3905_v18 }
 0x671   :  { %v4589_v49 = vpop.f32.mrf.mxu1 }
 0x672   :  { %3950 = vst.msk [vmem:[#allocation7] sm:$0x3] %vm3357_vm1, %v3945_v25 }
 0x673   :  { %4900 = shalt.err (!%p4897_p4)
}
 0x674   :  { %3960 = dma.vmem_to_hbm [thread:$0]  %s3958_s23, 32, %s6310_s11, [#allocation8]  }
 0x675   :  { %4909 = dma.done.wait [#allocation8], 32  }
 0x676   :  { %4910 = vsyncadd [#allocation8], 4294967264 }
 0x677   :  { %3964 = vsyncpa [#allocation8], 1 }

</bundles_post_ra>
